<compile_context>
chip_gen: v7x
topology: tpu7x:2x2x1
jax: 0.10.0
libtpu: 0.0.40
codegen_flags: <defaults>
</compile_context>

<pallas_src>
import functools

import numpy as np
import jax
import jax.numpy as jnp
from jax import lax
from jax.experimental import pallas as pl
from jax.experimental.pallas import tpu as pltpu


# ----------------------------- in-kernel helpers -----------------------------

def _ksigmoid(x):
    # exp rides the EUP; approximate reciprocal also uses the EUP slot (no VPU divide).
    return pl.reciprocal(1.0 + jnp.exp(-x), approx=True)


def _kswish(x):
    return x * _ksigmoid(x)


# --------------------------------- kernel ------------------------------------

def _mbconv_kernel(x_ref, wexp_ref, exps_ref, expb_ref,
                   wdwm_ref, dws_ref, dwb_ref,
                   wse1_ref, bse1_ref, wse2_ref, bse2_ref,
                   wout_ref, outs_ref, outb_ref,
                   o_ref, *, H, W, ks, pad_top, pad_left, skip, b_tile):
    HW = H * W
    L = b_tile * HW                                   # batched lane extent

    xt = x_ref[...]                                   # (ni, L) bf16, lane-dense

    # ---- 1x1 expand conv + folded BN + Swish (bf16 MXU, f32 accumulation) ----
    e = jnp.dot(wexp_ref[...], xt, preferred_element_type=jnp.float32)     # (ne, L)
    e = _kswish(e * exps_ref[...] + expb_ref[...])

    # ---- depthwise conv, TF-"SAME", stride 1 ----
    # Each tap is a static lane rotation (XLU) of the expanded activations times a
    # host-fused (weight * edge-mask) tensor; the mask is tiled per image so wrap
    # contributions across adjacent images in the lane axis are zeroed.
    # Three independent partial sums break the serial VPU dependence chain.
    n_chains = 3
    chains = [None] * n_chains
    for t in range(ks * ks):
        dh, dw = t // ks, t % ks
        off = (dh - pad_top) * W + (dw - pad_left)
        shifted = e if off == 0 else pltpu.roll(e, shift=(-off) % L, axis=1)
        term = shifted * wdwm_ref[t]                  # (ne, L)
        c = t % n_chains
        chains[c] = term if chains[c] is None else chains[c] + term
    acc = chains[0]
    for extra in chains[1:]:
        if extra is not None:
            acc = acc + extra
    d = _kswish(acc * dws_ref[...] + dwb_ref[...])    # (ne, L) f32

    # ---- Squeeze & Excitation: per-image segmented pool + gate (VPU/EUP only) ----
    gated = []
    for b in range(b_tile):
        db = lax.slice_in_dim(d, b * HW, (b + 1) * HW, axis=1)              # (ne, HW)
        pooled = jnp.sum(db, axis=1, keepdims=True) * (1.0 / HW)            # (ne, 1)
        s1 = jnp.sum(pooled * wse1_ref[...], axis=0, keepdims=True) + bse1_ref[...]   # (1, ns)
        s1 = _kswish(s1)
        s2 = jnp.sum(s1 * wse2_ref[...], axis=1, keepdims=True) + bse2_ref[...]       # (ne, 1)
        gated.append(db * _ksigmoid(s2))
    dg = gated[0] if b_tile == 1 else jnp.concatenate(gated, axis=1)         # (ne, L)

    # ---- 1x1 projection conv + folded BN (no activation) ----
    o = jnp.dot(wout_ref[...], dg.astype(jnp.bfloat16),
                preferred_element_type=jnp.float32)   # (nf, L)
    o = o * outs_ref[...] + outb_ref[...]
    if skip:
        o = o + xt.astype(jnp.float32)                # residual (ni == nf, stride == 1)
    o_ref[...] = o.astype(o_ref.dtype)


# --------------------------------- wrapper -----------------------------------

def _pick_batch_tile(N, HW, ne, ks, *, max_lanes=2048, wdwm_budget=4 << 20):
    """Largest divisor of N that (a) keeps the lane extent modest (vreg/VMEM pressure,
    v7x's smaller VMEM), (b) keeps the resident fused-tap tensor small, and (c) leaves
    >= 2 grid steps whenever N >= 2 so both v7x TensorCores get work."""
    best = 1
    for c in range(1, N + 1):
        if N % c:
            continue
        if c * HW > max_lanes:
            continue
        if ks * ks * ne * c * HW * 4 > wdwm_budget:
            continue
        if N >= 2 and N // c < 2:
            continue
        best = c
    return best


def mbconv_forward(x_nchw, params, *, ks, stride, skip, b_tile=None):
    """x_nchw: (N, ni, H, W) float32 (PyTorch layout). Returns (N, nf, Ho, Wo)."""
    # TODO(synk): stride>1 (downsampling, non-skip) MBConv path not implemented.
    assert stride == 1, "this kernel implements the stride==1 (skip-capable) path"
    N, ni, H, W = x_nchw.shape
    (w_exp, exp_s, exp_b, w_dw, dw_s, dw_b,
     w_se1, b_se1, w_se2, b_se2, w_out, out_s, out_b) = params
    ne = w_exp.shape[1]
    nf = w_out.shape[1]
    if skip:
        assert ni == nf, "skip connection requires ni == nf"

    HW = H * W
    Ho, Wo = -(-H // stride), -(-W // stride)
    pad_h = max((Ho - 1) * stride + ks - H, 0)
    pad_w = max((Wo - 1) * stride + ks - W, 0)
    pad_top, pad_left = pad_h // 2, pad_w // 2   # asymmetric SAME padding handled by masks

    if b_tile is None:
        b_tile = _pick_batch_tile(N, HW, ne, ks)
    assert N % b_tile == 0
    L = b_tile * HW
    G = N // b_tile

    # Per-tap validity masks for TF-"SAME" padding, precomputed on the host.
    hh, ww = np.meshgrid(np.arange(H), np.arange(W), indexing="ij")
    mask_rows = []
    for dh in range(ks):
        for dw in range(ks):
            sh, sw = dh - pad_top, dw - pad_left
            m = ((hh + sh >= 0) & (hh + sh < H) & (ww + sw >= 0) & (ww + sw < W))
            mask_rows.append(m.reshape(-1))
    masks_np = np.stack(mask_rows).astype(np.float32)                   # (ks*ks, HW)

    # Fused per-tap (weight * mask) tensor, tiled per image along the lane axis so the
    # lane-roll wrap between adjacent images in a batched block is masked to zero.
    wdwm = jnp.tile(w_dw.astype(jnp.float32)[:, :, None] *
                    jnp.asarray(masks_np)[:, None, :], (1, 1, b_tile))  # (ks*ks, ne, L)

    # Layout plumbing (one-time, wrapper side): channel-on-sublane, images folded into
    # the lane axis, bf16 activations on the wire.
    x_cl = jnp.transpose(x_nchw.reshape(N, ni, HW).astype(jnp.float32),
                         (1, 0, 2)).reshape(ni, N * HW).astype(jnp.bfloat16)

    wexp_t = w_exp.T.astype(jnp.bfloat16)                               # (ne, ni)
    exps_c, expb_c = exp_s.reshape(ne, 1), exp_b.reshape(ne, 1)
    dws_c, dwb_c = dw_s.reshape(ne, 1), dw_b.reshape(ne, 1)
    wse1 = w_se1.astype(jnp.float32)                                    # (ne, ns)
    bse1 = b_se1.astype(jnp.float32)                                    # (1, ns)
    wse2_t = w_se2.T.astype(jnp.float32)                                # (ne, ns)
    bse2_c = b_se2.reshape(ne, 1)
    wout_t = w_out.T.astype(jnp.bfloat16)                               # (nf, ne)
    outs_c, outb_c = out_s.reshape(nf, 1), out_b.reshape(nf, 1)

    kernel = functools.partial(_mbconv_kernel, H=H, W=W, ks=ks,
                               pad_top=pad_top, pad_left=pad_left,
                               skip=skip, b_tile=b_tile)

    def resident(a):  # full-array block, constant index_map -> DMA'd once, stays in VMEM
        return pl.BlockSpec(a.shape, lambda g: (0,) * a.ndim)

    weight_bytes = int(sum(np.prod(a.shape) * a.dtype.itemsize for a in
                           (wdwm, wexp_t, exps_c, expb_c, dws_c, dwb_c,
                            wse1, bse1, wse2_t, bse2_c, wout_t, outs_c, outb_c)))
    cost = pl.CostEstimate(
        flops=2 * N * HW * (ni * ne + ne * nf + ks * ks * ne),
        transcendentals=4 * N * HW * ne,
        bytes_accessed=N * HW * (ni * 2 + nf * 4) + weight_bytes,
    )

    out_cl = pl.pallas_call(
        kernel,
        out_shape=jax.ShapeDtypeStruct((nf, N * HW), jnp.float32),
        grid=(G,),
        in_specs=[pl.BlockSpec((ni, L), lambda g: (0, g)),
                  resident(wexp_t), resident(exps_c), resident(expb_c),
                  resident(wdwm), resident(dws_c), resident(dwb_c),
                  resident(wse1), resident(bse1), resident(wse2_t), resident(bse2_c),
                  resident(wout_t), resident(outs_c), resident(outb_c)],
        out_specs=pl.BlockSpec((nf, L), lambda g: (0, g)),
        compiler_params=pltpu.CompilerParams(
            dimension_semantics=("parallel",),
            vmem_limit_bytes=32 * 1024 * 1024),
        cost_estimate=cost,
    )(x_cl, wexp_t, exps_c, expb_c, wdwm, dws_c, dwb_c,
      wse1, bse1, wse2_t, bse2_c, wout_t, outs_c, outb_c)

    return jnp.transpose(out_cl.reshape(nf, N, Ho, Wo), (1, 0, 2, 3))


# ----------------------------- pure-JAX reference ----------------------------

def mbconv_ref(x_nchw, params, *, ks, stride, skip):
    """Pure-JAX reference (f32, highest precision)."""
    x = jnp.transpose(x_nchw, (0, 2, 3, 1)).astype(jnp.float32)
    (w_exp, exp_s, exp_b, w_dw, dw_s, dw_b,
     w_se1, b_se1, w_se2, b_se2, w_out, out_s, out_b) = params
    ne = w_exp.shape[1]
    N, H, W, _ = x.shape
    Ho, Wo = -(-H // stride), -(-W // stride)
    pad_h = max((Ho - 1) * stride + ks - H, 0)
    pad_w = max((Wo - 1) * stride + ks - W, 0)

    e = jnp.einsum('nhwc,ce->nhwe', x, w_exp, precision='highest') * exp_s + exp_b
    e = e * jax.nn.sigmoid(e)

    rhs = w_dw.reshape(ks, ks, 1, ne)
    d = lax.conv_general_dilated(
        e, rhs, window_strides=(stride, stride),
        padding=((pad_h // 2, pad_h - pad_h // 2),
                 (pad_w // 2, pad_w - pad_w // 2)),
        dimension_numbers=('NHWC', 'HWIO', 'NHWC'),
        feature_group_count=ne, precision=lax.Precision.HIGHEST)
    d = d * dw_s.reshape(1, 1, 1, ne) + dw_b.reshape(1, 1, 1, ne)
    d = d * jax.nn.sigmoid(d)

    pooled = jnp.mean(d, axis=(1, 2))
    s1 = jnp.dot(pooled, w_se1, precision='highest') + b_se1
    s1 = s1 * jax.nn.sigmoid(s1)
    gate = jax.nn.sigmoid(jnp.dot(s1, w_se2, precision='highest') + b_se2)
    d = d * gate[:, None, None, :]

    o = jnp.einsum('nhwc,cf->nhwf', d, w_out, precision='highest') * out_s + out_b
    if skip:
        o = o + x
    return jnp.transpose(o, (0, 3, 1, 2))


# ----------------------------- parameter builder -----------------------------

def init_params(key, ni, expand_ratio, nf, ks, se_ratio, eps=1e-3):
    """Deterministic synthetic parameters (BatchNorms folded to scale/bias)."""
    ne = ni * expand_ratio
    ns = max(1, int(ni * se_ratio))
    keys = jax.random.split(key, 10)

    def folded_bn(k, c):
        gamma = jnp.ones((1, c), jnp.float32)      # conv_layer init: bn.weight = 1
        beta = jnp.zeros((1, c), jnp.float32)      # bn.bias default = 0
        mean = 0.1 * jax.random.normal(k, (1, c), jnp.float32)
        var = jax.random.uniform(jax.random.fold_in(k, 1), (1, c),
                                 jnp.float32, 0.5, 1.5)
        scale = gamma / jnp.sqrt(var + eps)
        bias = beta - mean * scale
        return scale, bias

    w_exp = 0.2 * jax.random.normal(keys[0], (ni, ne), jnp.float32)
    exp_s, exp_b = folded_bn(keys[1], ne)
    w_dw = 0.2 * jax.random.normal(keys[2], (ks * ks, ne), jnp.float32)
    dw_s, dw_b = folded_bn(keys[3], ne)
    w_se1 = 0.2 * jax.random.normal(keys[4], (ne, ns), jnp.float32)
    b_se1 = 0.1 * jax.random.normal(keys[5], (1, ns), jnp.float32)
    w_se2 = 0.2 * jax.random.normal(keys[6], (ns, ne), jnp.float32)
    b_se2 = 0.1 * jax.random.normal(keys[7], (1, ne), jnp.float32)
    w_out = 0.2 * jax.random.normal(keys[8], (ne, nf), jnp.float32)
    out_s, out_b = folded_bn(keys[9], nf)
    return (w_exp, exp_s, exp_b, w_dw, dw_s, dw_b,
            w_se1, b_se1, w_se2, b_se2, w_out, out_s, out_b)


if __name__ == "__main__":
    # MBConv(ni=8, nf=8, expand_ratio=4, ks=3, stride=1, se=0.25, skip=True)
    ni, expand_ratio, nf, kern, stride, se_ratio = 8, 4, 8, 3, 1, 0.25
    skip = (stride == 1) and (ni == nf)
    N, H, W = 8, 16, 16   # N=8 -> B_tile=4 images per grid step, grid=(2,) (both v7x TCs)

    key = jax.random.PRNGKey(0)
    kx, kp = jax.random.split(key)
    x = jax.random.normal(kx, (N, ni, H, W), jnp.float32)   # NCHW (PyTorch layout)
    params = init_params(kp, ni, expand_ratio, nf, kern, se_ratio)

    out = mbconv_forward(x, params, ks=kern, stride=stride, skip=skip)
    out = jax.block_until_ready(out)

    ref = mbconv_ref(x, params, ks=kern, stride=stride, skip=skip)
    assert out.shape == ref.shape == (N, nf, H, W)
    err = float(jnp.max(jnp.abs(out - ref)))
    # Tolerance widened vs. the f32 'highest' reference: bf16 activations/MXU inputs +
    # approx-reciprocal sigmoid in the kernel.
    if not jnp.allclose(out, ref, atol=5e-2, rtol=5e-2):
        raise AssertionError(f"kernel/reference mismatch, max abs err = {err}")
    print("KERNEL_OK")
</pallas_src>

<mosaic_0001>
module attributes {stable_mosaic.version = 11 : i64} {
  func.func @_mbconv_kernel(%arg0: i32, %arg1: memref<8x1024xbf16, #tpu.memory_space<vmem>>, %arg2: memref<32x8xbf16, #tpu.memory_space<vmem>>, %arg3: memref<32x1xf32, #tpu.memory_space<vmem>>, %arg4: memref<32x1xf32, #tpu.memory_space<vmem>>, %arg5: memref<9x32x1024xf32, #tpu.memory_space<vmem>>, %arg6: memref<32x1xf32, #tpu.memory_space<vmem>>, %arg7: memref<32x1xf32, #tpu.memory_space<vmem>>, %arg8: memref<32x2xf32, #tpu.memory_space<vmem>>, %arg9: memref<1x2xf32, #tpu.memory_space<vmem>>, %arg10: memref<32x2xf32, #tpu.memory_space<vmem>>, %arg11: memref<32x1xf32, #tpu.memory_space<vmem>>, %arg12: memref<8x32xbf16, #tpu.memory_space<vmem>>, %arg13: memref<8x1xf32, #tpu.memory_space<vmem>>, %arg14: memref<8x1xf32, #tpu.memory_space<vmem>>, %arg15: memref<8x1024xf32, #tpu.memory_space<vmem>>) attributes {dimension_semantics = [#tpu.dimension_semantics<parallel>], iteration_bounds = array<i64: 2>, scalar_prefetch = 0 : i64, scratch_operands = 0 : i64, tpu.core_type = #tpu.core_type<tc>, window_params = [{transform_indices = @transform_0, window_bounds = array<i64: 8, 1024>}, {pipeline_mode = #tpu.pipeline_mode<synchronous>, transform_indices = @transform_1, window_bounds = array<i64: 32, 8>}, {pipeline_mode = #tpu.pipeline_mode<synchronous>, transform_indices = @transform_2, window_bounds = array<i64: 32, 1>}, {pipeline_mode = #tpu.pipeline_mode<synchronous>, transform_indices = @transform_3, window_bounds = array<i64: 32, 1>}, {pipeline_mode = #tpu.pipeline_mode<synchronous>, transform_indices = @transform_4, window_bounds = array<i64: 9, 32, 1024>}, {pipeline_mode = #tpu.pipeline_mode<synchronous>, transform_indices = @transform_5, window_bounds = array<i64: 32, 1>}, {pipeline_mode = #tpu.pipeline_mode<synchronous>, transform_indices = @transform_6, window_bounds = array<i64: 32, 1>}, {pipeline_mode = #tpu.pipeline_mode<synchronous>, transform_indices = @transform_7, window_bounds = array<i64: 32, 2>}, {pipeline_mode = #tpu.pipeline_mode<synchronous>, transform_indices = @transform_8, window_bounds = array<i64: 1, 2>}, {pipeline_mode = #tpu.pipeline_mode<synchronous>, transform_indices = @transform_9, window_bounds = array<i64: 32, 2>}, {pipeline_mode = #tpu.pipeline_mode<synchronous>, transform_indices = @transform_10, window_bounds = array<i64: 32, 1>}, {pipeline_mode = #tpu.pipeline_mode<synchronous>, transform_indices = @transform_11, window_bounds = array<i64: 8, 32>}, {pipeline_mode = #tpu.pipeline_mode<synchronous>, transform_indices = @transform_12, window_bounds = array<i64: 8, 1>}, {pipeline_mode = #tpu.pipeline_mode<synchronous>, transform_indices = @transform_13, window_bounds = array<i64: 8, 1>}, {transform_indices = @transform_14, window_bounds = array<i64: 8, 1024>}]} {
    %c0 = arith.constant 0 : index
    %c0_0 = arith.constant 0 : index
    %0 = vector.load %arg1[%c0, %c0_0] : memref<8x1024xbf16, #tpu.memory_space<vmem>>, vector<8x1024xbf16>
    %c0_1 = arith.constant 0 : index
    %c0_2 = arith.constant 0 : index
    %1 = vector.load %arg2[%c0_1, %c0_2] : memref<32x8xbf16, #tpu.memory_space<vmem>>, vector<32x8xbf16>
    %cst = arith.constant dense<0.000000e+00> : vector<32x1024xf32>
    %2 = tpu.matmul %1, %0, %cst {dimension_numbers = #tpu.dot_dimension_numbers<[1], [0], [0], [1], [0, 0, 1, 1], [], []>} : vector<32x8xbf16>, vector<8x1024xbf16>, vector<32x1024xf32> -> vector<32x1024xf32>
    %c0_3 = arith.constant 0 : index
    %c0_4 = arith.constant 0 : index
    %3 = vector.load %arg3[%c0_3, %c0_4] : memref<32x1xf32, #tpu.memory_space<vmem>>, vector<32x1xf32>
    %4 = vector.broadcast %3 : vector<32x1xf32> to vector<32x1024xf32>
    %5 = arith.mulf %2, %4 : vector<32x1024xf32>
    %c0_5 = arith.constant 0 : index
    %c0_6 = arith.constant 0 : index
    %6 = vector.load %arg4[%c0_5, %c0_6] : memref<32x1xf32, #tpu.memory_space<vmem>>, vector<32x1xf32>
    %7 = vector.broadcast %6 : vector<32x1xf32> to vector<32x1024xf32>
    %8 = arith.addf %5, %7 : vector<32x1024xf32>
    %cst_7 = arith.constant 0.000000e+00 : f32
    %9 = vector.broadcast %cst_7 : f32 to vector<32x1024xf32>
    %10 = arith.subf %9, %8 : vector<32x1024xf32>
    %11 = math.exp %10 : vector<32x1024xf32>
    %cst_8 = arith.constant 1.000000e+00 : f32
    %12 = vector.broadcast %cst_8 : f32 to vector<32x1024xf32>
    %13 = arith.addf %12, %11 : vector<32x1024xf32>
    %14 = tpu.reciprocal %13 {approx = true} : vector<32x1024xf32> -> vector<32x1024xf32>
    %15 = arith.mulf %8, %14 : vector<32x1024xf32>
    %c17_i32 = arith.constant 17 : i32
    %16 = tpu.dynamic_rotate %15 by %c17_i32 dim 1 : vector<32x1024xf32>, i32 -> vector<32x1024xf32>
    %c0_9 = arith.constant 0 : index
    %c0_10 = arith.constant 0 : index
    %c0_11 = arith.constant 0 : index
    %17 = vector.load %arg5[%c0_9, %c0_10, %c0_11] : memref<9x32x1024xf32, #tpu.memory_space<vmem>>, vector<1x32x1024xf32>
    %18 = vector.shape_cast %17 : vector<1x32x1024xf32> to vector<32x1024xf32>
    %19 = arith.mulf %16, %18 : vector<32x1024xf32>
    %c16_i32 = arith.constant 16 : i32
    %20 = tpu.dynamic_rotate %15 by %c16_i32 dim 1 : vector<32x1024xf32>, i32 -> vector<32x1024xf32>
    %c1 = arith.constant 1 : index
    %c0_12 = arith.constant 0 : index
    %c0_13 = arith.constant 0 : index
    %21 = vector.load %arg5[%c1, %c0_12, %c0_13] : memref<9x32x1024xf32, #tpu.memory_space<vmem>>, vector<1x32x1024xf32>
    %22 = vector.shape_cast %21 : vector<1x32x1024xf32> to vector<32x1024xf32>
    %23 = arith.mulf %20, %22 : vector<32x1024xf32>
    %c15_i32 = arith.constant 15 : i32
    %24 = tpu.dynamic_rotate %15 by %c15_i32 dim 1 : vector<32x1024xf32>, i32 -> vector<32x1024xf32>
    %c2 = arith.constant 2 : index
    %c0_14 = arith.constant 0 : index
    %c0_15 = arith.constant 0 : index
    %25 = vector.load %arg5[%c2, %c0_14, %c0_15] : memref<9x32x1024xf32, #tpu.memory_space<vmem>>, vector<1x32x1024xf32>
    %26 = vector.shape_cast %25 : vector<1x32x1024xf32> to vector<32x1024xf32>
    %27 = arith.mulf %24, %26 : vector<32x1024xf32>
    %c1_i32 = arith.constant 1 : i32
    %28 = tpu.dynamic_rotate %15 by %c1_i32 dim 1 : vector<32x1024xf32>, i32 -> vector<32x1024xf32>
    %c3 = arith.constant 3 : index
    %c0_16 = arith.constant 0 : index
    %c0_17 = arith.constant 0 : index
    %29 = vector.load %arg5[%c3, %c0_16, %c0_17] : memref<9x32x1024xf32, #tpu.memory_space<vmem>>, vector<1x32x1024xf32>
    %30 = vector.shape_cast %29 : vector<1x32x1024xf32> to vector<32x1024xf32>
    %31 = arith.mulf %28, %30 : vector<32x1024xf32>
    %32 = arith.addf %19, %31 : vector<32x1024xf32>
    %c4 = arith.constant 4 : index
    %c0_18 = arith.constant 0 : index
    %c0_19 = arith.constant 0 : index
    %33 = vector.load %arg5[%c4, %c0_18, %c0_19] : memref<9x32x1024xf32, #tpu.memory_space<vmem>>, vector<1x32x1024xf32>
    %34 = vector.shape_cast %33 : vector<1x32x1024xf32> to vector<32x1024xf32>
    %35 = arith.mulf %15, %34 : vector<32x1024xf32>
    %36 = arith.addf %23, %35 : vector<32x1024xf32>
    %c1023_i32 = arith.constant 1023 : i32
    %37 = tpu.dynamic_rotate %15 by %c1023_i32 dim 1 : vector<32x1024xf32>, i32 -> vector<32x1024xf32>
    %c5 = arith.constant 5 : index
    %c0_20 = arith.constant 0 : index
    %c0_21 = arith.constant 0 : index
    %38 = vector.load %arg5[%c5, %c0_20, %c0_21] : memref<9x32x1024xf32, #tpu.memory_space<vmem>>, vector<1x32x1024xf32>
    %39 = vector.shape_cast %38 : vector<1x32x1024xf32> to vector<32x1024xf32>
    %40 = arith.mulf %37, %39 : vector<32x1024xf32>
    %41 = arith.addf %27, %40 : vector<32x1024xf32>
    %c1009_i32 = arith.constant 1009 : i32
    %42 = tpu.dynamic_rotate %15 by %c1009_i32 dim 1 : vector<32x1024xf32>, i32 -> vector<32x1024xf32>
    %c6 = arith.constant 6 : index
    %c0_22 = arith.constant 0 : index
    %c0_23 = arith.constant 0 : index
    %43 = vector.load %arg5[%c6, %c0_22, %c0_23] : memref<9x32x1024xf32, #tpu.memory_space<vmem>>, vector<1x32x1024xf32>
    %44 = vector.shape_cast %43 : vector<1x32x1024xf32> to vector<32x1024xf32>
    %45 = arith.mulf %42, %44 : vector<32x1024xf32>
    %46 = arith.addf %32, %45 : vector<32x1024xf32>
    %c1008_i32 = arith.constant 1008 : i32
    %47 = tpu.dynamic_rotate %15 by %c1008_i32 dim 1 : vector<32x1024xf32>, i32 -> vector<32x1024xf32>
    %c7 = arith.constant 7 : index
    %c0_24 = arith.constant 0 : index
    %c0_25 = arith.constant 0 : index
    %48 = vector.load %arg5[%c7, %c0_24, %c0_25] : memref<9x32x1024xf32, #tpu.memory_space<vmem>>, vector<1x32x1024xf32>
    %49 = vector.shape_cast %48 : vector<1x32x1024xf32> to vector<32x1024xf32>
    %50 = arith.mulf %47, %49 : vector<32x1024xf32>
    %51 = arith.addf %36, %50 : vector<32x1024xf32>
    %c1007_i32 = arith.constant 1007 : i32
    %52 = tpu.dynamic_rotate %15 by %c1007_i32 dim 1 : vector<32x1024xf32>, i32 -> vector<32x1024xf32>
    %c8 = arith.constant 8 : index
    %c0_26 = arith.constant 0 : index
    %c0_27 = arith.constant 0 : index
    %53 = vector.load %arg5[%c8, %c0_26, %c0_27] : memref<9x32x1024xf32, #tpu.memory_space<vmem>>, vector<1x32x1024xf32>
    %54 = vector.shape_cast %53 : vector<1x32x1024xf32> to vector<32x1024xf32>
    %55 = arith.mulf %52, %54 : vector<32x1024xf32>
    %56 = arith.addf %41, %55 : vector<32x1024xf32>
    %57 = arith.addf %46, %51 : vector<32x1024xf32>
    %58 = arith.addf %57, %56 : vector<32x1024xf32>
    %c0_28 = arith.constant 0 : index
    %c0_29 = arith.constant 0 : index
    %59 = vector.load %arg6[%c0_28, %c0_29] : memref<32x1xf32, #tpu.memory_space<vmem>>, vector<32x1xf32>
    %60 = vector.broadcast %59 : vector<32x1xf32> to vector<32x1024xf32>
    %61 = arith.mulf %58, %60 : vector<32x1024xf32>
    %c0_30 = arith.constant 0 : index
    %c0_31 = arith.constant 0 : index
    %62 = vector.load %arg7[%c0_30, %c0_31] : memref<32x1xf32, #tpu.memory_space<vmem>>, vector<32x1xf32>
    %63 = vector.broadcast %62 : vector<32x1xf32> to vector<32x1024xf32>
    %64 = arith.addf %61, %63 : vector<32x1024xf32>
    %cst_32 = arith.constant 0.000000e+00 : f32
    %65 = vector.broadcast %cst_32 : f32 to vector<32x1024xf32>
    %66 = arith.subf %65, %64 : vector<32x1024xf32>
    %67 = math.exp %66 : vector<32x1024xf32>
    %cst_33 = arith.constant 1.000000e+00 : f32
    %68 = vector.broadcast %cst_33 : f32 to vector<32x1024xf32>
    %69 = arith.addf %68, %67 : vector<32x1024xf32>
    %70 = tpu.reciprocal %69 {approx = true} : vector<32x1024xf32> -> vector<32x1024xf32>
    %71 = arith.mulf %64, %70 : vector<32x1024xf32>
    %72 = vector.extract_strided_slice %71 {offsets = [0, 0], sizes = [32, 256], strides = [1, 1]} : vector<32x1024xf32> to vector<32x256xf32>
    %cst_34 = arith.constant dense<0.000000e+00> : vector<32xf32>
    %73 = vector.multi_reduction <add>, %72, %cst_34 [1] : vector<32x256xf32> to vector<32xf32>
    %74 = vector.shape_cast %73 : vector<32xf32> to vector<32x1xf32>
    %cst_35 = arith.constant 3.906250e-03 : f32
    %75 = vector.broadcast %cst_35 : f32 to vector<32x1xf32>
    %76 = arith.mulf %74, %75 : vector<32x1xf32>
    %c0_36 = arith.constant 0 : index
    %c0_37 = arith.constant 0 : index
    %77 = vector.load %arg8[%c0_36, %c0_37] : memref<32x2xf32, #tpu.memory_space<vmem>>, vector<32x2xf32>
    %78 = vector.broadcast %76 : vector<32x1xf32> to vector<32x2xf32>
    %79 = arith.mulf %78, %77 : vector<32x2xf32>
    %cst_38 = arith.constant dense<0.000000e+00> : vector<2xf32>
    %80 = vector.multi_reduction <add>, %79, %cst_38 [0] : vector<32x2xf32> to vector<2xf32>
    %81 = vector.shape_cast %80 : vector<2xf32> to vector<1x2xf32>
    %c0_39 = arith.constant 0 : index
    %c0_40 = arith.constant 0 : index
    %82 = vector.load %arg9[%c0_39, %c0_40] : memref<1x2xf32, #tpu.memory_space<vmem>>, vector<1x2xf32>
    %83 = arith.addf %81, %82 : vector<1x2xf32>
    %cst_41 = arith.constant 0.000000e+00 : f32
    %84 = vector.broadcast %cst_41 : f32 to vector<1x2xf32>
    %85 = arith.subf %84, %83 : vector<1x2xf32>
    %86 = math.exp %85 : vector<1x2xf32>
    %cst_42 = arith.constant 1.000000e+00 : f32
    %87 = vector.broadcast %cst_42 : f32 to vector<1x2xf32>
    %88 = arith.addf %87, %86 : vector<1x2xf32>
    %89 = tpu.reciprocal %88 {approx = true} : vector<1x2xf32> -> vector<1x2xf32>
    %90 = arith.mulf %83, %89 : vector<1x2xf32>
    %c0_43 = arith.constant 0 : index
    %c0_44 = arith.constant 0 : index
    %91 = vector.load %arg10[%c0_43, %c0_44] : memref<32x2xf32, #tpu.memory_space<vmem>>, vector<32x2xf32>
    %92 = vector.broadcast %90 : vector<1x2xf32> to vector<32x2xf32>
    %93 = arith.mulf %92, %91 : vector<32x2xf32>
    %cst_45 = arith.constant dense<0.000000e+00> : vector<32xf32>
    %94 = vector.multi_reduction <add>, %93, %cst_45 [1] : vector<32x2xf32> to vector<32xf32>
    %95 = vector.shape_cast %94 : vector<32xf32> to vector<32x1xf32>
    %c0_46 = arith.constant 0 : index
    %c0_47 = arith.constant 0 : index
    %96 = vector.load %arg11[%c0_46, %c0_47] : memref<32x1xf32, #tpu.memory_space<vmem>>, vector<32x1xf32>
    %97 = arith.addf %95, %96 : vector<32x1xf32>
    %cst_48 = arith.constant 0.000000e+00 : f32
    %98 = vector.broadcast %cst_48 : f32 to vector<32x1xf32>
    %99 = arith.subf %98, %97 : vector<32x1xf32>
    %100 = math.exp %99 : vector<32x1xf32>
    %cst_49 = arith.constant 1.000000e+00 : f32
    %101 = vector.broadcast %cst_49 : f32 to vector<32x1xf32>
    %102 = arith.addf %101, %100 : vector<32x1xf32>
    %103 = tpu.reciprocal %102 {approx = true} : vector<32x1xf32> -> vector<32x1xf32>
    %104 = vector.broadcast %103 : vector<32x1xf32> to vector<32x256xf32>
    %105 = arith.mulf %72, %104 : vector<32x256xf32>
    %106 = vector.extract_strided_slice %71 {offsets = [0, 256], sizes = [32, 256], strides = [1, 1]} : vector<32x1024xf32> to vector<32x256xf32>
    %cst_50 = arith.constant dense<0.000000e+00> : vector<32xf32>
    %107 = vector.multi_reduction <add>, %106, %cst_50 [1] : vector<32x256xf32> to vector<32xf32>
    %108 = vector.shape_cast %107 : vector<32xf32> to vector<32x1xf32>
    %cst_51 = arith.constant 3.906250e-03 : f32
    %109 = vector.broadcast %cst_51 : f32 to vector<32x1xf32>
    %110 = arith.mulf %108, %109 : vector<32x1xf32>
    %c0_52 = arith.constant 0 : index
    %c0_53 = arith.constant 0 : index
    %111 = vector.load %arg8[%c0_52, %c0_53] : memref<32x2xf32, #tpu.memory_space<vmem>>, vector<32x2xf32>
    %112 = vector.broadcast %110 : vector<32x1xf32> to vector<32x2xf32>
    %113 = arith.mulf %112, %111 : vector<32x2xf32>
    %cst_54 = arith.constant dense<0.000000e+00> : vector<2xf32>
    %114 = vector.multi_reduction <add>, %113, %cst_54 [0] : vector<32x2xf32> to vector<2xf32>
    %115 = vector.shape_cast %114 : vector<2xf32> to vector<1x2xf32>
    %c0_55 = arith.constant 0 : index
    %c0_56 = arith.constant 0 : index
    %116 = vector.load %arg9[%c0_55, %c0_56] : memref<1x2xf32, #tpu.memory_space<vmem>>, vector<1x2xf32>
    %117 = arith.addf %115, %116 : vector<1x2xf32>
    %cst_57 = arith.constant 0.000000e+00 : f32
    %118 = vector.broadcast %cst_57 : f32 to vector<1x2xf32>
    %119 = arith.subf %118, %117 : vector<1x2xf32>
    %120 = math.exp %119 : vector<1x2xf32>
    %cst_58 = arith.constant 1.000000e+00 : f32
    %121 = vector.broadcast %cst_58 : f32 to vector<1x2xf32>
    %122 = arith.addf %121, %120 : vector<1x2xf32>
    %123 = tpu.reciprocal %122 {approx = true} : vector<1x2xf32> -> vector<1x2xf32>
    %124 = arith.mulf %117, %123 : vector<1x2xf32>
    %c0_59 = arith.constant 0 : index
    %c0_60 = arith.constant 0 : index
    %125 = vector.load %arg10[%c0_59, %c0_60] : memref<32x2xf32, #tpu.memory_space<vmem>>, vector<32x2xf32>
    %126 = vector.broadcast %124 : vector<1x2xf32> to vector<32x2xf32>
    %127 = arith.mulf %126, %125 : vector<32x2xf32>
    %cst_61 = arith.constant dense<0.000000e+00> : vector<32xf32>
    %128 = vector.multi_reduction <add>, %127, %cst_61 [1] : vector<32x2xf32> to vector<32xf32>
    %129 = vector.shape_cast %128 : vector<32xf32> to vector<32x1xf32>
    %c0_62 = arith.constant 0 : index
    %c0_63 = arith.constant 0 : index
    %130 = vector.load %arg11[%c0_62, %c0_63] : memref<32x1xf32, #tpu.memory_space<vmem>>, vector<32x1xf32>
    %131 = arith.addf %129, %130 : vector<32x1xf32>
    %cst_64 = arith.constant 0.000000e+00 : f32
    %132 = vector.broadcast %cst_64 : f32 to vector<32x1xf32>
    %133 = arith.subf %132, %131 : vector<32x1xf32>
    %134 = math.exp %133 : vector<32x1xf32>
    %cst_65 = arith.constant 1.000000e+00 : f32
    %135 = vector.broadcast %cst_65 : f32 to vector<32x1xf32>
    %136 = arith.addf %135, %134 : vector<32x1xf32>
    %137 = tpu.reciprocal %136 {approx = true} : vector<32x1xf32> -> vector<32x1xf32>
    %138 = vector.broadcast %137 : vector<32x1xf32> to vector<32x256xf32>
    %139 = arith.mulf %106, %138 : vector<32x256xf32>
    %140 = vector.extract_strided_slice %71 {offsets = [0, 512], sizes = [32, 256], strides = [1, 1]} : vector<32x1024xf32> to vector<32x256xf32>
    %cst_66 = arith.constant dense<0.000000e+00> : vector<32xf32>
    %141 = vector.multi_reduction <add>, %140, %cst_66 [1] : vector<32x256xf32> to vector<32xf32>
    %142 = vector.shape_cast %141 : vector<32xf32> to vector<32x1xf32>
    %cst_67 = arith.constant 3.906250e-03 : f32
    %143 = vector.broadcast %cst_67 : f32 to vector<32x1xf32>
    %144 = arith.mulf %142, %143 : vector<32x1xf32>
    %c0_68 = arith.constant 0 : index
    %c0_69 = arith.constant 0 : index
    %145 = vector.load %arg8[%c0_68, %c0_69] : memref<32x2xf32, #tpu.memory_space<vmem>>, vector<32x2xf32>
    %146 = vector.broadcast %144 : vector<32x1xf32> to vector<32x2xf32>
    %147 = arith.mulf %146, %145 : vector<32x2xf32>
    %cst_70 = arith.constant dense<0.000000e+00> : vector<2xf32>
    %148 = vector.multi_reduction <add>, %147, %cst_70 [0] : vector<32x2xf32> to vector<2xf32>
    %149 = vector.shape_cast %148 : vector<2xf32> to vector<1x2xf32>
    %c0_71 = arith.constant 0 : index
    %c0_72 = arith.constant 0 : index
    %150 = vector.load %arg9[%c0_71, %c0_72] : memref<1x2xf32, #tpu.memory_space<vmem>>, vector<1x2xf32>
    %151 = arith.addf %149, %150 : vector<1x2xf32>
    %cst_73 = arith.constant 0.000000e+00 : f32
    %152 = vector.broadcast %cst_73 : f32 to vector<1x2xf32>
    %153 = arith.subf %152, %151 : vector<1x2xf32>
    %154 = math.exp %153 : vector<1x2xf32>
    %cst_74 = arith.constant 1.000000e+00 : f32
    %155 = vector.broadcast %cst_74 : f32 to vector<1x2xf32>
    %156 = arith.addf %155, %154 : vector<1x2xf32>
    %157 = tpu.reciprocal %156 {approx = true} : vector<1x2xf32> -> vector<1x2xf32>
    %158 = arith.mulf %151, %157 : vector<1x2xf32>
    %c0_75 = arith.constant 0 : index
    %c0_76 = arith.constant 0 : index
    %159 = vector.load %arg10[%c0_75, %c0_76] : memref<32x2xf32, #tpu.memory_space<vmem>>, vector<32x2xf32>
    %160 = vector.broadcast %158 : vector<1x2xf32> to vector<32x2xf32>
    %161 = arith.mulf %160, %159 : vector<32x2xf32>
    %cst_77 = arith.constant dense<0.000000e+00> : vector<32xf32>
    %162 = vector.multi_reduction <add>, %161, %cst_77 [1] : vector<32x2xf32> to vector<32xf32>
    %163 = vector.shape_cast %162 : vector<32xf32> to vector<32x1xf32>
    %c0_78 = arith.constant 0 : index
    %c0_79 = arith.constant 0 : index
    %164 = vector.load %arg11[%c0_78, %c0_79] : memref<32x1xf32, #tpu.memory_space<vmem>>, vector<32x1xf32>
    %165 = arith.addf %163, %164 : vector<32x1xf32>
    %cst_80 = arith.constant 0.000000e+00 : f32
    %166 = vector.broadcast %cst_80 : f32 to vector<32x1xf32>
    %167 = arith.subf %166, %165 : vector<32x1xf32>
    %168 = math.exp %167 : vector<32x1xf32>
    %cst_81 = arith.constant 1.000000e+00 : f32
    %169 = vector.broadcast %cst_81 : f32 to vector<32x1xf32>
    %170 = arith.addf %169, %168 : vector<32x1xf32>
    %171 = tpu.reciprocal %170 {approx = true} : vector<32x1xf32> -> vector<32x1xf32>
    %172 = vector.broadcast %171 : vector<32x1xf32> to vector<32x256xf32>
    %173 = arith.mulf %140, %172 : vector<32x256xf32>
    %174 = vector.extract_strided_slice %71 {offsets = [0, 768], sizes = [32, 256], strides = [1, 1]} : vector<32x1024xf32> to vector<32x256xf32>
    %cst_82 = arith.constant dense<0.000000e+00> : vector<32xf32>
    %175 = vector.multi_reduction <add>, %174, %cst_82 [1] : vector<32x256xf32> to vector<32xf32>
    %176 = vector.shape_cast %175 : vector<32xf32> to vector<32x1xf32>
    %cst_83 = arith.constant 3.906250e-03 : f32
    %177 = vector.broadcast %cst_83 : f32 to vector<32x1xf32>
    %178 = arith.mulf %176, %177 : vector<32x1xf32>
    %c0_84 = arith.constant 0 : index
    %c0_85 = arith.constant 0 : index
    %179 = vector.load %arg8[%c0_84, %c0_85] : memref<32x2xf32, #tpu.memory_space<vmem>>, vector<32x2xf32>
    %180 = vector.broadcast %178 : vector<32x1xf32> to vector<32x2xf32>
    %181 = arith.mulf %180, %179 : vector<32x2xf32>
    %cst_86 = arith.constant dense<0.000000e+00> : vector<2xf32>
    %182 = vector.multi_reduction <add>, %181, %cst_86 [0] : vector<32x2xf32> to vector<2xf32>
    %183 = vector.shape_cast %182 : vector<2xf32> to vector<1x2xf32>
    %c0_87 = arith.constant 0 : index
    %c0_88 = arith.constant 0 : index
    %184 = vector.load %arg9[%c0_87, %c0_88] : memref<1x2xf32, #tpu.memory_space<vmem>>, vector<1x2xf32>
    %185 = arith.addf %183, %184 : vector<1x2xf32>
    %cst_89 = arith.constant 0.000000e+00 : f32
    %186 = vector.broadcast %cst_89 : f32 to vector<1x2xf32>
    %187 = arith.subf %186, %185 : vector<1x2xf32>
    %188 = math.exp %187 : vector<1x2xf32>
    %cst_90 = arith.constant 1.000000e+00 : f32
    %189 = vector.broadcast %cst_90 : f32 to vector<1x2xf32>
    %190 = arith.addf %189, %188 : vector<1x2xf32>
    %191 = tpu.reciprocal %190 {approx = true} : vector<1x2xf32> -> vector<1x2xf32>
    %192 = arith.mulf %185, %191 : vector<1x2xf32>
    %c0_91 = arith.constant 0 : index
    %c0_92 = arith.constant 0 : index
    %193 = vector.load %arg10[%c0_91, %c0_92] : memref<32x2xf32, #tpu.memory_space<vmem>>, vector<32x2xf32>
    %194 = vector.broadcast %192 : vector<1x2xf32> to vector<32x2xf32>
    %195 = arith.mulf %194, %193 : vector<32x2xf32>
    %cst_93 = arith.constant dense<0.000000e+00> : vector<32xf32>
    %196 = vector.multi_reduction <add>, %195, %cst_93 [1] : vector<32x2xf32> to vector<32xf32>
    %197 = vector.shape_cast %196 : vector<32xf32> to vector<32x1xf32>
    %c0_94 = arith.constant 0 : index
    %c0_95 = arith.constant 0 : index
    %198 = vector.load %arg11[%c0_94, %c0_95] : memref<32x1xf32, #tpu.memory_space<vmem>>, vector<32x1xf32>
    %199 = arith.addf %197, %198 : vector<32x1xf32>
    %cst_96 = arith.constant 0.000000e+00 : f32
    %200 = vector.broadcast %cst_96 : f32 to vector<32x1xf32>
    %201 = arith.subf %200, %199 : vector<32x1xf32>
    %202 = math.exp %201 : vector<32x1xf32>
    %cst_97 = arith.constant 1.000000e+00 : f32
    %203 = vector.broadcast %cst_97 : f32 to vector<32x1xf32>
    %204 = arith.addf %203, %202 : vector<32x1xf32>
    %205 = tpu.reciprocal %204 {approx = true} : vector<32x1xf32> -> vector<32x1xf32>
    %206 = vector.broadcast %205 : vector<32x1xf32> to vector<32x256xf32>
    %207 = arith.mulf %174, %206 : vector<32x256xf32>
    %208 = tpu.concatenate %105, %139, %173, %207 in 1 : vector<32x256xf32>, vector<32x256xf32>, vector<32x256xf32>, vector<32x256xf32> -> vector<32x1024xf32>
    %c0_98 = arith.constant 0 : index
    %c0_99 = arith.constant 0 : index
    %209 = vector.load %arg12[%c0_98, %c0_99] : memref<8x32xbf16, #tpu.memory_space<vmem>>, vector<8x32xbf16>
    %210 = arith.truncf %208 : vector<32x1024xf32> to vector<32x1024xbf16>
    %cst_100 = arith.constant dense<0.000000e+00> : vector<8x1024xf32>
    %211 = tpu.matmul %209, %210, %cst_100 {dimension_numbers = #tpu.dot_dimension_numbers<[1], [0], [0], [1], [0, 0, 1, 1], [], []>} : vector<8x32xbf16>, vector<32x1024xbf16>, vector<8x1024xf32> -> vector<8x1024xf32>
    %c0_101 = arith.constant 0 : index
    %c0_102 = arith.constant 0 : index
    %212 = vector.load %arg13[%c0_101, %c0_102] : memref<8x1xf32, #tpu.memory_space<vmem>>, vector<8x1xf32>
    %213 = vector.broadcast %212 : vector<8x1xf32> to vector<8x1024xf32>
    %214 = arith.mulf %211, %213 : vector<8x1024xf32>
    %c0_103 = arith.constant 0 : index
    %c0_104 = arith.constant 0 : index
    %215 = vector.load %arg14[%c0_103, %c0_104] : memref<8x1xf32, #tpu.memory_space<vmem>>, vector<8x1xf32>
    %216 = vector.broadcast %215 : vector<8x1xf32> to vector<8x1024xf32>
    %217 = arith.addf %214, %216 : vector<8x1024xf32>
    %218 = arith.extf %0 : vector<8x1024xbf16> to vector<8x1024xf32>
    %219 = arith.addf %217, %218 : vector<8x1024xf32>
    %c0_105 = arith.constant 0 : index
    %c0_106 = arith.constant 0 : index
    %220 = vector.load %arg15[%c0_105, %c0_106] : memref<8x1024xf32, #tpu.memory_space<vmem>>, vector<8x1024xf32>
    tpu.vector_store %arg15[%c0_105, %c0_106], %219 {strides = array<i32>} : memref<8x1024xf32, #tpu.memory_space<vmem>>, vector<8x1024xf32>,
    return
  }
  func.func @transform_0(%arg0: i32) -> (i32, i32) {
    %c0_i32 = arith.constant 0 : i32
    %c0_i32_0 = arith.constant 0 : i32
    return %c0_i32, %arg0 : i32, i32
  }
  func.func @transform_1(%arg0: i32) -> (i32, i32) {
    %c0_i32 = arith.constant 0 : i32
    %c0_i32_0 = arith.constant 0 : i32
    %c0_i32_1 = arith.constant 0 : i32
    return %c0_i32, %c0_i32_0 : i32, i32
  }
  func.func @transform_2(%arg0: i32) -> (i32, i32) {
    %c0_i32 = arith.constant 0 : i32
    %c0_i32_0 = arith.constant 0 : i32
    %c0_i32_1 = arith.constant 0 : i32
    return %c0_i32, %c0_i32_0 : i32, i32
  }
  func.func @transform_3(%arg0: i32) -> (i32, i32) {
    %c0_i32 = arith.constant 0 : i32
    %c0_i32_0 = arith.constant 0 : i32
    %c0_i32_1 = arith.constant 0 : i32
    return %c0_i32, %c0_i32_0 : i32, i32
  }
  func.func @transform_4(%arg0: i32) -> (i32, i32, i32) {
    %c0_i32 = arith.constant 0 : i32
    %c0_i32_0 = arith.constant 0 : i32
    %c0_i32_1 = arith.constant 0 : i32
    %c0_i32_2 = arith.constant 0 : i32
    return %c0_i32, %c0_i32_0, %c0_i32_1 : i32, i32, i32
  }
  func.func @transform_5(%arg0: i32) -> (i32, i32) {
    %c0_i32 = arith.constant 0 : i32
    %c0_i32_0 = arith.constant 0 : i32
    %c0_i32_1 = arith.constant 0 : i32
    return %c0_i32, %c0_i32_0 : i32, i32
  }
  func.func @transform_6(%arg0: i32) -> (i32, i32) {
    %c0_i32 = arith.constant 0 : i32
    %c0_i32_0 = arith.constant 0 : i32
    %c0_i32_1 = arith.constant 0 : i32
    return %c0_i32, %c0_i32_0 : i32, i32
  }
  func.func @transform_7(%arg0: i32) -> (i32, i32) {
    %c0_i32 = arith.constant 0 : i32
    %c0_i32_0 = arith.constant 0 : i32
    %c0_i32_1 = arith.constant 0 : i32
    return %c0_i32, %c0_i32_0 : i32, i32
  }
  func.func @transform_8(%arg0: i32) -> (i32, i32) {
    %c0_i32 = arith.constant 0 : i32
    %c0_i32_0 = arith.constant 0 : i32
    %c0_i32_1 = arith.constant 0 : i32
    return %c0_i32, %c0_i32_0 : i32, i32
  }
  func.func @transform_9(%arg0: i32) -> (i32, i32) {
    %c0_i32 = arith.constant 0 : i32
    %c0_i32_0 = arith.constant 0 : i32
    %c0_i32_1 = arith.constant 0 : i32
    return %c0_i32, %c0_i32_0 : i32, i32
  }
  func.func @transform_10(%arg0: i32) -> (i32, i32) {
    %c0_i32 = arith.constant 0 : i32
    %c0_i32_0 = arith.constant 0 : i32
    %c0_i32_1 = arith.constant 0 : i32
    return %c0_i32, %c0_i32_0 : i32, i32
  }
  func.func @transform_11(%arg0: i32) -> (i32, i32) {
    %c0_i32 = arith.constant 0 : i32
    %c0_i32_0 = arith.constant 0 : i32
    %c0_i32_1 = arith.constant 0 : i32
    return %c0_i32, %c0_i32_0 : i32, i32
  }
  func.func @transform_12(%arg0: i32) -> (i32, i32) {
    %c0_i32 = arith.constant 0 : i32
    %c0_i32_0 = arith.constant 0 : i32
    %c0_i32_1 = arith.constant 0 : i32
    return %c0_i32, %c0_i32_0 : i32, i32
  }
  func.func @transform_13(%arg0: i32) -> (i32, i32) {
    %c0_i32 = arith.constant 0 : i32
    %c0_i32_0 = arith.constant 0 : i32
    %c0_i32_1 = arith.constant 0 : i32
    return %c0_i32, %c0_i32_0 : i32, i32
  }
  func.func @transform_14(%arg0: i32) -> (i32, i32) {
    %c0_i32 = arith.constant 0 : i32
    %c0_i32_0 = arith.constant 0 : i32
    return %c0_i32, %arg0 : i32, i32
  }
}

</mosaic_0001>

<bundles_post_ra>
// kernel: tpu_custom_call.1
= control target key start
LH: loop header
LB: loop body
LE: loop exit
PB: predicated region body
PF: predicated region fallthrough
CT: control target
= control target key end

     0   :  { %s8328_s0 = inlined_call_operand.hbm [shape: bf16[8,2048], index: 0, kind: input, shape index: {}]   ;;  %s8329_s1 = inlined_call_operand.vmem [shape: bf16[32,8], index: 1, kind: input, shape index: {}]   ;;  %s8330_s2 = inlined_call_operand.vmem [shape: f32[32,1], index: 2, kind: input, shape index: {}]   ;;  %s8331_s3 = inlined_call_operand.vmem [shape: f32[32,1], index: 3, kind: input, shape index: {}]   ;;  %s8332_s4 = inlined_call_operand.hbm [shape: f32[9,32,1024], index: 4, kind: input, shape index: {}]   ;;  %s8333_s5 = inlined_call_operand.vmem [shape: f32[32,1], index: 5, kind: input, shape index: {}]   ;;  %s8334_s6 = inlined_call_operand.vmem [shape: f32[32,1], index: 6, kind: input, shape index: {}]   ;;  %s8335_s7 = inlined_call_operand.vmem [shape: f32[32,2], index: 7, kind: input, shape index: {}]   ;;  %s8336_s8 = inlined_call_operand.hbm [shape: f32[1,2], index: 8, kind: input, shape index: {}]   ;;  %s8337_s9 = inlined_call_operand.vmem [shape: f32[32,2], index: 9, kind: input, shape index: {}]   ;;  %s8338_s10 = inlined_call_operand.vmem [shape: f32[32,1], index: 10, kind: input, shape index: {}]   ;;  %s8339_s11 = inlined_call_operand.hbm [shape: bf16[8,32], index: 11, kind: input, shape index: {}]   ;;  %s8340_s12 = inlined_call_operand.vmem [shape: f32[8,1], index: 12, kind: input, shape index: {}]   ;;  %s8341_s13 = inlined_call_operand.vmem [shape: f32[8,1], index: 13, kind: input, shape index: {}]   ;;  %s8342_s14 = inlined_call_operand.hbm [shape: f32[8,2048], index: 14, kind: output, shape index: {}]  }
   0x1   :  { %8581 = sst [smem:[#allocation193_spill]] %s8335_s7 }
   0x2   :  { %8582 = sst [smem:[#allocation194_spill]] %s8337_s9 }
   0x3   :  { %8583 = sst [smem:[#allocation195_spill]] %s8338_s10 }
   0x4   :  { %8584 = sst [smem:[#allocation196_spill]] %s8340_s12 }
   0x5   :  { %8585 = sst [smem:[#allocation197_spill]] %s8341_s13 }
   0x6   :  { %8586 = sst [smem:[#allocation198_spill]] %s8342_s14 }
   0x7   :  { %19 = vsyncpa [#allocation3], 0 }
   0x8   :  { %21 = vsyncpa [#allocation3 + $0x1], 0 }
   0x9   :  { %22 = vsyncpa [#allocation6], 0 }
   0xa   :  { %23 = vsyncpa [#allocation9], 0 }
   0xb   :  { %24 = vsyncpa [#allocation4], 0 }
   0xc   :  { %26 = vsyncpa [#allocation4 + $0x1], 0  ;;  %s4617_s29 = smov 0   ;;  %s4619_s30 = smov 0  }
   0xd   :  { %s4621_s15 = smov 0   ;;  %s4623_s16 = smov 0  }
   0xe LB: > { %8587 = sst [smem:[#allocation15_spill]] %s4512_s29  ;;  %s4638_s17 = sadd.s32 4294967295, %s4524_s16   ;;  %s4524_s16 = sphi %s4623_s16, %s9305_s16   ;;  %s4520_s15 = sphi %s4621_s15, %s9304_s15   ;;  %s4516_s30 = sphi %s4619_s30, %s9303_s30   ;;  %s4512_s29 = sphi %s4617_s29, %s9302_s29  }
   0xf   : > { %s3848_s18 = sadd.s32 4294967294, %s4524_s16   ;;  %p52_p0 = scmp.ne.s32.totalorder %s4516_s30, %s4512_s29 }
  0x10   : > { %p8346_p1 = scmp.eq.s32.totalorder %s4638_s17, 0  ;;  %p355_p3 = scmp.eq.s32.totalorder %s3848_s18, 1 }
  0x11   : > { %p3849_p5 = scmp.ge.s32.totalorder %s4524_s16, 1  ;;  %p362_p7 = scmp.lt.s32.totalorder %s4524_s16, 3 }
  0x12   : > { %p4647_p4 = por %p8346_p1, %p52_p0  ;;  %p4652_p6 = por %p355_p3, %p52_p0 }
  0x13   : > { %p4657_p8 = pnand %p3849_p5, %p362_p7  ;;  %s4526_s22 = smov [#allocation5]  }
  0x14   : > { %s8588_s19 = scalar_select %p4647_p4, 1, 0 }
  0x15   : > { %s8589_s20 = scalar_select %p4652_p6, 1, 0 }
  0x16   : > { %s8591_s21 = scalar_select %p4657_p8, 1, 0 }
  0x17   : > { %8590 = sst [smem:[#allocation16_spill]] %s8589_s20  ;;  %s383_s23 = sshll.u32 %s4526_s22, 4  ;;  %s4661_s23 = int_to_ptr.vmem [resolvable:$true] %s383_s23 }
  0x18   : > { %p3912_p9 = pneg %p4657_p8  ;;  %s4527_s25 = smov [#allocation7]  }
  0x19   : > { %s406_s26 = sshll.u32 %s4527_s25, 4  ;;  %s4528_s27 = smov [#allocation8]   ;;  %s4672_s26 = int_to_ptr.vmem [resolvable:$true] %s406_s26 }
  0x1a   : > { %p4668_p11 = pnand %p3912_p9, %p8346_p1  ;;  %s4674_s28 = sshll.u32 %s4528_s27, 4  ;;  %s424_s28 = int_to_ptr.vmem [resolvable:$true] %s4674_s28 }
  0x1b   : > { %s4336_s20 = scalar_lea.hbm %s8332_s4, 36864 }
  0x1c   : > { %p4337_p12 = scmp.ne.s32.totalorder %s8332_s4, %s4336_s20  ;;  %p4684_p13 = pneg %p4668_p11 }
  0x1d   : > { %p4343_p5 = scmp.lt.u32.totalorder %s4336_s20, %s8332_s4 }
  0x1e   : > { %p4339_p0 = pnand %p4684_p13, %p4337_p12 }
  0x20   : > { %p4340_p3 = pneg %p4339_p0 }
  0x22   : > { %p4345_p7 = pnand %p4343_p5, %p4340_p3 }
  0x24   : > { %4348 = shalt.err (!%p4345_p7)
}
  0x25   : > { %s4349_s14 = scalar_lea.vmem %s4661_s23, 36864  ;;  %p4357_p2 = scmp.lt.s32.totalorder %s4661_s23, %s4661_s23 }
  0x26   : > { %p4350_p9 = scmp.ne.s32.totalorder %s4661_s23, %s4349_s14  ;;  %p4358_p6 = scmp.lt.s32.totalorder %s4349_s14, %s4349_s14 }
  0x28   : > { %p4352_p10 = pnand %p4350_p9, %p4684_p13  ;;  %p4359_p12 = por %p4358_p6, %p4357_p2 }
  0x2a   : > { %p4353_p1 = pneg %p4352_p10 }
  0x2c   : > { %p4360_p0 = pnand %p4359_p12, %p4353_p1 }
  0x2e   : > { %4363 = shalt.err (!%p4360_p0)
}
  0x2f   : > { %s4529_s29 = smov 1024   ;;  %s4530_s20 = smov 64  }
  0x30   : > { %3915 = dma.hbm_to_vmem [thread:$0]  (!%p4668_p11), %s8332_s4, 36864, %s4661_s23, [#allocation6], %s4529_s29, %s4529_s29, %s4530_s20  }
  0x31   : > { %s4364_s13 = scalar_lea.hbm %s8336_s8, 16 }
  0x32   : > { %p4365_p2 = scmp.ne.s32.totalorder %s8336_s8, %s4364_s13  ;;  %p4371_p10 = scmp.lt.u32.totalorder %s4364_s13, %s8336_s8 }
  0x34   : > { %p4367_p1 = pnand %p4365_p2, %p4684_p13 }
  0x36   : > { %p4368_p6 = pneg %p4367_p1 }
  0x38   : > { %p4373_p3 = pnand %p4371_p10, %p4368_p6 }
  0x3a   : > { %4376 = shalt.err (!%p4373_p3)
}
  0x3b   : > { %s4377_s23 = scalar_lea.vmem %s4672_s26, 16  ;;  %s4384_s9 = scalar_lea.vmem %s4672_s26, 32 }
  0x3c   : > { %p4378_p5 = scmp.ne.s32.totalorder %s4672_s26, %s4377_s23  ;;  %p4385_p12 = scmp.lt.s32.totalorder %s4672_s26, %s4672_s26 }
  0x3d   : > { %p4386_p0 = scmp.lt.s32.totalorder %s4384_s9, %s4377_s23 }
  0x3e   : > { %p4380_p7 = pnand %p4378_p5, %p4684_p13 }
  0x3f   : > { %p4387_p2 = por %p4386_p0, %p4385_p12 }
  0x40   : > { %p4381_p9 = pneg %p4380_p7 }
  0x42   : > { %p4388_p1 = pnand %p4387_p2, %p4381_p9 }
  0x44   : > { %4391 = shalt.err (!%p4388_p1)
}
  0x45   : > { %3918 = dma.hbm_to_vmem [thread:$0]  (!%p4668_p11), %s8336_s8, 16, %s4672_s26, [#allocation6]  }
  0x46   : > { %s4392_s20 = scalar_lea.hbm %s8339_s11, 64 }
  0x47   : > { %p4393_p6 = scmp.ne.s32.totalorder %s8339_s11, %s4392_s20  ;;  %p4399_p5 = scmp.lt.u32.totalorder %s4392_s20, %s8339_s11 }
  0x49   : > { %p4395_p10 = pnand %p4393_p6, %p4684_p13 }
  0x4b   : > { %p4396_p3 = pneg %p4395_p10 }
  0x4d   : > { %p4401_p7 = pnand %p4399_p5, %p4396_p3 }
  0x4f   : > { %4404 = shalt.err (!%p4401_p7)
}
  0x50   : > { %s4405_s14 = scalar_lea.vmem %s424_s28, 64  ;;  %p4413_p2 = scmp.lt.s32.totalorder %s424_s28, %s424_s28 }
  0x51   : > { %p4406_p9 = scmp.ne.s32.totalorder %s424_s28, %s4405_s14  ;;  %p4414_p1 = scmp.lt.s32.totalorder %s4405_s14, %s4405_s14 }
  0x53   : > { %p4408_p12 = pnand %p4406_p9, %p4684_p13  ;;  %p4415_p4 = por %p4414_p1, %p4413_p2 }
  0x55   : > { %p4409_p0 = pneg %p4408_p12 }
  0x57   : > { %p4416_p8 = pnand %p4415_p4, %p4409_p0 }
  0x59   : > { %4419 = shalt.err (!%p4416_p8)
}
  0x5a   : > { %3921 = dma.hbm_to_vmem [thread:$0]  (!%p4668_p11), %s8339_s11, 64, %s424_s28, [#allocation9]  }
  0x5b   : > { %s4749_s12 = sadd.s32 1, %s4524_s16   ;;  %s39_s24 = sadd.s32 1, %s4520_s15 }
  0x5c   : > { %s36_s9 = ssub.s32 %s4524_s16, %s4749_s12  ;;  %p46_p8 = scmp.ne.s32.totalorder %s4520_s15, %s4516_s30 }
  0x5d   : > { %p37_p4 = scmp.eq.s32.totalorder %s36_s9, 0  ;;  %p47_p13 = scmp.eq.s32.totalorder %s4524_s16, 0 }
  0x5e   : > { %p3933_p6 = scmp.lt.s32.totalorder %s4524_s16, 2  ;;  %p8594_p3 = scmp.eq.s32.totalorder %s4638_s17, 1 }
  0x5f   : > { %s4759_s7 = scalar_select %p37_p4, %s4520_s15, %s39_s24  }
  0x60   : > { %p48_p10 = por %p47_p13, %p46_p8  ;;  %p4763_p5 = por %p8594_p3, %p46_p8 }
  0x61   : > { %s440_s13 = sand.u32 1, %s4520_s15   ;;  %s3894_s29 = sshll.u32 %s4524_s16, 9 }
  0x62   : > { %s3854_s28 = sshll.u32 %s440_s13, 5  ;;  %s4772_s22 = scalar_lea.hbm %s8328_s0, %s3894_s29 }
  0x63   : > { %s444_s25 = scalar_lea.vmem [#allocation2], %s3854_s28  ;;  %p4774_p11 = pnand %p3933_p6, %p48_p10 }
  0x64   : > { %s452_s27 = sshll.u32 %s444_s25, 4  ;;  %s441_s26 = scalar_lea.sflag [#allocation3], %s440_s13  ;;  %s4778_s27 = int_to_ptr.vmem [resolvable:$true] %s452_s27 }
  0x65   : > { %s4420_s23 = scalar_lea.hbm %s4772_s22, 512  ;;  %p4422_p9 = pneg %p4774_p11 }
  0x66   : > { %p4421_p7 = scmp.ne.s32.totalorder %s4772_s22, %s4420_s23  ;;  %s4425_s29 = scalar_lea.hbm %s8328_s0, 1024 }
  0x67   : > { %p4426_p2 = scmp.lt.u32.totalorder %s4772_s22, %s8328_s0  ;;  %p4427_p1 = scmp.lt.u32.totalorder %s4425_s29, %s4420_s23 }
  0x68   : > { %p4423_p12 = pnand %p4422_p9, %p4421_p7  ;;  %p4429_p8 = scmp.lt.u32.totalorder %s4420_s23, %s4772_s22 }
  0x69   : > { %p4428_p4 = por %p4427_p1, %p4426_p2 }
  0x6a   : > { %p4424_p0 = pneg %p4423_p12 }
  0x6b   : > { %p4430_p13 = por %p4429_p8, %p4428_p4 }
  0x6d   : > { %p4431_p6 = pnand %p4430_p13, %p4424_p0 }
  0x6f   : > { %4434 = shalt.err (!%p4431_p6)
}
  0x70   : > { %s4435_s13 = scalar_lea.vmem %s4778_s27, 512  ;;  %s4531_s18 = smov [#allocation2]  }
  0x71   : > { %p4436_p10 = scmp.ne.s32.totalorder %s4778_s27, %s4435_s13  ;;  %s4440_s25 = sshll.u32 %s4531_s18, 4  ;;  %s4441_s25 = int_to_ptr.vmem [resolvable:$false] %s4440_s25 }
  0x72   : > { %s4442_s9 = scalar_lea.vmem %s4441_s25, 1024  ;;  %p4443_p12 = scmp.lt.s32.totalorder %s4778_s27, %s4441_s25 }
  0x73   : > { %p4438_p3 = pnand %p4436_p10, %p4422_p9  ;;  %p4444_p2 = scmp.lt.s32.totalorder %s4442_s9, %s4435_s13 }
  0x75   : > { %p4439_p7 = pneg %p4438_p3  ;;  %p4445_p1 = por %p4444_p2, %p4443_p12 }
  0x77   : > { %p4446_p4 = pnand %p4445_p1, %p4439_p7 }
  0x79   : > { %4449 = shalt.err (!%p4446_p4)
}
  0x7a   : > { %3925 = dma.hbm_to_vmem [thread:$0]  (!%p4774_p11), %s4772_s22, 512, %s4778_s27, %s441_s26  }
  0x7b   : > { %p8597_p0 = scmp.ne.s32.totalorder %s8591_s21, 0 }
  0x7d   : > { %461 = sbr.rel (%p8597_p0) target bundleno = 1881 (0x759), region = 76 }
  0x84   : > { %s4808_s23 = sand.u32 1, %s4516_s30   ;;  %p8598_p9 = scmp.ne.s32.totalorder %s8588_s19, 0 }
  0x85   : > { %s3858_s24 = sshll.u32 %s4808_s23, 5  ;;  %s464_s29 = scalar_lea.sflag [#allocation3], %s4808_s23 }
  0x86   : > { %s4812_s28 = scalar_lea.vmem [#allocation2], %s3858_s24 }
  0x87   : > { %4495 = dma.done.wait (%p8598_p9), %s464_s29, 512  }
  0x88   : > { %4497 = vsyncadd (%p8598_p9), %s464_s29, 4294966784  ;;  %p8599_p11 = scmp.eq.s32.totalorder %s4638_s17, 0 }
  0x8a   : > { %4499 = dma.done.wait (%p8599_p11), [#allocation6], 36880   ;;  %p8600_p8 = pmov %p8599_p11 }
  0x8c   : > { %4501 = vsyncadd (%p8600_p8), [#allocation6], 4294930416  ;;  %p8601_p13 = pmov %p8600_p8 }
  0x8d   : > { %p8602_p6 = pmov %p8600_p8 }
  0x8e   : > { %4503 = dma.done.wait (%p8601_p13), [#allocation9], 64  }
  0x8f   : > { %4505 = vsyncadd (%p8602_p6), [#allocation9], 4294967232  ;;  %v8352_v0 = vmov 0   ;;  %v527_v1 = vld [vmem:[%s4812_s28] sm:$0xff]  ;;  %vm572_vm0 = vcmask 1043456   ;;  %v528_v2 = vld [vmem:[%s4812_s28 + $0x8] sm:$0xff] }
  0x90   : > { %629 = vmatprep.mubr.bf16.mxu0 %v8352_v0  ;;  %682 = vmatprep.mubr.bf16.mxu1 %v8352_v0  ;;  %v3866_v3 = vcombine.high %v527_v1, %v527_v1  ;;  %v3868_v4 = vcombine.high %v528_v2, %v528_v2  ;;  %v3865_v5 = vcombine.low %v527_v1, %v527_v1  ;;  %v529_v7 = vld [vmem:[%s4812_s28 + $0x10] sm:$0xff]  ;;  %v3990_v10 = vld [vmem:[%s8329_s1] sm:$0xff]   ;;  %v530_v12 = vld [vmem:[%s4812_s28 + $0x18] sm:$0xff]  ;;  %vm565_vm1 = vcmask 64512   ;;  %s4533_s13 = smov 127   ;;  %s4534_s18 = smov 17  }
  0x91   : > { %3984 = vset.pattern.permute.xlu0 %v8352_v0  ;;  %3985 = vset.pattern.permute.xlu1 %v8352_v0  ;;  %v3867_v6 = vcombine.low %v528_v2, %v528_v2  ;;  %v3870_v11 = vcombine.high %v529_v7, %v529_v7  ;;  %v3869_v13 = vcombine.low %v529_v7, %v529_v7  ;;  %v809_v14 = vld [vmem:[%s8330_s2] sm:$0xff]  ;;  %v811_v17 = vld [vmem:[%s8330_s2 + $0x10] sm:$0xff]  ;;  %v810_v20 = vld [vmem:[%s8330_s2 + $0x8] sm:$0xff]  ;;  %s4535_s25 = smov 113   ;;  %s4536_s9 = smov 16   ;;  %vm3059_vm10 = vcmask 15360  }
  0x92   : > { %3873 = vmatprep.subr.msk.bf16.mxu0 %vm572_vm0, %v3866_v3  ;;  %3876 = vmatprep.subr.msk.bf16.mxu1 %vm572_vm0, %v3868_v4  ;;  %v574_v8 = vsel %vm572_vm0, %v3865_v5, 0  ;;  %v3872_v15 = vcombine.high %v530_v12, %v530_v12  ;;  %v3871_v16 = vcombine.low %v530_v12, %v530_v12  ;;  %v812_v21 = vld [vmem:[%s8330_s2 + $0x18] sm:$0xff]  ;;  %v3991_v22 = vld [vmem:[%s8329_s1 + $0x8] sm:$0xff]   ;;  %v865_v23 = vld [vmem:[%s8331_s3] sm:$0xff]  ;;  %s4537_s24 = smov 112   ;;  %s4538_s29 = smov 15  }
  0x93   : > { %v580_v9 = vsel %vm572_vm0, %v3867_v6, 0  ;;  %598 = vmatpush1.bf16.msra.mxu0 %v574_v8  ;;  %815 = vperm.xlu0 %3984, %v809_v14   ;;  %v586_v18 = vsel %vm572_vm0, %v3869_v13, 0  ;;  %v866_v24 = vld [vmem:[%s8331_s3 + $0x8] sm:$0xff]  ;;  %v867_v25 = vld [vmem:[%s8331_s3 + $0x10] sm:$0xff]  ;;  %v868_v26 = vld [vmem:[%s8331_s3 + $0x18] sm:$0xff]  ;;  %s4539_s19 = smov 1  }
  0x94   : > { %651 = vmatpush1.bf16.msra.mxu1 %v580_v9  ;;  %3879 = vmatprep.subr.msk.bf16.mxu0 %vm572_vm0, %v3870_v11  ;;  %v592_v19 = vsel %vm572_vm0, %v3871_v16, 0  ;;  %s4540_s21 = smov 111   ;;  %s9280_s22 = sld [smem:[#allocation194_spill]]  ;;  %vm3514_vm11 = vcmask 261120  }
  0x95   : > { %3882 = vmatprep.subr.msk.bf16.mxu1 %vm572_vm0, %v3872_v15  ;;  %825 = vperm.xlu1 %3985, %v811_v17   ;;  %s9281_s20 = sld [smem:[#allocation195_spill]]  ;;  %s9282_s14 = sld [smem:[#allocation197_spill]] }
  0x96   : > { %3874 = vmatmul.mubr.msk.bf16.vlgmr.msra.gmra.mrb[0].mxu0 %vm565_vm1, %v3990_v10  ;;  %s3862_s27 = sshll.u32 %s4808_s23, 6  ;;  %s3735_s26 = scalar_lea.sflag [#allocation4], %s4808_s23 }
  0x97   : > { %3877 = vmatmul.mubr.msk.bf16.vlgmr.msra.gmra.mrb[0].mxu1 %vm565_vm1, %v3990_v10  ;;  %639 = vmatprep.mubr.bf16.mxu0 %v8352_v0 }
  0x98   : > { %692 = vmatprep.mubr.bf16.mxu1 %v8352_v0  ;;  %704 = vmatpush1.bf16.msra.mxu0 %v586_v18 }
  0x99   : > { %757 = vmatpush1.bf16.msra.mxu1 %v592_v19  ;;  %820 = vperm.xlu0 %3984, %v810_v20  }
  0x9a   : > { %830 = vperm.xlu1 %3985, %v812_v21  }
  0x9d   : > { %871 = vperm.xlu0 %3984, %v865_v23  }
  0x9e   : > { %876 = vperm.xlu1 %3985, %v866_v24   ;;  %3875 = vmatmul.mubr.msk.bf16.gmra.mrb[4].mxu0 %vm565_vm1, %v3991_v22 }
  0x9f   : > { %3878 = vmatmul.mubr.msk.bf16.gmra.mrb[4].mxu1 %vm565_vm1, %v3991_v22  ;;  %735 = vmatprep.mubr.bf16.mxu0 %v8352_v0 }
  0xa0   : > { %788 = vmatprep.mubr.bf16.mxu1 %v8352_v0 }
  0xa1   : > { %881 = vperm.xlu0 %3984, %v867_v25  }
  0xa2   : > { %886 = vperm.xlu1 %3985, %v868_v26  }
  0xa6   : > { %3880 = vmatmul.mubr.msk.bf16.vlgmr.msra.gmra.mrb[8].mxu0 %vm565_vm1, %v3990_v10 }
  0xa7   : > { %3883 = vmatmul.mubr.msk.bf16.vlgmr.msra.gmra.mrb[8].mxu1 %vm565_vm1, %v3990_v10  ;;  %745 = vmatprep.mubr.bf16.mxu0 %v8352_v0 }
  0xa8   : > { %798 = vmatprep.mubr.bf16.mxu1 %v8352_v0 }
  0xae   : > { %3881 = vmatmul.mubr.msk.bf16.gmra.mrb[12].mxu0 %vm565_vm1, %v3991_v22 }
  0xaf   : > { %3884 = vmatmul.mubr.msk.bf16.gmra.mrb[12].mxu1 %vm565_vm1, %v3991_v22  ;;  %3550 = vmatprep.mubr.bf16.mxu0 %v8352_v0 }
  0xb0   : > { %3591 = vmatprep.mubr.bf16.mxu1 %v8352_v0 }
 0x112   : > { %v4888_v27 = vpop.permute.xlu0 %815 }
 0x114   : > { %v4945_v8 = vpop.permute.xlu1 %825 }
 0x118   : > { %v4890_v28 = vpop.permute.xlu0 %820 }
 0x119   : > { %v4964_v20 = vpop.permute.xlu1 %830 }
 0x11c   : > { %v4892_v29 = vpop.permute.xlu0 %871 }
 0x11d   : > { %v4973_v25 = vpop.permute.xlu1 %876 }
 0x169   : > { %v631_v30 = vpop.f32.mrb[0].mxu0 }
 0x16a   : > { %v684_v31 = vpop.f32.mrb[0].mxu1  ;;  %v833_v32 = vmul.f32 %v4888_v27, %v631_v30  ;;  %v633_v34 = vpop.f32.mrb[1].mxu0 }
 0x16b   : > { %v835_v33 = vmul.f32 %v4888_v27, %v684_v31  ;;  %v686_v35 = vpop.f32.mrb[1].mxu1  ;;  %v635_v36 = vpop.f32.mrb[2].mxu0  ;;  %v834_v50 = vmul.f32 %v4888_v27, %v633_v34 }
 0x16c   : > { %v4896_v37 = vpop.f32.mrb[2].mxu1  ;;  %v889_v38 = vadd.f32 %v4892_v29, %v833_v32  ;;  %v4900_v40 = vpop.f32.mrb[3].mxu0  ;;  %v836_v56 = vmul.f32 %v4888_v27, %v686_v35  ;;  %v841_v24 = vmul.f32 %v4890_v28, %v635_v36 }
 0x16d   : > { %v891_v39 = vadd.f32 %v4892_v29, %v835_v33  ;;  %v4902_v41 = vpop.f32.mrb[3].mxu1  ;;  %v4922_v55 = vadd.f32 %v4892_v29, %v834_v50  ;;  %v843_v31 = vmul.f32 %v4890_v28, %v4896_v37 }
 0x16e   : > { %v921_v42 = vsub.f32 0.0, %v889_v38  ;;  %v4935_v63 = vadd.f32 %v4892_v29, %v836_v56  ;;  %v897_v32 = vadd.f32 %v4973_v25, %v841_v24 }
 0x16f   : > { %v923_v43 = vsub.f32 0.0, %v891_v39  ;;  %v922_v62 = vsub.f32 0.0, %v4922_v55  ;;  %v899_v35 = vadd.f32 %v4973_v25, %v843_v31 }
 0x170   : > { %v953_v44 = vmul.f32 1.442695, %v921_v42  ;;  %v924_v10 = vsub.f32 0.0, %v4935_v63  ;;  %v929_v36 = vsub.f32 0.0, %v897_v32 }
 0x171   : > { %v957_v45 = vmul.f32 1.442695, %v923_v43  ;;  %v4904_v46 = vpop.f32.mrb[4].mxu0  ;;  %v955_v9 = vmul.f32 1.442695, %v922_v62  ;;  %v842_v62 = vmul.f32 %v4890_v28, %v4900_v40 }
 0x172   : > { %3996 = vpow2.f32 %v953_v44  ;;  %v4906_v47 = vpop.f32.mrb[4].mxu1  ;;  %v4908_v48 = vpop.f32.mrb[5].mxu0  ;;  %v959_v17 = vmul.f32 1.442695, %v924_v10 }
 0x173   : > { %3998 = vpow2.f32 %v957_v45  ;;  %v4910_v49 = vpop.f32.mrb[5].mxu1  ;;  %v4913_v51 = vpop.f32.mrb[6].mxu0 }
 0x174   : > { %v4915_v52 = vpop.f32.mrb[6].mxu1  ;;  %v4917_v53 = vpop.f32.mrb[7].mxu0 }
 0x175   : > { %v4919_v54 = vpop.f32.mrb[7].mxu1 }
 0x179   : > { %v4925_v57 = vpop.f32.mrb[8].mxu0 }
 0x17a   : > { %v4927_v58 = vpop.f32.mrb[8].mxu1  ;;  %v4929_v59 = vpop.f32.mrb[9].mxu0 }
 0x17b   : > { %v4931_v60 = vpop.f32.mrb[9].mxu1  ;;  %v4937_v1 = vpop.f32.mrb[10].mxu0  ;;  %v838_v0 = vmul.f32 %v4888_v27, %v4929_v59 }
 0x17c   : > { %v3997_v61 = vpop.eup %3996  ;;  %v4939_v2 = vpop.f32.mrb[10].mxu1 }
 0x17d   : > { %v3999_v3 = vpop.eup %3998  ;;  %v1017_v4 = vadd.f32 1.0, %v3997_v61  ;;  %v4941_v5 = vpop.f32.mrb[11].mxu0 }
 0x17e   : > { %v4943_v6 = vpop.f32.mrb[11].mxu1  ;;  %v1019_v7 = vadd.f32 1.0, %v3999_v3 }
 0x17f   : > { %4000 = vrcp.f32 %v1017_v4  ;;  %v898_v4 = vadd.f32 %v4973_v25, %v842_v62 }
 0x180   : > { %4002 = vrcp.f32 %v1019_v7 }
 0x181   : > { %v4948_v11 = vpop.f32.mrb[12].mxu0  ;;  %4004 = vpow2.f32 %v955_v9  ;;  %v930_v7 = vsub.f32 0.0, %v898_v4 }
 0x182   : > { %v4950_v12 = vpop.f32.mrb[12].mxu1  ;;  %v4952_v13 = vpop.f32.mrb[13].mxu0  ;;  %4006 = vpow2.f32 %v959_v17 }
 0x183   : > { %v4954_v14 = vpop.f32.mrb[13].mxu1  ;;  %v4956_v15 = vpop.f32.mrb[14].mxu0  ;;  %v971_v10 = vmul.f32 1.442695, %v930_v7  ;;  %v859_v7 = vmul.f32 %v4964_v20, %v4915_v52 }
 0x184   : > { %v4958_v16 = vpop.f32.mrb[14].mxu1  ;;  %v4960_v18 = vpop.f32.mrb[15].mxu0 }
 0x185   : > { %v4962_v19 = vpop.f32.mrb[15].mxu1 }
 0x189   : > { %v4001_v21 = vpop.eup %4000 }
 0x18a   : > { %v4966_v22 = vmul.f32 %v4001_v21, %v889_v38  ;;  %v4003_v23 = vpop.eup %4002  ;;  %v931_v38 = vsub.f32 0.0, %v899_v35 }
 0x18b   : > { %v4005_v26 = vpop.eup %4004  ;;  %v4975_v30 = vmul.f32 %v4003_v23, %v891_v39  ;;  %v969_v39 = vmul.f32 1.442695, %v929_v36  ;;  %v851_v36 = vmul.f32 %v4945_v8, %v4906_v47 }
 0x18c   : > { %1891 = vrot.lane.b32.xlu1 %v4966_v22, %s4533_s13  ;;  %1113 = vrot.lane.b32.xlu0 %v4966_v22, %s4534_s18  ;;  %v1018_v33 = vadd.f32 1.0, %v4005_v26  ;;  %v4007_v34 = vpop.eup %4006  ;;  %v973_v42 = vmul.f32 1.442695, %v931_v38  ;;  %v850_v38 = vmul.f32 %v4945_v8, %v4908_v48 }
 0x18d   : > { %v1020_v37 = vadd.f32 1.0, %v4007_v34 }
 0x18e   : > { %4008 = vrcp.f32 %v1018_v33  ;;  %v849_v33 = vmul.f32 %v4945_v8, %v4904_v46 }
 0x18f   : > { %4010 = vrcp.f32 %v1020_v37 }
 0x190   : > { %1907 = vrot.lane.b32.xlu1 %v4975_v30, %s4533_s13  ;;  %1129 = vrot.lane.b32.xlu0 %v4975_v30, %s4534_s18  ;;  %4012 = vpow2.f32 %v969_v39 }
 0x191   : > { %4014 = vpow2.f32 %v973_v42  ;;  %v852_v42 = vmul.f32 %v4945_v8, %v4910_v49  ;;  %v5103_v49 = vpop.permute.xlu1 %886 }
 0x192   : > { %v5121_v52 = vadd.f32 %v5103_v49, %v859_v7 }
 0x194   : > { %2085 = vrot.lane.b32.xlu1 %v4966_v22, %s4535_s25  ;;  %1276 = vrot.lane.b32.xlu0 %v4966_v22, %s4536_s9 }
 0x198   : > { %2101 = vrot.lane.b32.xlu1 %v4975_v30, %s4535_s25  ;;  %1292 = vrot.lane.b32.xlu0 %v4975_v30, %s4536_s9  ;;  %v4009_v43 = vpop.eup %4008 }
 0x199   : > { %v5002_v44 = vmul.f32 %v4009_v43, %v4922_v55  ;;  %v4011_v45 = vpop.eup %4010 }
 0x19a   : > { %v4013_v50 = vpop.eup %4012  ;;  %v5009_v56 = vmul.f32 %v4011_v45, %v4935_v63  ;;  %v844_v63 = vmul.f32 %v4890_v28, %v4902_v41 }
 0x19b   : > { %v1025_v55 = vadd.f32 1.0, %v4013_v50  ;;  %v4015_v61 = vpop.eup %4014 }
 0x19c   : > { %2279 = vrot.lane.b32.xlu1 %v4966_v22, %s4537_s24  ;;  %1438 = vrot.lane.b32.xlu0 %v4966_v22, %s4538_s29  ;;  %v1027_v3 = vadd.f32 1.0, %v4015_v61  ;;  %v5029_v40 = vadd.f32 %v4973_v25, %v844_v63  ;;  %v857_v61 = vmul.f32 %v4964_v20, %v4913_v51 }
 0x19d   : > { %4016 = vrcp.f32 %v1025_v55 }
 0x19e   : > { %4018 = vrcp.f32 %v1027_v3  ;;  %v932_v9 = vsub.f32 0.0, %v5029_v40  ;;  %v5111_v51 = vadd.f32 %v5103_v49, %v857_v61 }
 0x19f   : > { %4020 = vpow2.f32 %v971_v10 }
 0x1a0   : > { %2295 = vrot.lane.b32.xlu1 %v4975_v30, %s4537_s24  ;;  %1454 = vrot.lane.b32.xlu0 %v4975_v30, %s4538_s29  ;;  %v975_v23 = vmul.f32 1.442695, %v932_v9 }
 0x1a2   : > { %4022 = vpow2.f32 %v975_v23  ;;  %v947_v23 = vsub.f32 0.0, %v5121_v52 }
 0x1a4   : > { %1600 = vrot.lane.b32.xlu0 %v4966_v22, %s4539_s19  ;;  %1899 = vrot.lane.b32.xlu1 %v5002_v44, %s4533_s13 }
 0x1a7   : > { %v4017_v41 = vpop.eup %4016 }
 0x1a8   : > { %1616 = vrot.lane.b32.xlu0 %v4975_v30, %s4539_s19  ;;  %1915 = vrot.lane.b32.xlu1 %v5009_v56, %s4533_s13  ;;  %v5040_v17 = vmul.f32 %v4017_v41, %v897_v32  ;;  %v4019_v21 = vpop.eup %4018 }
 0x1a9   : > { %v5046_v24 = vmul.f32 %v4019_v21, %v899_v35  ;;  %v4021_v26 = vpop.eup %4020  ;;  %v5066_v35 = vpop.permute.xlu0 %881  ;;  %v945_v21 = vsub.f32 0.0, %v5111_v51 }
 0x1aa   : > { %v1026_v31 = vadd.f32 1.0, %v4021_v26  ;;  %v5071_v37 = vadd.f32 %v5066_v35, %v849_v33  ;;  %v5080_v46 = vadd.f32 %v5066_v35, %v851_v36  ;;  %v5084_v47 = vadd.f32 %v5066_v35, %v850_v38 }
 0x1ab   : > { %v5095_v55 = vadd.f32 %v5066_v35, %v852_v42  ;;  %v1001_v26 = vmul.f32 1.442695, %v945_v21 }
 0x1ac   : > { %2093 = vrot.lane.b32.xlu1 %v5002_v44, %s4535_s25  ;;  %1121 = vrot.lane.b32.xlu0 %v5002_v44, %s4534_s18  ;;  %v4023_v32 = vpop.eup %4022  ;;  %4024 = vrcp.f32 %v1026_v31  ;;  %v937_v39 = vsub.f32 0.0, %v5071_v37  ;;  %v939_v43 = vsub.f32 0.0, %v5080_v46  ;;  %v938_v50 = vsub.f32 0.0, %v5084_v47 }
 0x1ad   : > { %v1028_v34 = vadd.f32 1.0, %v4023_v32  ;;  %v940_v9 = vsub.f32 0.0, %v5095_v55  ;;  %v1005_v31 = vmul.f32 1.442695, %v947_v23 }
 0x1ae   : > { %v985_v45 = vmul.f32 1.442695, %v937_v39  ;;  %v989_v63 = vmul.f32 1.442695, %v939_v43  ;;  %v987_v41 = vmul.f32 1.442695, %v938_v50 }
 0x1af   : > { %4026 = vrcp.f32 %v1028_v34  ;;  %v991_v10 = vmul.f32 1.442695, %v940_v9 }
 0x1b0   : > { %2109 = vrot.lane.b32.xlu1 %v5009_v56, %s4535_s25  ;;  %1137 = vrot.lane.b32.xlu0 %v5009_v56, %s4534_s18  ;;  %4028 = vpow2.f32 %v985_v45  ;;  %v860_v45 = vmul.f32 %v4964_v20, %v4919_v54 }
 0x1b1   : > { %4030 = vpow2.f32 %v989_v63 }
 0x1b2   : > { %4032 = vpow2.f32 %v987_v41 }
 0x1b3   : > { %4034 = vpow2.f32 %v991_v10 }
 0x1b4   : > { %2287 = vrot.lane.b32.xlu1 %v5002_v44, %s4537_s24  ;;  %1284 = vrot.lane.b32.xlu0 %v5002_v44, %s4536_s9  ;;  %4036 = vpow2.f32 %v1001_v26 }
 0x1b5   : > { %4038 = vpow2.f32 %v1005_v31 }
 0x1b6   : > { %v4025_v48 = vpop.eup %4024 }
 0x1b7   : > { %v5105_v62 = vmul.f32 %v4025_v48, %v898_v4  ;;  %v858_v48 = vmul.f32 %v4964_v20, %v4917_v53  ;;  %v5161_v53 = vadd.f32 %v5103_v49, %v860_v45 }
 0x1b8   : > { %2303 = vrot.lane.b32.xlu1 %v5009_v56, %s4537_s24  ;;  %1300 = vrot.lane.b32.xlu0 %v5009_v56, %s4536_s9 }
 0x1b9   : > { %v4027_v3 = vpop.eup %4026  ;;  %v5154_v50 = vadd.f32 %v5103_v49, %v858_v48  ;;  %v948_v21 = vsub.f32 0.0, %v5161_v53 }
 0x1ba   : > { %v5118_v4 = vmul.f32 %v4027_v3, %v5029_v40  ;;  %v4029_v40 = vpop.eup %4028 }
 0x1bb   : > { %v4031_v32 = vpop.eup %4030  ;;  %v1033_v33 = vadd.f32 1.0, %v4029_v40  ;;  %v946_v7 = vsub.f32 0.0, %v5154_v50 }
 0x1bc   : > { %1446 = vrot.lane.b32.xlu0 %v5002_v44, %s4538_s29  ;;  %1115 = vrot.lane.b32.xlu1 %v5040_v17, %s4534_s18  ;;  %v4033_v34 = vpop.eup %4032  ;;  %v1035_v36 = vadd.f32 1.0, %v4031_v32 }
 0x1bd   : > { %4040 = vrcp.f32 %v1033_v33  ;;  %v1034_v38 = vadd.f32 1.0, %v4033_v34  ;;  %v4035_v39 = vpop.eup %4034  ;;  %v1003_v23 = vmul.f32 1.442695, %v946_v7  ;;  %v1007_v33 = vmul.f32 1.442695, %v948_v21 }
 0x1be   : > { %4042 = vrcp.f32 %v1035_v36  ;;  %v1036_v42 = vadd.f32 1.0, %v4035_v39  ;;  %v4037_v43 = vpop.eup %4036 }
 0x1bf   : > { %4044 = vrcp.f32 %v1034_v38  ;;  %v1041_v61 = vadd.f32 1.0, %v4037_v43  ;;  %v4039_v3 = vpop.eup %4038 }
 0x1c0   : > { %1462 = vrot.lane.b32.xlu0 %v5009_v56, %s4538_s29  ;;  %1131 = vrot.lane.b32.xlu1 %v5046_v24, %s4534_s18  ;;  %4046 = vrcp.f32 %v1036_v42  ;;  %v1043_v41 = vadd.f32 1.0, %v4039_v3 }
 0x1c1   : > { %4048 = vrcp.f32 %v1041_v61  ;;  %v837_v61 = vmul.f32 %v4888_v27, %v4925_v57 }
 0x1c2   : > { %4050 = vrcp.f32 %v1043_v41 }
 0x1c3   : > { %4052 = vpow2.f32 %v1003_v23  ;;  %v5226_v41 = vadd.f32 %v4892_v29, %v837_v61 }
 0x1c4   : > { %1608 = vrot.lane.b32.xlu0 %v5002_v44, %s4539_s19  ;;  %1278 = vrot.lane.b32.xlu1 %v5040_v17, %s4536_s9  ;;  %4054 = vpow2.f32 %v1007_v33 }
 0x1c5   : > { %v925_v23 = vsub.f32 0.0, %v5226_v41 }
 0x1c7   : > { %v4041_v63 = vpop.eup %4040 }
 0x1c8   : > { %1624 = vrot.lane.b32.xlu0 %v5009_v56, %s4539_s19  ;;  %1294 = vrot.lane.b32.xlu1 %v5046_v24, %s4536_s9  ;;  %v4043_v54 = vpop.eup %4042  ;;  %v5165_v9 = vmul.f32 %v4041_v63, %v5071_v37 }
 0x1c9   : > { %v4045_v10 = vpop.eup %4044  ;;  %v5173_v26 = vmul.f32 %v4043_v54, %v5080_v46  ;;  %v839_v54 = vmul.f32 %v4888_v27, %v4927_v58 }
 0x1ca   : > { %v5176_v40 = vmul.f32 %v4045_v10, %v5084_v47  ;;  %v4047_v32 = vpop.eup %4046 }
 0x1cb   : > { %v5187_v34 = vmul.f32 %v4047_v32, %v5095_v55  ;;  %v4049_v36 = vpop.eup %4048  ;;  %v5240_v32 = vadd.f32 %v4892_v29, %v839_v54  ;;  %v845_v54 = vmul.f32 %v4890_v28, %v4937_v1 }
 0x1cc   : > { %1893 = vrot.lane.b32.xlu0 %v5040_v17, %s4533_s13  ;;  %1440 = vrot.lane.b32.xlu1 %v5040_v17, %s4538_s29  ;;  %v5198_v38 = vmul.f32 %v4049_v36, %v5111_v51  ;;  %v4051_v55 = vpop.eup %4050  ;;  %v961_v36 = vmul.f32 1.442695, %v925_v23 }
 0x1cd   : > { %v5209_v48 = vmul.f32 %v4051_v55, %v5121_v52  ;;  %v4053_v51 = vpop.eup %4052  ;;  %v927_v55 = vsub.f32 0.0, %v5240_v32  ;;  %v5275_v1 = vadd.f32 %v4973_v25, %v845_v54 }
 0x1ce   : > { %v1042_v3 = vadd.f32 1.0, %v4053_v51  ;;  %v4055_v52 = vpop.eup %4054 }
 0x1cf   : > { %v1044_v57 = vadd.f32 1.0, %v4055_v52  ;;  %v965_v52 = vmul.f32 1.442695, %v927_v55  ;;  %v847_v55 = vmul.f32 %v4890_v28, %v4939_v2  ;;  %v933_v2 = vsub.f32 0.0, %v5275_v1 }
 0x1d0   : > { %1909 = vrot.lane.b32.xlu0 %v5046_v24, %s4533_s13  ;;  %1456 = vrot.lane.b32.xlu1 %v5046_v24, %s4538_s29  ;;  %4056 = vrcp.f32 %v1042_v3 }
 0x1d1   : > { %4058 = vrcp.f32 %v1044_v57  ;;  %v5297_v54 = vadd.f32 %v4973_v25, %v847_v55 }
 0x1d2   : > { %4060 = vpow2.f32 %v961_v36 }
 0x1d3   : > { %4062 = vpow2.f32 %v965_v52  ;;  %v840_v52 = vmul.f32 %v4888_v27, %v4931_v60  ;;  %v977_v60 = vmul.f32 1.442695, %v933_v2 }
 0x1d4   : > { %2087 = vrot.lane.b32.xlu0 %v5040_v17, %s4535_s25  ;;  %1602 = vrot.lane.b32.xlu1 %v5040_v17, %s4539_s19 }
 0x1d5   : > { %v5309_v27 = vadd.f32 %v4892_v29, %v840_v52  ;;  %4064 = vpow2.f32 %v977_v60 }
 0x1d8   : > { %2103 = vrot.lane.b32.xlu0 %v5046_v24, %s4535_s25  ;;  %1618 = vrot.lane.b32.xlu1 %v5046_v24, %s4539_s19 }
 0x1da   : > { %v4057_v3 = vpop.eup %4056 }
 0x1db   : > { %v4059_v36 = vpop.eup %4058 }
 0x1dc   : > { %2281 = vrot.lane.b32.xlu0 %v5040_v17, %s4537_s24  ;;  %1123 = vrot.lane.b32.xlu1 %v5105_v62, %s4534_s18 }
 0x1e0   : > { %2297 = vrot.lane.b32.xlu0 %v5046_v24, %s4537_s24  ;;  %1139 = vrot.lane.b32.xlu1 %v5118_v4, %s4534_s18 }
 0x1e4   : > { %1901 = vrot.lane.b32.xlu0 %v5105_v62, %s4533_s13  ;;  %1286 = vrot.lane.b32.xlu1 %v5105_v62, %s4536_s9 }
 0x1e8   : > { %1917 = vrot.lane.b32.xlu0 %v5118_v4, %s4533_s13  ;;  %1302 = vrot.lane.b32.xlu1 %v5118_v4, %s4536_s9 }
 0x1ec   : > { %2095 = vrot.lane.b32.xlu0 %v5105_v62, %s4535_s25  ;;  %1448 = vrot.lane.b32.xlu1 %v5105_v62, %s4538_s29 }
 0x1f0   : > { %2111 = vrot.lane.b32.xlu0 %v5118_v4, %s4535_s25  ;;  %1464 = vrot.lane.b32.xlu1 %v5118_v4, %s4538_s29 }
 0x1f4   : > { %2289 = vrot.lane.b32.xlu0 %v5105_v62, %s4537_s24  ;;  %1610 = vrot.lane.b32.xlu1 %v5105_v62, %s4539_s19 }
 0x1f8   : > { %2305 = vrot.lane.b32.xlu0 %v5118_v4, %s4537_s24  ;;  %1626 = vrot.lane.b32.xlu1 %v5118_v4, %s4539_s19 }
 0x1fc   : > { %1895 = vrot.lane.b32.xlu1 %v5165_v9, %s4533_s13  ;;  %1117 = vrot.lane.b32.xlu0 %v5165_v9, %s4534_s18 }
 0x1fe   : > { %v5178_v31 = vpop.permute.xlu1 %1891  ;;  %v5180_v37 = vpop.permute.xlu0 %1113 }
 0x1ff   : > { %8603 = vst [vmem:[#allocation17_spill] sm:$0xff] %v5178_v31  ;;  %8604 = vst [vmem:[#allocation18_spill] sm:$0xff] %v5180_v37 }
 0x200   : > { %1133 = vrot.lane.b32.xlu0 %v5173_v26, %s4534_s18  ;;  %1612 = vrot.lane.b32.xlu1 %v5176_v40, %s4539_s19 }
 0x202   : > { %v5189_v46 = vpop.permute.xlu1 %1907  ;;  %v5191_v47 = vpop.permute.xlu0 %1129 }
 0x204   : > { %1280 = vrot.lane.b32.xlu0 %v5165_v9, %s4536_s9  ;;  %1628 = vrot.lane.b32.xlu1 %v5187_v34, %s4539_s19 }
 0x206   : > { %v5200_v39 = vpop.permute.xlu1 %2085  ;;  %v5202_v42 = vpop.permute.xlu0 %1276 }
 0x207   : > { %8605 = vst [vmem:[#allocation19_spill] sm:$0xff] %v5200_v39  ;;  %8606 = vst [vmem:[#allocation20_spill] sm:$0xff] %v5202_v42 }
 0x208   : > { %1296 = vrot.lane.b32.xlu0 %v5173_v26, %s4536_s9  ;;  %1119 = vrot.lane.b32.xlu1 %v5198_v38, %s4534_s18 }
 0x20a   : > { %v5211_v43 = vpop.permute.xlu1 %2101  ;;  %v5213_v45 = vpop.permute.xlu0 %1292 }
 0x20b   : > { %8607 = vst [vmem:[#allocation21_spill] sm:$0xff] %v5211_v43  ;;  %8608 = vst [vmem:[#allocation22_spill] sm:$0xff] %v5213_v45  ;;  %v928_v45 = vsub.f32 0.0, %v5309_v27 }
 0x20c   : > { %1442 = vrot.lane.b32.xlu0 %v5165_v9, %s4538_s29  ;;  %1135 = vrot.lane.b32.xlu1 %v5209_v48, %s4534_s18 }
 0x20e   : > { %v5221_v63 = vpop.permute.xlu1 %2279  ;;  %v5223_v7 = vpop.permute.xlu0 %1438 }
 0x20f   : > { %8609 = vst [vmem:[#allocation23_spill] sm:$0xff] %v5221_v63  ;;  %8610 = vst [vmem:[#allocation24_spill] sm:$0xff] %v5223_v7  ;;  %v5272_v63 = vmul.f32 %v4057_v3, %v5154_v50  ;;  %v5288_v50 = vadd.f32 %v4892_v29, %v838_v0  ;;  %v5291_v3 = vmul.f32 %v4059_v36, %v5161_v53  ;;  %v935_v36 = vsub.f32 0.0, %v5297_v54 }
 0x210   : > { %1458 = vrot.lane.b32.xlu0 %v5173_v26, %s4538_s29  ;;  %1282 = vrot.lane.b32.xlu1 %v5198_v38, %s4536_s9 }
 0x211   : > { %v926_v53 = vsub.f32 0.0, %v5288_v50  ;;  %v981_v29 = vmul.f32 1.442695, %v935_v36 }
 0x212   : > { %v5234_v10 = vpop.permute.xlu1 %2295  ;;  %v5236_v21 = vpop.permute.xlu0 %1454 }
 0x213   : > { %8611 = vst [vmem:[#allocation25_spill] sm:$0xff] %v5234_v10  ;;  %8612 = vst [vmem:[#allocation26_spill] sm:$0xff] %v5236_v21  ;;  %v963_v43 = vmul.f32 1.442695, %v926_v53  ;;  %v846_v53 = vmul.f32 %v4890_v28, %v4941_v5 }
 0x214   : > { %1604 = vrot.lane.b32.xlu0 %v5165_v9, %s4539_s19  ;;  %1298 = vrot.lane.b32.xlu1 %v5209_v48, %s4536_s9 }
 0x215   : > { %v5340_v36 = vadd.f32 %v4973_v25, %v846_v53 }
 0x216   : > { %v5246_v58 = vpop.permute.xlu0 %1600  ;;  %v5248_v33 = vpop.permute.xlu1 %1899 }
 0x217   : > { %8613 = vst [vmem:[#allocation27_spill] sm:$0xff] %v5246_v58 }
 0x218   : > { %1620 = vrot.lane.b32.xlu0 %v5173_v26, %s4539_s19  ;;  %1444 = vrot.lane.b32.xlu1 %v5198_v38, %s4538_s29 }
 0x21a   : > { %v5255_v51 = vpop.permute.xlu0 %1616  ;;  %v5257_v61 = vpop.permute.xlu1 %1915 }
 0x21b   : > { %8614 = vst [vmem:[#allocation28_spill] sm:$0xff] %v5255_v51 }
 0x21c   : > { %1125 = vrot.lane.b32.xlu0 %v5176_v40, %s4534_s18  ;;  %1460 = vrot.lane.b32.xlu1 %v5209_v48, %s4538_s29 }
 0x21e   : > { %v5265_v57 = vpop.permute.xlu1 %2093  ;;  %v5267_v23 = vpop.permute.xlu0 %1121 }
 0x220   : > { %1141 = vrot.lane.b32.xlu0 %v5187_v34, %s4534_s18  ;;  %1127 = vrot.lane.b32.xlu1 %v5272_v63, %s4534_s18 }
 0x222   : > { %v5283_v7 = vpop.permute.xlu1 %2109  ;;  %v5285_v59 = vpop.permute.xlu0 %1137 }
 0x223   : > { %8615 = vst [vmem:[#allocation29_spill] sm:$0xff] %v5283_v7  ;;  %8616 = vst [vmem:[#allocation30_spill] sm:$0xff] %v5285_v59  ;;  %v4061_v59 = vpop.eup %4060 }
 0x224   : > { %1288 = vrot.lane.b32.xlu0 %v5176_v40, %s4536_s9  ;;  %1143 = vrot.lane.b32.xlu1 %v5291_v3, %s4534_s18  ;;  %v1021_v55 = vadd.f32 1.0, %v4061_v59  ;;  %v4063_v21 = vpop.eup %4062 }
 0x225   : > { %v1023_v52 = vadd.f32 1.0, %v4063_v21  ;;  %v4065_v5 = vpop.eup %4064 }
 0x226   : > { %v5303_v0 = vpop.permute.xlu1 %2287  ;;  %v5305_v7 = vpop.permute.xlu0 %1284  ;;  %4066 = vrcp.f32 %v1021_v55 }
 0x227   : > { %8617 = vst [vmem:[#allocation31_spill] sm:$0xff] %v5303_v0  ;;  %4068 = vpow2.f32 %v963_v43  ;;  %v848_v43 = vmul.f32 %v4890_v28, %v4943_v6 }
 0x228   : > { %1304 = vrot.lane.b32.xlu0 %v5187_v34, %s4536_s9  ;;  %1290 = vrot.lane.b32.xlu1 %v5272_v63, %s4536_s9  ;;  %4070 = vpow2.f32 %v981_v29 }
 0x229   : > { %4072 = vrcp.f32 %v1023_v52  ;;  %v5354_v52 = vadd.f32 %v4973_v25, %v848_v43 }
 0x22a   : > { %v5316_v10 = vpop.permute.xlu1 %2303  ;;  %v5318_v0 = vpop.permute.xlu0 %1300 }
 0x22b   : > { %8618 = vst [vmem:[#allocation32_spill] sm:$0xff] %v5316_v10  ;;  %8619 = vst [vmem:[#allocation33_spill] sm:$0xff] %v5318_v0  ;;  %v967_v10 = vmul.f32 1.442695, %v928_v45  ;;  %v936_v25 = vsub.f32 0.0, %v5354_v52 }
 0x22c   : > { %1450 = vrot.lane.b32.xlu0 %v5176_v40, %s4538_s29  ;;  %1306 = vrot.lane.b32.xlu1 %v5291_v3, %s4536_s9 }
 0x22d   : > { %4074 = vpow2.f32 %v967_v10  ;;  %v934_v10 = vsub.f32 0.0, %v5340_v36 }
 0x22e   : > { %v5325_v59 = vpop.permute.xlu0 %1446  ;;  %v5327_v2 = vpop.permute.xlu1 %1115 }
 0x22f   : > { %8620 = vst [vmem:[#allocation34_spill] sm:$0xff] %v5325_v59  ;;  %8621 = vst [vmem:[#allocation35_spill] sm:$0xff] %v5327_v2  ;;  %v1029_v2 = vadd.f32 1.0, %v4065_v5  ;;  %v979_v59 = vmul.f32 1.442695, %v934_v10 }
 0x230   : > { %1466 = vrot.lane.b32.xlu0 %v5187_v34, %s4538_s29  ;;  %1452 = vrot.lane.b32.xlu1 %v5272_v63, %s4538_s29  ;;  %v4067_v29 = vpop.eup %4066  ;;  %v983_v10 = vmul.f32 1.442695, %v936_v25  ;;  %v855_v25 = vmul.f32 %v4945_v8, %v4950_v12 }
 0x231   : > { %v4069_v28 = vpop.eup %4068  ;;  %v5361_v53 = vmul.f32 %v4067_v29, %v5226_v41  ;;  %4076 = vrcp.f32 %v1029_v2  ;;  %v853_v2 = vmul.f32 %v4945_v8, %v4948_v11  ;;  %v856_v11 = vmul.f32 %v4945_v8, %v4954_v14 }
 0x232   : > { %v5335_v21 = vpop.permute.xlu0 %1462  ;;  %v5337_v60 = vpop.permute.xlu1 %1131  ;;  %v1022_v43 = vadd.f32 1.0, %v4069_v28  ;;  %4078 = vpow2.f32 %v979_v59 }
 0x233   : > { %8622 = vst [vmem:[#allocation36_spill] sm:$0xff] %v5335_v21  ;;  %8623 = vst [vmem:[#allocation37_spill] sm:$0xff] %v5337_v60  ;;  %v4071_v6 = vpop.eup %4070  ;;  %v5422_v14 = vadd.f32 %v5066_v35, %v856_v11 }
 0x234   : > { %1606 = vrot.lane.b32.xlu0 %v5198_v38, %s4539_s19  ;;  %1468 = vrot.lane.b32.xlu1 %v5291_v3, %s4538_s29  ;;  %v4073_v21 = vpop.eup %4072  ;;  %v1031_v5 = vadd.f32 1.0, %v4071_v6  ;;  %4080 = vrcp.f32 %v1022_v43  ;;  %v5398_v6 = vadd.f32 %v5066_v35, %v853_v2 }
 0x235   : > { %v5373_v41 = vmul.f32 %v4073_v21, %v5240_v32 }
 0x236   : > { %v5348_v45 = vpop.permute.xlu0 %1608  ;;  %v5350_v55 = vpop.permute.xlu1 %1278  ;;  %4082 = vrcp.f32 %v1031_v5  ;;  %v941_v12 = vsub.f32 0.0, %v5398_v6 }
 0x237   : > { %8624 = vst [vmem:[#allocation38_spill] sm:$0xff] %v5350_v55  ;;  %v4075_v0 = vpop.eup %4074  ;;  %8627 = vst [vmem:[#allocation41_spill] sm:$0xff] %v5373_v41  ;;  %4084 = vpow2.f32 %v983_v10 }
 0x238   : > { %1622 = vrot.lane.b32.xlu0 %v5209_v48, %s4539_s19  ;;  %1614 = vrot.lane.b32.xlu1 %v5272_v63, %s4539_s19  ;;  %v1024_v28 = vadd.f32 1.0, %v4075_v0  ;;  %v993_v11 = vmul.f32 1.442695, %v941_v12 }
 0x23a   : > { %v5363_v60 = vpop.permute.xlu0 %1624  ;;  %v5365_v55 = vpop.permute.xlu1 %1294  ;;  %4086 = vrcp.f32 %v1024_v28 }
 0x23b   : > { %8625 = vst [vmem:[#allocation39_spill] sm:$0xff] %v5363_v60  ;;  %8626 = vst [vmem:[#allocation40_spill] sm:$0xff] %v5365_v55  ;;  %v4077_v21 = vpop.eup %4076 }
 0x23c   : > { %1145 = vrot.lane.b32.xlu0 %v5361_v53, %s4534_s18  ;;  %1630 = vrot.lane.b32.xlu1 %v5291_v3, %s4539_s19  ;;  %v4079_v43 = vpop.eup %4078  ;;  %v5413_v2 = vmul.f32 %v4077_v21, %v5275_v1 }
 0x23e   : > { %v5375_v29 = vpop.permute.xlu0 %1893  ;;  %v5377_v55 = vpop.permute.xlu1 %1440 }
 0x23f   : > { %8628 = vst [vmem:[#allocation42_spill] sm:$0xff] %v5375_v29  ;;  %8629 = vst [vmem:[#allocation43_spill] sm:$0xff] %v5377_v55  ;;  %v4081_v28 = vpop.eup %4080  ;;  %v1030_v55 = vadd.f32 1.0, %v4079_v43  ;;  %v863_v43 = vmul.f32 %v4964_v20, %v4958_v16 }
 0x240   : > { %1161 = vrot.lane.b32.xlu0 %v5373_v41, %s4534_s18  ;;  %1923 = vrot.lane.b32.xlu1 %v5361_v53, %s4533_s13  ;;  %v5429_v21 = vmul.f32 %v4081_v28, %v5288_v50 }
 0x241   : > { %4088 = vrcp.f32 %v1030_v55 }
 0x242   : > { %v5383_v60 = vpop.permute.xlu0 %1909  ;;  %v5385_v32 = vpop.permute.xlu1 %1456  ;;  %8636 = vst [vmem:[#allocation50_spill] sm:$0xff] %v5429_v21  ;;  %4090 = vpow2.f32 %v993_v11 }
 0x243   : > { %8630 = vst [vmem:[#allocation44_spill] sm:$0xff] %v5383_v60  ;;  %8631 = vst [vmem:[#allocation45_spill] sm:$0xff] %v5385_v32  ;;  %v5417_v32 = vadd.f32 %v5066_v35, %v855_v25 }
 0x244   : > { %1308 = vrot.lane.b32.xlu0 %v5361_v53, %s4536_s9  ;;  %2117 = vrot.lane.b32.xlu1 %v5361_v53, %s4535_s25 }
 0x245   : > { %v943_v60 = vsub.f32 0.0, %v5417_v32 }
 0x246   : > { %v5393_v0 = vpop.permute.xlu0 %2087  ;;  %v5395_v59 = vpop.permute.xlu1 %1602 }
 0x247   : > { %8632 = vst [vmem:[#allocation46_spill] sm:$0xff] %v5393_v0  ;;  %8633 = vst [vmem:[#allocation47_spill] sm:$0xff] %v5395_v59  ;;  %v4083_v0 = vpop.eup %4082 }
 0x248   : > { %1324 = vrot.lane.b32.xlu0 %v5373_v41, %s4536_s9  ;;  %2311 = vrot.lane.b32.xlu1 %v5361_v53, %s4537_s24  ;;  %v4085_v1 = vpop.eup %4084  ;;  %v5436_v29 = vmul.f32 %v4083_v0, %v5297_v54 }
 0x249   : > { %v1032_v0 = vadd.f32 1.0, %v4085_v1 }
 0x24a   : > { %v5408_v5 = vpop.permute.xlu0 %2103  ;;  %v5410_v10 = vpop.permute.xlu1 %1618  ;;  %8639 = vst [vmem:[#allocation53_spill] sm:$0xff] %v5436_v29 }
 0x24b   : > { %8634 = vst [vmem:[#allocation48_spill] sm:$0xff] %v5408_v5  ;;  %8635 = vst [vmem:[#allocation49_spill] sm:$0xff] %v5410_v10  ;;  %v861_v5 = vmul.f32 %v4964_v20, %v4956_v15  ;;  %v4087_v10 = vpop.eup %4086  ;;  %v944_v15 = vsub.f32 0.0, %v5422_v14  ;;  %4092 = vrcp.f32 %v1032_v0 }
 0x24c   : > { %1470 = vrot.lane.b32.xlu0 %v5361_v53, %s4538_s29  ;;  %1147 = vrot.lane.b32.xlu1 %v5413_v2, %s4534_s18  ;;  %v5450_v54 = vmul.f32 %v4087_v10, %v5309_v27  ;;  %v5462_v27 = vadd.f32 %v5103_v49, %v863_v43 }
 0x24d   : > { %v5443_v50 = vadd.f32 %v5103_v49, %v861_v5  ;;  %v854_v5 = vmul.f32 %v4945_v8, %v4952_v13  ;;  %v999_v16 = vmul.f32 1.442695, %v944_v15  ;;  %v4089_v15 = vpop.eup %4088 }
 0x24e   : > { %v5431_v59 = vpop.permute.xlu0 %2281  ;;  %v5433_v25 = vpop.permute.xlu1 %1123  ;;  %8640 = vst [vmem:[#allocation54_spill] sm:$0xff] %v5450_v54 }
 0x24f   : > { %8637 = vst [vmem:[#allocation51_spill] sm:$0xff] %v5431_v59  ;;  %8638 = vst [vmem:[#allocation52_spill] sm:$0xff] %v5433_v25  ;;  %v997_v59 = vmul.f32 1.442695, %v943_v60  ;;  %v949_v25 = vsub.f32 0.0, %v5443_v50  ;;  %v5471_v8 = vadd.f32 %v5066_v35, %v854_v5  ;;  %v951_v60 = vsub.f32 0.0, %v5462_v27  ;;  %v4091_v43 = vpop.eup %4090 }
 0x250   : > { %1153 = vrot.lane.b32.xlu0 %v5429_v21, %s4534_s18  ;;  %1163 = vrot.lane.b32.xlu1 %v5436_v29, %s4534_s18 }
 0x251   : > { %4094 = vpow2.f32 %v997_v59  ;;  %v1009_v13 = vmul.f32 1.442695, %v949_v25  ;;  %v942_v59 = vsub.f32 0.0, %v5471_v8  ;;  %v1013_v35 = vmul.f32 1.442695, %v951_v60 }
 0x252   : > { %v5452_v28 = vpop.permute.xlu0 %2297  ;;  %v5454_v12 = vpop.permute.xlu1 %1139  ;;  %4096 = vpow2.f32 %v999_v16  ;;  %v862_v25 = vmul.f32 %v4964_v20, %v4960_v18  ;;  %v5494_v16 = vmul.f32 %v4089_v15, %v5340_v36  ;;  %v864_v60 = vmul.f32 %v4964_v20, %v4962_v19 }
 0x253   : > { %8641 = vst [vmem:[#allocation55_spill] sm:$0xff] %v5452_v28  ;;  %8642 = vst [vmem:[#allocation56_spill] sm:$0xff] %v5454_v12  ;;  %4098 = vpow2.f32 %v1009_v13  ;;  %v1037_v13 = vadd.f32 1.0, %v4091_v43  ;;  %v1799_v12 = vld [vmem:[#allocation5 + $0x420] sm:$0xff] }
 0x254   : > { %1169 = vrot.lane.b32.xlu0 %v5450_v54, %s4534_s18  ;;  %1310 = vrot.lane.b32.xlu1 %v5413_v2, %s4536_s9  ;;  %8649 = vst [vmem:[#allocation63_spill] sm:$0xff] %v5494_v16  ;;  %4100 = vpow2.f32 %v1013_v35  ;;  %v5499_v18 = vadd.f32 %v5103_v49, %v862_v25  ;;  %v5516_v20 = vadd.f32 %v5103_v49, %v864_v60 }
 0x255   : > { %v4093_v28 = vpop.eup %4092 }
 0x256   : > { %v5466_v55 = vpop.permute.xlu0 %1901  ;;  %v5468_v10 = vpop.permute.xlu1 %1286  ;;  %v950_v19 = vsub.f32 0.0, %v5499_v18 }
 0x257   : > { %8643 = vst [vmem:[#allocation57_spill] sm:$0xff] %v5466_v55  ;;  %8644 = vst [vmem:[#allocation58_spill] sm:$0xff] %v5468_v10  ;;  %v1800_v10 = vld [vmem:[#allocation5 + $0x428] sm:$0xff] }
 0x258   : > { %1316 = vrot.lane.b32.xlu0 %v5429_v21, %s4536_s9  ;;  %1326 = vrot.lane.b32.xlu1 %v5436_v29, %s4536_s9 }
 0x25a   : > { %v5478_v1 = vpop.permute.xlu0 %1917  ;;  %v5480_v11 = vpop.permute.xlu1 %1302 }
 0x25b   : > { %8645 = vst [vmem:[#allocation59_spill] sm:$0xff] %v5478_v1  ;;  %8646 = vst [vmem:[#allocation60_spill] sm:$0xff] %v5480_v11  ;;  %v995_v1 = vmul.f32 1.442695, %v942_v59  ;;  %v5510_v59 = vmul.f32 %v4093_v28, %v5354_v52  ;;  %v1011_v28 = vmul.f32 1.442695, %v950_v19 }
 0x25c   : > { %1332 = vrot.lane.b32.xlu0 %v5450_v54, %s4536_s9  ;;  %1472 = vrot.lane.b32.xlu1 %v5413_v2, %s4538_s29  ;;  %v1803_v11 = vld [vmem:[#allocation5 + $0x440] sm:$0xff] }
 0x25d   : > { %8652 = vst [vmem:[#allocation66_spill] sm:$0xff] %v5510_v59  ;;  %4102 = vpow2.f32 %v995_v1  ;;  %v952_v1 = vsub.f32 0.0, %v5516_v20 }
 0x25e   : > { %v5489_v0 = vpop.permute.xlu0 %2095  ;;  %v5491_v5 = vpop.permute.xlu1 %1448  ;;  %4104 = vrcp.f32 %v1037_v13 }
 0x25f   : > { %8647 = vst [vmem:[#allocation61_spill] sm:$0xff] %v5489_v0  ;;  %8648 = vst [vmem:[#allocation62_spill] sm:$0xff] %v5491_v5  ;;  %v4095_v0 = vpop.eup %4094 }
 0x260   : > { %1656 = vrot.lane.b32.xlu0 %v5450_v54, %s4539_s19  ;;  %1155 = vrot.lane.b32.xlu1 %v5494_v16, %s4534_s18  ;;  %v4097_v15 = vpop.eup %4096  ;;  %v1039_v35 = vadd.f32 1.0, %v4095_v0 }
 0x261   : > { %v1040_v25 = vadd.f32 1.0, %v4097_v15  ;;  %v4099_v52 = vpop.eup %4098  ;;  %v1015_v15 = vmul.f32 1.442695, %v952_v1 }
 0x262   : > { %v5505_v5 = vpop.permute.xlu0 %2111  ;;  %v5507_v36 = vpop.permute.xlu1 %1464  ;;  %4106 = vrcp.f32 %v1039_v35  ;;  %v1045_v49 = vadd.f32 1.0, %v4099_v52 }
 0x263   : > { %8650 = vst [vmem:[#allocation64_spill] sm:$0xff] %v5505_v5  ;;  %8651 = vst [vmem:[#allocation65_spill] sm:$0xff] %v5507_v36  ;;  %4108 = vrcp.f32 %v1040_v25  ;;  %v4101_v60 = vpop.eup %4100 }
 0x264   : > { %1494 = vrot.lane.b32.xlu0 %v5450_v54, %s4538_s29  ;;  %1171 = vrot.lane.b32.xlu1 %v5510_v59, %s4534_s18  ;;  %4110 = vpow2.f32 %v1011_v28  ;;  %v1047_v19 = vadd.f32 1.0, %v4101_v60 }
 0x265   : > { %4112 = vrcp.f32 %v1045_v49 }
 0x266   : > { %v5520_v43 = vpop.permute.xlu0 %2289  ;;  %v5522_v36 = vpop.permute.xlu1 %1610  ;;  %4114 = vpow2.f32 %v1015_v15 }
 0x267   : > { %8653 = vst [vmem:[#allocation67_spill] sm:$0xff] %v5520_v43  ;;  %8654 = vst [vmem:[#allocation68_spill] sm:$0xff] %v5522_v36  ;;  %v4103_v35 = vpop.eup %4102  ;;  %4116 = vrcp.f32 %v1047_v19  ;;  %v1814_v43 = vld [vmem:[#allocation5 + $0x498] sm:$0xff] }
 0x268   : > { %1925 = vrot.lane.b32.xlu0 %v5413_v2, %s4533_s13  ;;  %1318 = vrot.lane.b32.xlu1 %v5494_v16, %s4536_s9  ;;  %v4105_v52 = vpop.eup %4104 }
 0x269   : > { %v5546_v28 = vmul.f32 %v4105_v52, %v5398_v6 }
 0x26a   : > { %v5529_v0 = vpop.permute.xlu0 %2305  ;;  %v5531_v13 = vpop.permute.xlu1 %1626 }
 0x26b   : > { %8655 = vst [vmem:[#allocation69_spill] sm:$0xff] %v5529_v0  ;;  %8656 = vst [vmem:[#allocation70_spill] sm:$0xff] %v5531_v13  ;;  %v1038_v13 = vadd.f32 1.0, %v4103_v35  ;;  %v1812_v0 = vld [vmem:[#allocation5 + $0x488] sm:$0xff] }
 0x26c   : > { %2119 = vrot.lane.b32.xlu0 %v5413_v2, %s4535_s25  ;;  %1334 = vrot.lane.b32.xlu1 %v5510_v59, %s4536_s9  ;;  %v4107_v60 = vpop.eup %4106 }
 0x26d   : > { %4118 = vrcp.f32 %v1038_v13  ;;  %v5557_v15 = vmul.f32 %v4107_v60, %v5417_v32 }
 0x26e   : > { %v5537_v5 = vpop.permute.xlu1 %1895  ;;  %v5539_v25 = vpop.permute.xlu0 %1117 }
 0x26f   : > { %8657 = vst [vmem:[#allocation71_spill] sm:$0xff] %v5537_v5  ;;  %8658 = vst [vmem:[#allocation72_spill] sm:$0xff] %v5539_v25  ;;  %v4109_v5 = vpop.eup %4108 }
 0x270   : > { %2313 = vrot.lane.b32.xlu0 %v5413_v2, %s4537_s24  ;;  %1658 = vrot.lane.b32.xlu1 %v5510_v59, %s4539_s19  ;;  %v4111_v19 = vpop.eup %4110  ;;  %v5564_v52 = vmul.f32 %v4109_v5, %v5422_v14 }
 0x271   : > { %v1046_v13 = vadd.f32 1.0, %v4111_v19 }
 0x272   : > { %v5548_v1 = vpop.permute.xlu0 %1133  ;;  %v5550_v49 = vpop.permute.xlu1 %1612  ;;  %8663 = vst [vmem:[#allocation77_spill] sm:$0xff] %v5564_v52 }
 0x273   : > { %8659 = vst [vmem:[#allocation73_spill] sm:$0xff] %v5548_v1  ;;  %8660 = vst [vmem:[#allocation74_spill] sm:$0xff] %v5550_v49  ;;  %v4113_v1 = vpop.eup %4112  ;;  %4120 = vrcp.f32 %v1046_v13  ;;  %v1795_v49 = vld [vmem:[#allocation5 + $0x400] sm:$0xff] }
 0x274   : > { %1149 = vrot.lane.b32.xlu0 %v5546_v28, %s4534_s18  ;;  %1496 = vrot.lane.b32.xlu1 %v5510_v59, %s4538_s29  ;;  %v4115_v60 = vpop.eup %4114 }
 0x275   : > { %v1048_v14 = vadd.f32 1.0, %v4115_v60 }
 0x276   : > { %v5559_v35 = vpop.permute.xlu0 %1280  ;;  %v5561_v6 = vpop.permute.xlu1 %1628 }
 0x277   : > { %8661 = vst [vmem:[#allocation75_spill] sm:$0xff] %v5559_v35  ;;  %8662 = vst [vmem:[#allocation76_spill] sm:$0xff] %v5561_v6  ;;  %v5575_v35 = vmul.f32 %v4113_v1, %v5443_v50  ;;  %v4117_v6 = vpop.eup %4116  ;;  %4122 = vrcp.f32 %v1048_v14 }
 0x278   : > { %1165 = vrot.lane.b32.xlu0 %v5557_v15, %s4534_s18  ;;  %1498 = vrot.lane.b32.xlu1 %v5564_v52, %s4538_s29 }
 0x279   : > { %8666 = vst [vmem:[#allocation80_spill] sm:$0xff] %v5575_v35 }
 0x27a   : > { %v5570_v25 = vpop.permute.xlu0 %1296  ;;  %v5572_v32 = vpop.permute.xlu1 %1119 }
 0x27b   : > { %8664 = vst [vmem:[#allocation78_spill] sm:$0xff] %v5570_v25  ;;  %8665 = vst [vmem:[#allocation79_spill] sm:$0xff] %v5572_v32  ;;  %v4119_v25 = vpop.eup %4118  ;;  %v5586_v32 = vmul.f32 %v4117_v6, %v5462_v27 }
 0x27c   : > { %1312 = vrot.lane.b32.xlu0 %v5546_v28, %s4536_s9  ;;  %1151 = vrot.lane.b32.xlu1 %v5575_v35, %s4534_s18  ;;  %v5593_v50 = vmul.f32 %v4119_v25, %v5471_v8 }
 0x27d   : > { %8669 = vst [vmem:[#allocation83_spill] sm:$0xff] %v5586_v32  ;;  %v4121_v60 = vpop.eup %4120 }
 0x27e   : > { %v5581_v5 = vpop.permute.xlu0 %1442  ;;  %v5583_v19 = vpop.permute.xlu1 %1135  ;;  %v5616_v14 = vmul.f32 %v4121_v60, %v5499_v18 }
 0x27f   : > { %8667 = vst [vmem:[#allocation81_spill] sm:$0xff] %v5581_v5  ;;  %8668 = vst [vmem:[#allocation82_spill] sm:$0xff] %v5583_v19 }
 0x280   : > { %1328 = vrot.lane.b32.xlu0 %v5557_v15, %s4536_s9  ;;  %1167 = vrot.lane.b32.xlu1 %v5586_v32, %s4534_s18  ;;  %8676 = vst [vmem:[#allocation90_spill] sm:$0xff] %v5616_v14 }
 0x282   : > { %v5595_v1 = vpop.permute.xlu0 %1458  ;;  %v5597_v13 = vpop.permute.xlu1 %1282 }
 0x283   : > { %8670 = vst [vmem:[#allocation84_spill] sm:$0xff] %v5595_v1  ;;  %8671 = vst [vmem:[#allocation85_spill] sm:$0xff] %v5597_v13  ;;  %v4123_v1 = vpop.eup %4122 }
 0x284   : > { %1157 = vrot.lane.b32.xlu0 %v5593_v50, %s4534_s18  ;;  %1314 = vrot.lane.b32.xlu1 %v5575_v35, %s4536_s9  ;;  %v5627_v13 = vmul.f32 %v4123_v1, %v5516_v20 }
 0x286   : > { %v5603_v27 = vpop.permute.xlu0 %1604  ;;  %v5605_v6 = vpop.permute.xlu1 %1298  ;;  %8679 = vst [vmem:[#allocation93_spill] sm:$0xff] %v5627_v13 }
 0x287   : > { %8672 = vst [vmem:[#allocation86_spill] sm:$0xff] %v5603_v27  ;;  %8673 = vst [vmem:[#allocation87_spill] sm:$0xff] %v5605_v6  ;;  %v1806_v27 = vld [vmem:[#allocation5 + $0x458] sm:$0xff] }
 0x288   : > { %1173 = vrot.lane.b32.xlu0 %v5564_v52, %s4534_s18  ;;  %1330 = vrot.lane.b32.xlu1 %v5586_v32, %s4536_s9 }
 0x28a   : > { %v5611_v8 = vpop.permute.xlu0 %1620  ;;  %v5613_v25 = vpop.permute.xlu1 %1444 }
 0x28b   : > { %8674 = vst [vmem:[#allocation88_spill] sm:$0xff] %v5611_v8  ;;  %8675 = vst [vmem:[#allocation89_spill] sm:$0xff] %v5613_v25 }
 0x28c   : > { %1320 = vrot.lane.b32.xlu0 %v5593_v50, %s4536_s9  ;;  %1159 = vrot.lane.b32.xlu1 %v5616_v14, %s4534_s18 }
 0x28e   : > { %v5622_v5 = vpop.permute.xlu0 %1125  ;;  %v5624_v19 = vpop.permute.xlu1 %1460 }
 0x28f   : > { %8677 = vst [vmem:[#allocation91_spill] sm:$0xff] %v5622_v5  ;;  %8678 = vst [vmem:[#allocation92_spill] sm:$0xff] %v5624_v19  ;;  %v1798_v5 = vld [vmem:[#allocation5 + $0x418] sm:$0xff] }
 0x290   : > { %1336 = vrot.lane.b32.xlu0 %v5564_v52, %s4536_s9  ;;  %1175 = vrot.lane.b32.xlu1 %v5627_v13, %s4534_s18  ;;  %v5938_v36 = vmul.f32 %v1798_v5, %v5009_v56  ;;  %v1811_v5 = vld [vmem:[#allocation5 + $0x480] sm:$0xff] }
 0x292   : > { %v5633_v18 = vpop.permute.xlu0 %1141  ;;  %v5635_v60 = vpop.permute.xlu1 %1127 }
 0x293   : > { %8680 = vst [vmem:[#allocation94_spill] sm:$0xff] %v5633_v18  ;;  %8681 = vst [vmem:[#allocation95_spill] sm:$0xff] %v5635_v60 }
 0x294   : > { %1660 = vrot.lane.b32.xlu0 %v5564_v52, %s4539_s19  ;;  %1322 = vrot.lane.b32.xlu1 %v5616_v14, %s4536_s9 }
 0x296   : > { %v5641_v25 = vpop.permute.xlu0 %1288  ;;  %v5643_v20 = vpop.permute.xlu1 %1143 }
 0x297   : > { %8682 = vst [vmem:[#allocation96_spill] sm:$0xff] %v5641_v25  ;;  %8683 = vst [vmem:[#allocation97_spill] sm:$0xff] %v5643_v20 }
 0x298   : > { %1662 = vrot.lane.b32.xlu0 %v5627_v13, %s4539_s19  ;;  %1338 = vrot.lane.b32.xlu1 %v5627_v13, %s4536_s9  ;;  %s9283_s9 = sld [smem:[#allocation196_spill]] }
 0x29a   : > { %v5649_v1 = vpop.permute.xlu0 %1304  ;;  %v5651_v19 = vpop.permute.xlu1 %1290 }
 0x29b   : > { %8684 = vst [vmem:[#allocation98_spill] sm:$0xff] %v5649_v1  ;;  %8685 = vst [vmem:[#allocation99_spill] sm:$0xff] %v5651_v19 }
 0x29c   : > { %1903 = vrot.lane.b32.xlu0 %v5176_v40, %s4533_s13  ;;  %1911 = vrot.lane.b32.xlu1 %v5173_v26, %s4533_s13 }
 0x29e   : > { %v5657_v60 = vpop.permute.xlu0 %1450  ;;  %v5659_v6 = vpop.permute.xlu1 %1306 }
 0x29f   : > { %8686 = vst [vmem:[#allocation100_spill] sm:$0xff] %v5657_v60  ;;  %8687 = vst [vmem:[#allocation101_spill] sm:$0xff] %v5659_v6 }
 0x2a0   : > { %1919 = vrot.lane.b32.xlu0 %v5187_v34, %s4533_s13  ;;  %1927 = vrot.lane.b32.xlu1 %v5546_v28, %s4533_s13 }
 0x2a2   : > { %v5665_v20 = vpop.permute.xlu0 %1466  ;;  %v5667_v1 = vpop.permute.xlu1 %1452 }
 0x2a3   : > { %8688 = vst [vmem:[#allocation102_spill] sm:$0xff] %v5665_v20  ;;  %8689 = vst [vmem:[#allocation103_spill] sm:$0xff] %v5667_v1 }
 0x2a4   : > { %2089 = vrot.lane.b32.xlu0 %v5165_v9, %s4535_s25  ;;  %2097 = vrot.lane.b32.xlu1 %v5176_v40, %s4535_s25 }
 0x2a6   : > { %v5673_v19 = vpop.permute.xlu0 %1606  ;;  %v5675_v60 = vpop.permute.xlu1 %1468 }
 0x2a7   : > { %8690 = vst [vmem:[#allocation104_spill] sm:$0xff] %v5673_v19  ;;  %8691 = vst [vmem:[#allocation105_spill] sm:$0xff] %v5675_v60 }
 0x2a8   : > { %2105 = vrot.lane.b32.xlu0 %v5173_v26, %s4535_s25  ;;  %2113 = vrot.lane.b32.xlu1 %v5187_v34, %s4535_s25 }
 0x2aa   : > { %v5681_v6 = vpop.permute.xlu0 %1622  ;;  %v5683_v20 = vpop.permute.xlu1 %1614 }
 0x2ab   : > { %8692 = vst [vmem:[#allocation106_spill] sm:$0xff] %v5681_v6  ;;  %8693 = vst [vmem:[#allocation107_spill] sm:$0xff] %v5683_v20 }
 0x2ac   : > { %2121 = vrot.lane.b32.xlu0 %v5546_v28, %s4535_s25  ;;  %2283 = vrot.lane.b32.xlu1 %v5165_v9, %s4537_s24 }
 0x2ae   : > { %v5689_v1 = vpop.permute.xlu0 %1145  ;;  %v5691_v19 = vpop.permute.xlu1 %1630 }
 0x2af   : > { %8694 = vst [vmem:[#allocation108_spill] sm:$0xff] %v5689_v1  ;;  %8695 = vst [vmem:[#allocation109_spill] sm:$0xff] %v5691_v19 }
 0x2b0   : > { %2291 = vrot.lane.b32.xlu0 %v5176_v40, %s4537_s24  ;;  %2299 = vrot.lane.b32.xlu1 %v5173_v26, %s4537_s24 }
 0x2b2   : > { %v5697_v60 = vpop.permute.xlu0 %1161  ;;  %v5699_v6 = vpop.permute.xlu1 %1923 }
 0x2b3   : > { %8696 = vst [vmem:[#allocation110_spill] sm:$0xff] %v5697_v60  ;;  %8697 = vst [vmem:[#allocation111_spill] sm:$0xff] %v5699_v6 }
 0x2b4   : > { %2307 = vrot.lane.b32.xlu0 %v5187_v34, %s4537_s24  ;;  %2315 = vrot.lane.b32.xlu1 %v5546_v28, %s4537_s24 }
 0x2b6   : > { %v5705_v20 = vpop.permute.xlu0 %1308  ;;  %v5707_v1 = vpop.permute.xlu1 %2117 }
 0x2b7   : > { %8698 = vst [vmem:[#allocation112_spill] sm:$0xff] %v5705_v20  ;;  %8699 = vst [vmem:[#allocation113_spill] sm:$0xff] %v5707_v1 }
 0x2b8   : > { %2473 = vrot.lane.b32.xlu0 %v4966_v22, %s4540_s21  ;;  %2475 = vrot.lane.b32.xlu1 %v5040_v17, %s4540_s21 }
 0x2ba   : > { %v5713_v60 = vpop.permute.xlu0 %1324  ;;  %v5715_v6 = vpop.permute.xlu1 %2311 }
 0x2bb   : > { %8700 = vst [vmem:[#allocation114_spill] sm:$0xff] %v5713_v60  ;;  %8701 = vst [vmem:[#allocation115_spill] sm:$0xff] %v5715_v6 }
 0x2bc   : > { %2481 = vrot.lane.b32.xlu0 %v5002_v44, %s4540_s21  ;;  %2483 = vrot.lane.b32.xlu1 %v5105_v62, %s4540_s21 }
 0x2be   : > { %v5721_v20 = vpop.permute.xlu0 %1470  ;;  %v5723_v1 = vpop.permute.xlu1 %1147 }
 0x2bf   : > { %8702 = vst [vmem:[#allocation116_spill] sm:$0xff] %v5721_v20  ;;  %8703 = vst [vmem:[#allocation117_spill] sm:$0xff] %v5723_v1  ;;  %v2732_v1 = vld [vmem:[%s8333_s5 + $0x8] sm:$0xff] }
 0x2c0   : > { %2489 = vrot.lane.b32.xlu0 %v4975_v30, %s4540_s21  ;;  %2491 = vrot.lane.b32.xlu1 %v5046_v24, %s4540_s21 }
 0x2c2   : > { %v5729_v19 = vpop.permute.xlu0 %1153  ;;  %v5731_v60 = vpop.permute.xlu1 %1163 }
 0x2c3   : > { %8704 = vst [vmem:[#allocation118_spill] sm:$0xff] %v5729_v19  ;;  %8705 = vst [vmem:[#allocation119_spill] sm:$0xff] %v5731_v60  ;;  %v2731_v60 = vld [vmem:[%s8333_s5] sm:$0xff] }
 0x2c4   : > { %2497 = vrot.lane.b32.xlu0 %v5009_v56, %s4540_s21  ;;  %2499 = vrot.lane.b32.xlu1 %v5118_v4, %s4540_s21  ;;  %v1802_v56 = vld [vmem:[#allocation5 + $0x438] sm:$0xff] }
 0x2c6   : > { %v5737_v6 = vpop.permute.xlu0 %1169  ;;  %v5739_v20 = vpop.permute.xlu1 %1310 }
 0x2c7   : > { %8706 = vst [vmem:[#allocation120_spill] sm:$0xff] %v5737_v6  ;;  %8707 = vst [vmem:[#allocation121_spill] sm:$0xff] %v5739_v20 }
 0x2c8   : > { %2505 = vrot.lane.b32.xlu0 %v5361_v53, %s4540_s21  ;;  %2507 = vrot.lane.b32.xlu1 %v5413_v2, %s4540_s21 }
 0x2ca   : > { %v5748_v19 = vpop.permute.xlu0 %1316  ;;  %v5753_v25 = vpop.permute.xlu1 %1326 }
 0x2cb   : > { %8708 = vst [vmem:[#allocation122_spill] sm:$0xff] %v5748_v19  ;;  %8709 = vst [vmem:[#allocation123_spill] sm:$0xff] %v5753_v25 }
 0x2cc   : > { %2737 = vperm.xlu0 %3984, %v2731_v60   ;;  %2742 = vperm.xlu1 %3985, %v2732_v1  }
 0x2ce   : > { %v5755_v6 = vpop.permute.xlu0 %1332  ;;  %v5757_v20 = vpop.permute.xlu1 %1472 }
 0x2cf   : > { %8710 = vst [vmem:[#allocation124_spill] sm:$0xff] %v5755_v6  ;;  %8711 = vst [vmem:[#allocation125_spill] sm:$0xff] %v5757_v20 }
 0x2d0   : > { %1500 = vrot.lane.b32.xlu0 %v5627_v13, %s4538_s29  ;;  %1897 = vrot.lane.b32.xlu1 %v5198_v38, %s4533_s13  ;;  %v1801_v13 = vld [vmem:[#allocation5 + $0x430] sm:$0xff] }
 0x2d2   : > { %v5763_v18 = vpop.permute.xlu0 %1656  ;;  %v5765_v19 = vpop.permute.xlu1 %1155 }
 0x2d3   : > { %8712 = vst [vmem:[#allocation126_spill] sm:$0xff] %v5763_v18  ;;  %8713 = vst [vmem:[#allocation127_spill] sm:$0xff] %v5765_v19 }
 0x2d4   : > { %1905 = vrot.lane.b32.xlu0 %v5272_v63, %s4533_s13  ;;  %1913 = vrot.lane.b32.xlu1 %v5209_v48, %s4533_s13 }
 0x2d6   : > { %v5771_v60 = vpop.permute.xlu0 %1494  ;;  %v5773_v1 = vpop.permute.xlu1 %1171 }
 0x2d7   : > { %8714 = vst [vmem:[#allocation128_spill] sm:$0xff] %v5771_v60  ;;  %8715 = vst [vmem:[#allocation129_spill] sm:$0xff] %v5773_v1 }
 0x2d8   : > { %1921 = vrot.lane.b32.xlu0 %v5291_v3, %s4533_s13  ;;  %1929 = vrot.lane.b32.xlu1 %v5575_v35, %s4533_s13 }
 0x2da   : > { %v5779_v25 = vpop.permute.xlu0 %1925  ;;  %v5781_v20 = vpop.permute.xlu1 %1318 }
 0x2db   : > { %8716 = vst [vmem:[#allocation130_spill] sm:$0xff] %v5779_v25  ;;  %8717 = vst [vmem:[#allocation131_spill] sm:$0xff] %v5781_v20 }
 0x2dc   : > { %2091 = vrot.lane.b32.xlu0 %v5198_v38, %s4535_s25  ;;  %2099 = vrot.lane.b32.xlu1 %v5272_v63, %s4535_s25 }
 0x2de   : > { %v5787_v19 = vpop.permute.xlu0 %2119  ;;  %v5789_v60 = vpop.permute.xlu1 %1334 }
 0x2df   : > { %8718 = vst [vmem:[#allocation132_spill] sm:$0xff] %v5787_v19  ;;  %8719 = vst [vmem:[#allocation133_spill] sm:$0xff] %v5789_v60 }
 0x2e0   : > { %2107 = vrot.lane.b32.xlu0 %v5209_v48, %s4535_s25  ;;  %2115 = vrot.lane.b32.xlu1 %v5291_v3, %s4535_s25 }
 0x2e2   : > { %v5795_v1 = vpop.permute.xlu0 %2313  ;;  %v5797_v25 = vpop.permute.xlu1 %1658 }
 0x2e3   : > { %8720 = vst [vmem:[#allocation134_spill] sm:$0xff] %v5795_v1  ;;  %8721 = vst [vmem:[#allocation135_spill] sm:$0xff] %v5797_v25 }
 0x2e4   : > { %2123 = vrot.lane.b32.xlu0 %v5575_v35, %s4535_s25  ;;  %2285 = vrot.lane.b32.xlu1 %v5198_v38, %s4537_s24 }
 0x2e6   : > { %v5803_v20 = vpop.permute.xlu0 %1149  ;;  %v5805_v19 = vpop.permute.xlu1 %1496 }
 0x2e7   : > { %8722 = vst [vmem:[#allocation136_spill] sm:$0xff] %v5803_v20  ;;  %8723 = vst [vmem:[#allocation137_spill] sm:$0xff] %v5805_v19 }
 0x2e8   : > { %2293 = vrot.lane.b32.xlu0 %v5272_v63, %s4537_s24  ;;  %2301 = vrot.lane.b32.xlu1 %v5209_v48, %s4537_s24 }
 0x2ea   : > { %v5811_v60 = vpop.permute.xlu0 %1165  ;;  %v5813_v1 = vpop.permute.xlu1 %1498 }
 0x2eb   : > { %8724 = vst [vmem:[#allocation138_spill] sm:$0xff] %v5811_v60  ;;  %8725 = vst [vmem:[#allocation139_spill] sm:$0xff] %v5813_v1 }
 0x2ec   : > { %2309 = vrot.lane.b32.xlu0 %v5291_v3, %s4537_s24  ;;  %2317 = vrot.lane.b32.xlu1 %v5575_v35, %s4537_s24 }
 0x2ee   : > { %v5819_v25 = vpop.permute.xlu0 %1312  ;;  %v5821_v20 = vpop.permute.xlu1 %1151 }
 0x2ef   : > { %8726 = vst [vmem:[#allocation140_spill] sm:$0xff] %v5819_v25  ;;  %8727 = vst [vmem:[#allocation141_spill] sm:$0xff] %v5821_v20  ;;  %v2733_v20 = vld [vmem:[%s8333_s5 + $0x10] sm:$0xff] }
 0x2f0   : > { %2477 = vrot.lane.b32.xlu0 %v5165_v9, %s4540_s21  ;;  %2485 = vrot.lane.b32.xlu1 %v5176_v40, %s4540_s21 }
 0x2f2   : > { %v5827_v19 = vpop.permute.xlu0 %1328  ;;  %v5829_v60 = vpop.permute.xlu1 %1167 }
 0x2f3   : > { %8728 = vst [vmem:[#allocation142_spill] sm:$0xff] %v5827_v19  ;;  %8729 = vst [vmem:[#allocation143_spill] sm:$0xff] %v5829_v60  ;;  %v2787_v60 = vld [vmem:[%s8334_s6] sm:$0xff] }
 0x2f4   : > { %2493 = vrot.lane.b32.xlu0 %v5173_v26, %s4540_s21  ;;  %2501 = vrot.lane.b32.xlu1 %v5187_v34, %s4540_s21 }
 0x2f6   : > { %v5835_v1 = vpop.permute.xlu0 %1157  ;;  %v5840_v25 = vpop.permute.xlu1 %1314 }
 0x2f7   : > { %8730 = vst [vmem:[#allocation144_spill] sm:$0xff] %v5835_v1  ;;  %8731 = vst [vmem:[#allocation145_spill] sm:$0xff] %v5840_v25  ;;  %v2788_v1 = vld [vmem:[%s8334_s6 + $0x8] sm:$0xff] }
 0x2f8   : > { %2509 = vrot.lane.b32.xlu0 %v5546_v28, %s4540_s21  ;;  %2747 = vperm.xlu1 %3985, %v2733_v20  }
 0x2fa   : > { %v5847_v19 = vpop.permute.xlu0 %1173  ;;  %v5852_v18 = vpop.permute.xlu1 %1330 }
 0x2fb   : > { %8732 = vst [vmem:[#allocation146_spill] sm:$0xff] %v5847_v19  ;;  %8733 = vst [vmem:[#allocation147_spill] sm:$0xff] %v5852_v18 }
 0x2fc   : > { %2793 = vperm.xlu0 %3984, %v2787_v60   ;;  %2798 = vperm.xlu1 %3985, %v2788_v1  }
 0x2fe   : > { %v5854_v6 = vpop.permute.xlu0 %1320  ;;  %v5856_v25 = vpop.permute.xlu1 %1159 }
 0x2ff   : > { %8734 = vst [vmem:[#allocation148_spill] sm:$0xff] %v5854_v6  ;;  %8735 = vst [vmem:[#allocation149_spill] sm:$0xff] %v5856_v25 }
 0x300   : > { %1632 = vrot.lane.b32.xlu0 %v5361_v53, %s4539_s19  ;;  %1634 = vrot.lane.b32.xlu1 %v5413_v2, %s4539_s19 }
 0x302   : > { %v5862_v20 = vpop.permute.xlu0 %1336  ;;  %v5864_v19 = vpop.permute.xlu1 %1175 }
 0x303   : > { %8736 = vst [vmem:[#allocation150_spill] sm:$0xff] %v5862_v20  ;;  %8737 = vst [vmem:[#allocation151_spill] sm:$0xff] %v5864_v19 }
 0x304   : > { %1640 = vrot.lane.b32.xlu0 %v5429_v21, %s4539_s19  ;;  %1642 = vrot.lane.b32.xlu1 %v5494_v16, %s4539_s19 }
 0x306   : > { %v5870_v60 = vpop.permute.xlu0 %1660  ;;  %v5872_v1 = vpop.permute.xlu1 %1322 }
 0x307   : > { %8738 = vst [vmem:[#allocation152_spill] sm:$0xff] %v5870_v60  ;;  %8739 = vst [vmem:[#allocation153_spill] sm:$0xff] %v5872_v1 }
 0x308   : > { %1648 = vrot.lane.b32.xlu0 %v5373_v41, %s4539_s19  ;;  %1650 = vrot.lane.b32.xlu1 %v5436_v29, %s4539_s19 }
 0x30a   : > { %v5878_v18 = vpop.permute.xlu0 %1662  ;;  %v5880_v25 = vpop.permute.xlu1 %1338 }
 0x30b   : > { %8740 = vst [vmem:[#allocation154_spill] sm:$0xff] %v5878_v18  ;;  %8741 = vst [vmem:[#allocation155_spill] sm:$0xff] %v5880_v25  ;;  %v2734_v25 = vld [vmem:[%s8333_s5 + $0x18] sm:$0xff] }
 0x30c   : > { %2479 = vrot.lane.b32.xlu0 %v5198_v38, %s4540_s21  ;;  %2487 = vrot.lane.b32.xlu1 %v5272_v63, %s4540_s21 }
 0x30e   : > { %v5886_v19 = vpop.permute.xlu0 %1903  ;;  %v5888_v6 = vpop.permute.xlu1 %1911 }
 0x30f   : > { %8742 = vst [vmem:[#allocation156_spill] sm:$0xff] %v5886_v19  ;;  %8743 = vst [vmem:[#allocation157_spill] sm:$0xff] %v5888_v6  ;;  %v2789_v6 = vld [vmem:[%s8334_s6 + $0x10] sm:$0xff] }
 0x310   : > { %2495 = vrot.lane.b32.xlu0 %v5209_v48, %s4540_s21  ;;  %2503 = vrot.lane.b32.xlu1 %v5291_v3, %s4540_s21 }
 0x312   : > { %v5894_v1 = vpop.permute.xlu0 %1919  ;;  %v5899_v18 = vpop.permute.xlu1 %1927 }
 0x313   : > { %8744 = vst [vmem:[#allocation158_spill] sm:$0xff] %v5894_v1  ;;  %8745 = vst [vmem:[#allocation159_spill] sm:$0xff] %v5899_v18  ;;  %v8482_v18 = vlaneseq }
 0x314   : > { %2511 = vrot.lane.b32.xlu0 %v5575_v35, %s4540_s21  ;;  %2752 = vperm.xlu1 %3985, %v2734_v25  }
 0x316   : > { %v5906_v19 = vpop.permute.xlu0 %2089  ;;  %v5908_v60 = vpop.permute.xlu1 %2097 }
 0x317   : > { %8746 = vst [vmem:[#allocation160_spill] sm:$0xff] %v5906_v19  ;;  %8747 = vst [vmem:[#allocation161_spill] sm:$0xff] %v5908_v60  ;;  %v1797_v19 = vld [vmem:[#allocation5 + $0x410] sm:$0xff]  ;;  %v1796_v60 = vld [vmem:[#allocation5 + $0x408] sm:$0xff] }
 0x318   : > { %2803 = vperm.xlu0 %3984, %v2789_v6   ;;  %1478 = vrot.lane.b32.xlu1 %v5429_v21, %s4538_s29  ;;  %v5925_v6 = vand.u32 127, %v8482_v18  ;;  %v5935_v18 = vmul.f32 %v1796_v60, %v5002_v44  ;;  %v1820_v44 = vld [vmem:[#allocation5 + $0x4c8] sm:$0xff] }
 0x31a   : > { %v5912_v1 = vpop.permute.xlu0 %2105  ;;  %v5914_v20 = vpop.permute.xlu1 %2113  ;;  %vm1955_vm2 = vcmp.lt.s32.totalorder %v5925_v6, 127  ;;  %vm2149_vm3 = vcmp.lt.s32.totalorder %v5925_v6, 113  ;;  %vm1179_vm4 = vcmp.lt.s32.totalorder %v5925_v6, 17  ;;  %vm2343_vm5 = vcmp.lt.s32.totalorder %v5925_v6, 112 }
 0x31b   : > { %8748 = vst [vmem:[#allocation162_spill] sm:$0xff] %v5912_v1  ;;  %8749 = vst [vmem:[#allocation163_spill] sm:$0xff] %v5914_v20  ;;  %v1805_v1 = vld [vmem:[#allocation5 + $0x450] sm:$0xff]  ;;  %v1804_v20 = vld [vmem:[#allocation5 + $0x448] sm:$0xff]  ;;  %vm1340_vm6 = vcmp.lt.s32.totalorder %v5925_v6, 16  ;;  %vm1502_vm7 = vcmp.lt.s32.totalorder %v5925_v6, 15 }
 0x31c   : > { %1480 = vrot.lane.b32.xlu0 %v5494_v16, %s4538_s29  ;;  %1486 = vrot.lane.b32.xlu1 %v5373_v41, %s4538_s29  ;;  %v5941_v55 = vmul.f32 %v1805_v1, %v5046_v24  ;;  %v5956_v24 = vmul.f32 %v1806_v27, %v5118_v4  ;;  %v5962_v1 = vmul.f32 %v1812_v0, %v5176_v40  ;;  %v1807_v4 = vld [vmem:[#allocation5 + $0x460] sm:$0xff]  ;;  %vm1664_vm8 = vcmp.lt.s32.totalorder %v5925_v6, 1 }
 0x31d   : > { %v5973_v27 = vmul.f32 %v1801_v13, %v5373_v41  ;;  %v5979_v40 = vmul.f32 %v1795_v49, %v4966_v22  ;;  %v5984_v0 = vmul.f32 %v1802_v56, %v5450_v54  ;;  %v1815_v13 = vld [vmem:[#allocation5 + $0x4a0] sm:$0xff]  ;;  %v5996_v49 = vmul.f32 %v1820_v44, %v5272_v63 }
 0x31e   : > { %v5920_v25 = vpop.permute.xlu0 %2121  ;;  %v5922_v8 = vpop.permute.xlu1 %2283  ;;  %8752 = vst [vmem:[#allocation166_spill] sm:$0xff] %v5941_v55  ;;  %v1819_v55 = vld [vmem:[#allocation5 + $0x4c0] sm:$0xff]  ;;  %vm2537_vm9 = vcmp.lt.s32.totalorder %v5925_v6, 111 }
 0x31f   : > { %8750 = vst [vmem:[#allocation164_spill] sm:$0xff] %v5920_v25  ;;  %8751 = vst [vmem:[#allocation165_spill] sm:$0xff] %v5922_v8  ;;  %v1813_v25 = vld [vmem:[#allocation5 + $0x490] sm:$0xff]  ;;  %v5932_v8 = vmul.f32 %v1797_v19, %v4975_v30  ;;  %v5949_v30 = vmul.f32 %v1804_v20, %v5105_v62  ;;  %v5965_v62 = vmul.f32 %v1814_v43, %v5187_v34  ;;  %v1808_v34 = vld [vmem:[#allocation5 + $0x468] sm:$0xff] }
 0x320   : > { %1488 = vrot.lane.b32.xlu0 %v5436_v29, %s4538_s29  ;;  %1636 = vrot.lane.b32.xlu1 %v5546_v28, %s4539_s19  ;;  %v5959_v60 = vmul.f32 %v1813_v25, %v5173_v26  ;;  %v1821_v20 = vld [vmem:[#allocation5 + $0x4d0] sm:$0xff]  ;;  %8756 = vst [vmem:[#allocation170_spill] sm:$0xff] %v5973_v27  ;;  %v5976_v26 = vmul.f32 %v1800_v10, %v5429_v21  ;;  %8758 = vst [vmem:[#allocation172_spill] sm:$0xff] %v5979_v40  ;;  %v1823_v56 = vld [vmem:[#allocation5 + $0x4e0] sm:$0xff] }
 0x321   : > { %v1809_v43 = vld [vmem:[#allocation5 + $0x470] sm:$0xff]  ;;  %8759 = vst [vmem:[#allocation173_spill] sm:$0xff] %v5984_v0  ;;  %v5990_v10 = vmul.f32 %v1811_v5, %v5165_v9  ;;  %v5993_v22 = vmul.f32 %v1821_v20, %v5209_v48  ;;  %v1816_v0 = vld [vmem:[#allocation5 + $0x4a8] sm:$0xff]  ;;  %v6008_v9 = vmul.f32 %v1807_v4, %v5413_v2  ;;  %v6014_v63 = vmul.f32 %v1808_v34, %v5494_v16  ;;  %v1989_v5 = vld [vmem:[#allocation5 + $0x500] sm:$0xff] }
 0x322   : > { %v5943_v51 = vpop.permute.xlu0 %2291  ;;  %v5951_v19 = vpop.permute.xlu1 %2299  ;;  %8757 = vst [vmem:[#allocation171_spill] sm:$0xff] %v5976_v26  ;;  %v1817_v25 = vld [vmem:[#allocation5 + $0x4b0] sm:$0xff]  ;;  %v1818_v26 = vld [vmem:[#allocation5 + $0x4b8] sm:$0xff]  ;;  %v6011_v48 = vmul.f32 %v1809_v43, %v5436_v29  ;;  %v6025_v2 = vmul.f32 %v1815_v13, %v5546_v28  ;;  %v1980_v20 = vsel %vm1955_vm2, %v5178_v31, %v5248_v33  ;;  %v6037_v4 = vmul.f32 %v1823_v56, %v5575_v35  ;;  %v1990_v13 = vld [vmem:[#allocation5 + $0x508] sm:$0xff] }
 0x323   : > { %8753 = vst [vmem:[#allocation167_spill] sm:$0xff] %v5943_v51  ;;  %8754 = vst [vmem:[#allocation168_spill] sm:$0xff] %v5951_v19  ;;  %v1822_v51 = vld [vmem:[#allocation5 + $0x4d8] sm:$0xff]  ;;  %v5970_v19 = vmul.f32 %v1799_v12, %v5361_v53  ;;  %v5987_v12 = vmul.f32 %v1803_v11, %v5040_v17  ;;  %v6002_v17 = vmul.f32 %v1819_v55, %v5198_v38  ;;  %v1824_v11 = vld [vmem:[#allocation5 + $0x4e8] sm:$0xff] }
 0x324   : > { %1644 = vrot.lane.b32.xlu0 %v5593_v50, %s4539_s19  ;;  %1652 = vrot.lane.b32.xlu1 %v5557_v15, %s4539_s19  ;;  %v1810_v53 = vld [vmem:[#allocation5 + $0x478] sm:$0xff]  ;;  %8761 = vst [vmem:[#allocation175_spill] sm:$0xff] %v5990_v10  ;;  %v5999_v27 = vmul.f32 %v1822_v51, %v5291_v3  ;;  %8764 = vst [vmem:[#allocation178_spill] sm:$0xff] %v6008_v9  ;;  %v1825_v51 = vld [vmem:[#allocation5 + $0x4f0] sm:$0xff]  ;;  %v6028_v55 = vmul.f32 %v1817_v25, %v5557_v15 }
 0x325   : > { %8755 = vst [vmem:[#allocation169_spill] sm:$0xff] %v5970_v19  ;;  %8760 = vst [vmem:[#allocation174_spill] sm:$0xff] %v5987_v12  ;;  %v6022_v38 = vmul.f32 %v1810_v53, %v5510_v59  ;;  %v6040_v34 = vmul.f32 %v1816_v0, %v5593_v50  ;;  %v6043_v43 = vmul.f32 %v1818_v26, %v5564_v52  ;;  %v1826_v53 = vld [vmem:[#allocation5 + $0x4f8] sm:$0xff]  ;;  %v1375_v31 = vld [vmem:[#allocation5 + $0x108] sm:$0xff] }
 0x326   : > { %8762 = vst [vmem:[#allocation176_spill] sm:$0xff] %v5999_v27  ;;  %8763 = vst [vmem:[#allocation177_spill] sm:$0xff] %v6002_v17  ;;  %v6016_v3 = vpop.permute.xlu0 %2307  ;;  %v6030_v44 = vpop.permute.xlu1 %2315  ;;  %v1976_v25 = vsel %vm1955_vm2, %v5248_v33, %v5189_v46  ;;  %v1991_v17 = vld [vmem:[#allocation5 + $0x510] sm:$0xff]  ;;  %v1972_v56 = vsel %vm1955_vm2, %v5189_v46, %v5257_v61  ;;  %v1365_v26 = vsel %vm1340_vm6, %v5202_v42, %v5305_v7  ;;  %v8793_v40 = vld [vmem:[#allocation29_spill] sm:$0xff] }
 0x327   : > { %8765 = vst [vmem:[#allocation179_spill] sm:$0xff] %v6011_v48  ;;  %8766 = vst [vmem:[#allocation180_spill] sm:$0xff] %v6014_v63  ;;  %v6058_v0 = vmul.f32 %v1825_v51, %v5586_v32  ;;  %v2174_v33 = vsel %vm2149_vm3, %v5200_v39, %v5265_v57  ;;  %v1204_v46 = vsel %vm1179_vm4, %v5180_v37, %v5267_v23  ;;  %v1214_v39 = vld [vmem:[#allocation5 + $0x10] sm:$0xff]  ;;  %v1701_v52 = vld [vmem:[#allocation5 + $0x318] sm:$0xff] }
 0x328   : > { %1931 = vrot.lane.b32.xlu0 %v5429_v21, %s4533_s13  ;;  %8767 = vst [vmem:[#allocation181_spill] sm:$0xff] %v6016_v3  ;;  %1933 = vrot.lane.b32.xlu1 %v5494_v16, %s4533_s13  ;;  %8768 = vst [vmem:[#allocation182_spill] sm:$0xff] %v6022_v38  ;;  %v1689_v51 = vsel %vm1664_vm8, %v5246_v58, %v5348_v45  ;;  %v1200_v3 = vsel %vm1179_vm4, %v5267_v23, %v5191_v47  ;;  %v1700_v10 = vld [vmem:[#allocation5 + $0x310] sm:$0xff]  ;;  %v8779_v38 = vld [vmem:[#allocation93_spill] sm:$0xff] }
 0x329   : > { %8769 = vst [vmem:[#allocation183_spill] sm:$0xff] %v6025_v2  ;;  %8770 = vst [vmem:[#allocation184_spill] sm:$0xff] %v6028_v55  ;;  %v1213_v55 = vld [vmem:[#allocation5 + $0x8] sm:$0xff]  ;;  %v2023_v48 = vmul.f32 %v1991_v17, %v1972_v56  ;;  %v1376_v63 = vld [vmem:[#allocation5 + $0x110] sm:$0xff]  ;;  %v1407_v12 = vmul.f32 %v1375_v31, %v1365_v26  ;;  %v1246_v17 = vmul.f32 %v1214_v39, %v1200_v3 }
 0x32a   : > { %8771 = vst [vmem:[#allocation185_spill] sm:$0xff] %v6030_v44  ;;  %8772 = vst [vmem:[#allocation186_spill] sm:$0xff] %v6037_v4  ;;  %v6079_v44 = vmul.f32 %v1989_v5, %v1980_v20  ;;  %v8778_v4 = vld [vmem:[#allocation28_spill] sm:$0xff]  ;;  %v8781_v5 = vld [vmem:[#allocation22_spill] sm:$0xff] }
 0x32b   : > { %8773 = vst [vmem:[#allocation187_spill] sm:$0xff] %v6040_v34  ;;  %8774 = vst [vmem:[#allocation188_spill] sm:$0xff] %v6043_v43  ;;  %v2183_v43 = vld [vmem:[#allocation5 + $0x600] sm:$0xff]  ;;  %v1699_v34 = vld [vmem:[#allocation5 + $0x308] sm:$0xff]  ;;  %v1685_v2 = vsel %vm1664_vm8, %v5348_v45, %v8778_v4  ;;  %v1361_v20 = vsel %vm1340_vm6, %v5305_v7, %v8781_v5  ;;  %v1860_v37 = vadd.f32 %v5935_v18, %v1407_v12 }
 0x32c   : > { %8775 = vst [vmem:[#allocation189_spill] sm:$0xff] %v6058_v0  ;;  %1939 = vrot.lane.b32.xlu0 %v5373_v41, %s4533_s13  ;;  %v6075_v0 = vmul.f32 %v1824_v11, %v5616_v14  ;;  %1941 = vrot.lane.b32.xlu1 %v5436_v29, %s4533_s13  ;;  %8777 = vst [vmem:[#allocation191_spill] sm:$0xff] %v6079_v44  ;;  %v6090_v11 = vmul.f32 %v1826_v53, %v8779_v38  ;;  %v6096_v44 = vpop.permute.xlu0 %2473  ;;  %v8783_v23 = vld [vmem:[#allocation21_spill] sm:$0xff]  ;;  %v8786_v7 = vld [vmem:[#allocation32_spill] sm:$0xff] }
 0x32d   : > { %8782 = vst [vmem:[#allocation22_spill] sm:$0xff] %v6096_v44  ;;  %v2170_v9 = vsel %vm2149_vm3, %v5265_v57, %v8783_v23  ;;  %v6102_v45 = vmul.f32 %v2183_v43, %v2174_v33  ;;  %v1245_v53 = vmul.f32 %v1213_v55, %v1204_v46  ;;  %v8787_v31 = vld [vmem:[#allocation25_spill] sm:$0xff]  ;;  %v1377_v26 = vld [vmem:[#allocation5 + $0x118] sm:$0xff]  ;;  %v1732_v55 = vmul.f32 %v1700_v10, %v1685_v2  ;;  %v1538_v46 = vld [vmem:[#allocation5 + $0x210] sm:$0xff] }
 0x32e   : > { %8776 = vst [vmem:[#allocation190_spill] sm:$0xff] %v6075_v0  ;;  %8780 = vst [vmem:[#allocation28_spill] sm:$0xff] %v6090_v11  ;;  %v2022_v0 = vmul.f32 %v1990_v13, %v1976_v25  ;;  %v1731_v11 = vmul.f32 %v1699_v34, %v1689_v51  ;;  %v6104_v13 = vpop.permute.xlu1 %2475  ;;  %v2379_v25 = vld [vmem:[#allocation5 + $0x710] sm:$0xff]  ;;  %v2360_v56 = vsel %vm2343_vm5, %v8787_v31, %v8786_v7  ;;  %v8788_v38 = vld [vmem:[#allocation33_spill] sm:$0xff] }
 0x32f   : > { %8784 = vst [vmem:[#allocation21_spill] sm:$0xff] %v6102_v45  ;;  %8785 = vst [vmem:[#allocation192_spill] sm:$0xff] %v6104_v13  ;;  %v1357_v57 = vsel %vm1340_vm6, %v8781_v5, %v8788_v38  ;;  %v2378_v34 = vld [vmem:[#allocation5 + $0x708] sm:$0xff]  ;;  %v8789_v43 = vld [vmem:[#allocation31_spill] sm:$0xff]  ;;  %v1408_v3 = vmul.f32 %v1376_v63, %v1361_v20  ;;  %v2411_v32 = vmul.f32 %v2379_v25, %v2360_v56 }
 0x330   : > { %1947 = vrot.lane.b32.xlu0 %v5450_v54, %s4533_s13  ;;  %1949 = vrot.lane.b32.xlu1 %v5510_v59, %s4533_s13  ;;  %v2364_v39 = vsel %vm2343_vm5, %v8789_v43, %v8787_v31  ;;  %v1537_v33 = vld [vmem:[#allocation5 + $0x208] sm:$0xff]  ;;  %v8792_v5 = vld [vmem:[#allocation24_spill] sm:$0xff]  ;;  %v2185_v45 = vld [vmem:[#allocation5 + $0x610] sm:$0xff]  ;;  %v2166_v31 = vsel %vm2149_vm3, %v8783_v23, %v8793_v40  ;;  %v1409_v27 = vmul.f32 %v1377_v26, %v1357_v57  ;;  %v6149_v35 = vpop.permute.xlu0 %2481 }
 0x331   : > { %v8790_v51 = vld [vmem:[#allocation26_spill] sm:$0xff]  ;;  %v8795_v58 = vld [vmem:[#allocation39_spill] sm:$0xff]  ;;  %v2377_v19 = vld [vmem:[#allocation5 + $0x700] sm:$0xff]  ;;  %v1763_v14 = vadd.f32 %v1731_v11, %v1245_v53  ;;  %8797 = vst [vmem:[#allocation25_spill] sm:$0xff] %v6149_v35  ;;  %v1861_v7 = vadd.f32 %v5932_v8, %v1408_v3 }
 0x332   : > { %v8791_v13 = vld [vmem:[#allocation34_spill] sm:$0xff]  ;;  %v8796_v42 = vld [vmem:[#allocation23_spill] sm:$0xff]  ;;  %v6154_v25 = vpop.permute.xlu1 %2483  ;;  %v8800_v57 = vld [vmem:[#allocation36_spill] sm:$0xff] }
 0x333   : > { %v1523_v44 = vsel %vm1502_vm7, %v8791_v13, %v8790_v51  ;;  %v1527_v10 = vsel %vm1502_vm7, %v8792_v5, %v8791_v13  ;;  %v2184_v2 = vld [vmem:[#allocation5 + $0x608] sm:$0xff]  ;;  %v1681_v13 = vsel %vm1664_vm8, %v8778_v4, %v8795_v58  ;;  %v1215_v5 = vld [vmem:[#allocation5 + $0x18] sm:$0xff]  ;;  %v2368_v23 = vsel %vm2343_vm5, %v8796_v42, %v8789_v43  ;;  %8798 = vst [vmem:[#allocation33_spill] sm:$0xff] %v6154_v25  ;;  %v1384_v3 = vld [vmem:[#allocation5 + $0x150] sm:$0xff] }
 0x334   : > { %v8794_v63 = vld [vmem:[#allocation30_spill] sm:$0xff]  ;;  %2125 = vrot.lane.b32.xlu0 %v5429_v21, %s4535_s25  ;;  %v1569_v18 = vmul.f32 %v1537_v33, %v1527_v10  ;;  %v1570_v12 = vmul.f32 %v1538_v46, %v1523_v44  ;;  %2127 = vrot.lane.b32.xlu1 %v5494_v16, %s4535_s25  ;;  %v2216_v4 = vmul.f32 %v2184_v2, %v2170_v9  ;;  %v1539_v26 = vld [vmem:[#allocation5 + $0x218] sm:$0xff] }
 0x335   : > { %v1196_v20 = vsel %vm1179_vm4, %v5191_v47, %v8794_v63  ;;  %v2410_v47 = vmul.f32 %v2378_v34, %v2364_v39  ;;  %v1764_v63 = vadd.f32 %v1732_v55, %v1246_v17  ;;  %v2217_v58 = vmul.f32 %v2185_v45, %v2166_v31  ;;  %v1383_v45 = vld [vmem:[#allocation5 + $0x148] sm:$0xff]  ;;  %v1222_v33 = vld [vmem:[#allocation5 + $0x50] sm:$0xff]  ;;  %v8807_v46 = vld [vmem:[#allocation52_spill] sm:$0xff] }
 0x336   : > { %v1733_v43 = vmul.f32 %v1701_v52, %v1681_v13  ;;  %v1247_v11 = vmul.f32 %v1215_v5, %v1196_v20  ;;  %v6156_v53 = vmul.f32 %v2377_v19, %v2368_v23  ;;  %v1519_v44 = vsel %vm1502_vm7, %v8790_v51, %v8800_v57  ;;  %v8801_v8 = vld [vmem:[#allocation58_spill] sm:$0xff]  ;;  %v1223_v5 = vld [vmem:[#allocation5 + $0x58] sm:$0xff]  ;;  %v1997_v31 = vld [vmem:[#allocation5 + $0x540] sm:$0xff] }
 0x337   : > { %v2442_v56 = vadd.f32 %v2410_v47, %v1860_v37  ;;  %v2443_v17 = vadd.f32 %v2411_v32, %v1861_v7  ;;  %v6163_v55 = vadd.f32 %v5938_v36, %v1409_v27  ;;  %v2248_v9 = vadd.f32 %v2216_v4, %v1763_v14  ;;  %v8802_v52 = vld [vmem:[#allocation38_spill] sm:$0xff]  ;;  %v8805_v32 = vld [vmem:[#allocation40_spill] sm:$0xff]  ;;  %v8811_v13 = vld [vmem:[#allocation57_spill] sm:$0xff]  ;;  %v6205_v4 = vpop.permute.xlu0 %2489 }
 0x338   : > { %8799 = vst [vmem:[#allocation31_spill] sm:$0xff] %v6156_v53  ;;  %v1366_v34 = vsel %vm1340_vm6, %v8802_v52, %v8801_v8  ;;  %2133 = vrot.lane.b32.xlu0 %v5373_v41, %s4535_s25  ;;  %v6171_v37 = vadd.f32 %v2022_v0, %v1569_v18  ;;  %v6173_v19 = vadd.f32 %v2023_v48, %v1570_v12  ;;  %v1221_v7 = vld [vmem:[#allocation5 + $0x48] sm:$0xff]  ;;  %v8808_v48 = vld [vmem:[#allocation35_spill] sm:$0xff]  ;;  %v8809_v10 = vld [vmem:[#allocation56_spill] sm:$0xff] }
 0x339   : > { %v2249_v39 = vadd.f32 %v2217_v58, %v1764_v63  ;;  %v1362_v36 = vsel %vm1340_vm6, %v8801_v8, %v8805_v32  ;;  %2135 = vrot.lane.b32.xlu1 %v5436_v29, %s4535_s25  ;;  %v6181_v14 = vmul.f32 %v1539_v26, %v1519_v44  ;;  %v6183_v27 = vadd.f32 %v1733_v43, %v1247_v11  ;;  %v8806_v0 = vld [vmem:[#allocation37_spill] sm:$0xff]  ;;  %v8810_v20 = vld [vmem:[#allocation44_spill] sm:$0xff]  ;;  %v8812_v47 = vld [vmem:[#allocation42_spill] sm:$0xff] }
 0x33a   : > { %8803 = vst [vmem:[#allocation26_spill] sm:$0xff] %v6171_v37  ;;  %8804 = vst [vmem:[#allocation34_spill] sm:$0xff] %v6173_v19  ;;  %v1201_v58 = vsel %vm1179_vm4, %v8807_v46, %v8806_v0  ;;  %v1205_v51 = vsel %vm1179_vm4, %v8808_v48, %v8807_v46  ;;  %v1197_v2 = vsel %vm1179_vm4, %v8806_v0, %v8809_v10  ;;  %v1998_v63 = vld [vmem:[#allocation5 + $0x548] sm:$0xff]  ;;  %v1708_v26 = vld [vmem:[#allocation5 + $0x350] sm:$0xff]  ;;  %v6217_v37 = vpop.permute.xlu1 %2491 }
 0x33b   : > { %v1977_v23 = vsel %vm1955_vm2, %v8811_v13, %v8810_v20  ;;  %v1981_v18 = vsel %vm1955_vm2, %v8812_v47, %v8811_v13  ;;  %v1415_v12 = vmul.f32 %v1383_v45, %v1366_v34  ;;  %8813 = vst [vmem:[#allocation29_spill] sm:$0xff] %v6205_v4  ;;  %v1416_v43 = vmul.f32 %v1384_v3, %v1362_v36  ;;  %v1707_v11 = vld [vmem:[#allocation5 + $0x348] sm:$0xff]  ;;  %v8815_v8 = vld [vmem:[#allocation68_spill] sm:$0xff]  ;;  %v8816_v46 = vld [vmem:[#allocation47_spill] sm:$0xff]  ;;  %v6265_v35 = vpop.permute.xlu0 %2497 }
 0x33c   : > { %v8814_v44 = vld [vmem:[#allocation49_spill] sm:$0xff]  ;;  %v1690_v42 = vsel %vm1664_vm8, %v8816_v46, %v8815_v8  ;;  %v6215_v19 = vadd.f32 %v2442_v56, %v2248_v9  ;;  %8818 = vst [vmem:[#allocation58_spill] sm:$0xff] %v6217_v37  ;;  %2141 = vrot.lane.b32.xlu0 %v5450_v54, %s4535_s25  ;;  %v1253_v45 = vmul.f32 %v1221_v7, %v1205_v51  ;;  %v1385_v3 = vld [vmem:[#allocation5 + $0x158] sm:$0xff]  ;;  %v8822_v37 = vld [vmem:[#allocation62_spill] sm:$0xff] }
 0x33d   : > { %v1686_v0 = vsel %vm1664_vm8, %v8815_v8, %v8814_v44  ;;  %v1254_v34 = vmul.f32 %v1222_v33, %v1201_v58  ;;  %v8819_v36 = vld [vmem:[#allocation60_spill] sm:$0xff]  ;;  %v6225_v47 = vadd.f32 %v2443_v17, %v2249_v39  ;;  %2143 = vrot.lane.b32.xlu1 %v5510_v59, %s4535_s25  ;;  %v6229_v56 = vmul.f32 %v1223_v5, %v1197_v2  ;;  %v8823_v7 = vld [vmem:[#allocation43_spill] sm:$0xff]  ;;  %v8825_v2 = vld [vmem:[#allocation166_spill] sm:$0xff] }
 0x33e   : > { %8817 = vst [vmem:[#allocation36_spill] sm:$0xff] %v6215_v19  ;;  %v1358_v13 = vsel %vm1340_vm6, %v8805_v32, %v8819_v36  ;;  %v6231_v9 = vmul.f32 %v1997_v31, %v1981_v18  ;;  %v2030_v8 = vmul.f32 %v1998_v63, %v1977_v23  ;;  %v1545_v19 = vld [vmem:[#allocation5 + $0x248] sm:$0xff]  ;;  %v1528_v33 = vsel %vm1502_vm7, %v8823_v7, %v8822_v37  ;;  %v1546_v51 = vld [vmem:[#allocation5 + $0x250] sm:$0xff] }
 0x33f   : > { %8820 = vst [vmem:[#allocation40_spill] sm:$0xff] %v6225_v47  ;;  %v1868_v58 = vadd.f32 %v5949_v30, %v1415_v12  ;;  %v8824_v32 = vld [vmem:[#allocation45_spill] sm:$0xff]  ;;  %v1739_v39 = vmul.f32 %v1707_v11, %v1690_v42  ;;  %v1740_v5 = vmul.f32 %v1708_v26, %v1686_v0  ;;  %v1869_v31 = vadd.f32 %v8825_v2, %v1416_v43  ;;  %v8826_v18 = vld [vmem:[#allocation59_spill] sm:$0xff]  ;;  %v8829_v12 = vld [vmem:[#allocation48_spill] sm:$0xff] }
 0x340   : > { %8821 = vst [vmem:[#allocation37_spill] sm:$0xff] %v6231_v9  ;;  %v1524_v17 = vsel %vm1502_vm7, %v8822_v37, %v8824_v32  ;;  %v1973_v63 = vsel %vm1955_vm2, %v8810_v20, %v8826_v18  ;;  %v1417_v23 = vmul.f32 %v1385_v3, %v1358_v13  ;;  %v2386_v47 = vld [vmem:[#allocation5 + $0x748] sm:$0xff]  ;;  %v8827_v25 = vld [vmem:[#allocation55_spill] sm:$0xff]  ;;  %2319 = vrot.lane.b32.xlu0 %v5429_v21, %s4537_s24  ;;  %v2191_v42 = vld [vmem:[#allocation5 + $0x640] sm:$0xff] }
 0x341   : > { %v8828_v4 = vld [vmem:[#allocation67_spill] sm:$0xff]  ;;  %v8830_v11 = vld [vmem:[#allocation61_spill] sm:$0xff]  ;;  %v8831_v26 = vld [vmem:[#allocation46_spill] sm:$0xff]  ;;  %v1577_v0 = vmul.f32 %v1545_v19, %v1528_v33  ;;  %8833 = vst [vmem:[#allocation52_spill] sm:$0xff] %v6265_v35  ;;  %2321 = vrot.lane.b32.xlu1 %v5494_v16, %s4537_s24  ;;  %v1578_v21 = vmul.f32 %v1546_v51, %v1524_v17  ;;  %v6281_v16 = vpop.permute.xlu1 %2499  ;;  %v1771_v53 = vadd.f32 %v1739_v39, %v1253_v45 }
 0x342   : > { %v2365_v30 = vsel %vm2343_vm5, %v8828_v4, %v8827_v25  ;;  %v1999_v37 = vld [vmem:[#allocation5 + $0x550] sm:$0xff]  ;;  %v2171_v43 = vsel %vm2149_vm3, %v8830_v11, %v8829_v12  ;;  %v2175_v20 = vsel %vm2149_vm3, %v8831_v26, %v8830_v11  ;;  %v8832_v13 = vld [vmem:[#allocation69_spill] sm:$0xff]  ;;  %v8834_v18 = vld [vmem:[#allocation64_spill] sm:$0xff]  ;;  %8837 = vst [vmem:[#allocation44_spill] sm:$0xff] %v6281_v16  ;;  %v1772_v52 = vadd.f32 %v1740_v5, %v1254_v34 }
 0x343   : > { %v2387_v3 = vld [vmem:[#allocation5 + $0x750] sm:$0xff]  ;;  %v2361_v2 = vsel %vm2343_vm5, %v8827_v25, %v8832_v13  ;;  %v2192_v9 = vld [vmem:[#allocation5 + $0x648] sm:$0xff]  ;;  %v2167_v11 = vsel %vm2149_vm3, %v8829_v12, %v8834_v18  ;;  %v1709_v26 = vld [vmem:[#allocation5 + $0x358] sm:$0xff]  ;;  %v2418_v18 = vmul.f32 %v2386_v47, %v2365_v30  ;;  %v2031_v48 = vmul.f32 %v1999_v37, %v1973_v63 }
 0x344   : > { %v2193_v7 = vld [vmem:[#allocation5 + $0x650] sm:$0xff]  ;;  %v8835_v19 = vld [vmem:[#allocation65_spill] sm:$0xff]  ;;  %v1547_v51 = vld [vmem:[#allocation5 + $0x258] sm:$0xff]  ;;  %v6290_v46 = vmul.f32 %v2191_v42, %v2175_v20  ;;  %2327 = vrot.lane.b32.xlu0 %v5373_v41, %s4537_s24 }
 0x345   : > { %v1520_v33 = vsel %vm1502_vm7, %v8824_v32, %v8835_v19  ;;  %v8836_v25 = vld [vmem:[#allocation70_spill] sm:$0xff]  ;;  %v2385_v17 = vld [vmem:[#allocation5 + $0x740] sm:$0xff]  ;;  %v8838_v13 = vld [vmem:[#allocation51_spill] sm:$0xff]  ;;  %v6288_v32 = vadd.f32 %v5956_v24, %v1417_v23  ;;  %v2419_v19 = vmul.f32 %v2387_v3, %v2361_v2  ;;  %v2225_v16 = vmul.f32 %v2193_v7, %v2167_v11  ;;  %2329 = vrot.lane.b32.xlu1 %v5436_v29, %s4537_s24 }
 0x346   : > { %v1682_v35 = vsel %vm1664_vm8, %v8814_v44, %v8836_v25  ;;  %v2369_v12 = vsel %vm2343_vm5, %v8838_v13, %v8828_v4  ;;  %v2224_v44 = vmul.f32 %v2192_v9, %v2171_v43  ;;  %v6294_v25 = vadd.f32 %v2030_v8, %v1577_v0  ;;  %v1715_v45 = vld [vmem:[#allocation5 + $0x388] sm:$0xff]  ;;  %v8845_v23 = vld [vmem:[#allocation72_spill] sm:$0xff]  ;;  %v1716_v37 = vld [vmem:[#allocation5 + $0x390] sm:$0xff] }
 0x347   : > { %v1741_v10 = vmul.f32 %v1709_v26, %v1682_v35  ;;  %v6298_v47 = vadd.f32 %v2031_v48, %v1578_v21  ;;  %v6300_v4 = vmul.f32 %v1547_v51, %v1520_v33  ;;  %v6302_v24 = vmul.f32 %v2385_v17, %v2369_v12  ;;  %v8842_v34 = vld [vmem:[#allocation74_spill] sm:$0xff]  ;;  %v8844_v35 = vld [vmem:[#allocation91_spill] sm:$0xff]  ;;  %v6312_v48 = vpop.permute.xlu0 %2505  ;;  %v8847_v42 = vld [vmem:[#allocation88_spill] sm:$0xff] }
 0x348   : > { %8839 = vst [vmem:[#allocation57_spill] sm:$0xff] %v6294_v25  ;;  %v8843_v39 = vld [vmem:[#allocation86_spill] sm:$0xff]  ;;  %v2450_v9 = vadd.f32 %v2418_v18, %v1868_v58  ;;  %v2256_v8 = vadd.f32 %v2224_v44, %v1771_v53  ;;  %v2257_v63 = vadd.f32 %v2225_v16, %v1772_v52  ;;  %v1206_v21 = vsel %vm1179_vm4, %v8845_v23, %v8844_v35  ;;  %v8848_v20 = vld [vmem:[#allocation73_spill] sm:$0xff]  ;;  %v1231_v53 = vld [vmem:[#allocation5 + $0x98] sm:$0xff]  ;;  %v6326_v18 = vpop.permute.xlu1 %2507 }
 0x349   : > { %8840 = vst [vmem:[#allocation49_spill] sm:$0xff] %v6298_v47  ;;  %8841 = vst [vmem:[#allocation68_spill] sm:$0xff] %v6302_v24  ;;  %v1691_v5 = vsel %vm1664_vm8, %v8843_v39, %v8842_v34  ;;  %v1229_v7 = vld [vmem:[#allocation5 + $0x88] sm:$0xff]  ;;  %v2451_v30 = vadd.f32 %v2419_v19, %v1869_v31  ;;  %v1687_v43 = vsel %vm1664_vm8, %v8842_v34, %v8847_v42  ;;  %v1230_v26 = vld [vmem:[#allocation5 + $0x90] sm:$0xff]  ;;  %2335 = vrot.lane.b32.xlu0 %v5450_v54, %s4537_s24 }
 0x34a   : > { %8846 = vst [vmem:[#allocation60_spill] sm:$0xff] %v6312_v48  ;;  %v1202_v16 = vsel %vm1179_vm4, %v8844_v35, %v8848_v20  ;;  %v8849_v52 = vld [vmem:[#allocation94_spill] sm:$0xff]  ;;  %8850 = vst [vmem:[#allocation62_spill] sm:$0xff] %v6326_v18  ;;  %v6331_v31 = vadd.f32 %v1741_v10, %v6229_v56  ;;  %v1747_v0 = vmul.f32 %v1715_v45, %v1691_v5  ;;  %v8852_v19 = vld [vmem:[#allocation96_spill] sm:$0xff]  ;;  %2337 = vrot.lane.b32.xlu1 %v5510_v59, %s4537_s24 }
 0x34b   : > { %v1198_v58 = vsel %vm1179_vm4, %v8848_v20, %v8849_v52  ;;  %v1391_v3 = vld [vmem:[#allocation5 + $0x188] sm:$0xff]  ;;  %v1392_v2 = vld [vmem:[#allocation5 + $0x190] sm:$0xff]  ;;  %v2790_v10 = vld [vmem:[%s8334_s6 + $0x18] sm:$0xff]  ;;  %v1261_v56 = vmul.f32 %v1229_v7, %v1206_v21  ;;  %v1748_v18 = vmul.f32 %v1716_v37, %v1687_v43  ;;  %v6362_v59 = vpop.permute.xlu0 %2737 }
 0x34c   : > { %v8851_v11 = vld [vmem:[#allocation78_spill] sm:$0xff]  ;;  %v8853_v51 = vld [vmem:[#allocation75_spill] sm:$0xff]  ;;  %v8857_v13 = vld [vmem:[#allocation85_spill] sm:$0xff]  ;;  %v1263_v48 = vmul.f32 %v1231_v53, %v1198_v58  ;;  %8859 = vst [vmem:[#allocation45_spill] sm:$0xff] %v6362_v59 }
 0x34d   : > { %v1363_v33 = vsel %vm1340_vm6, %v8852_v19, %v8851_v11  ;;  %v1367_v17 = vsel %vm1340_vm6, %v8853_v51, %v8852_v19  ;;  %v1393_v12 = vld [vmem:[#allocation5 + $0x198] sm:$0xff]  ;;  %v8854_v44 = vld [vmem:[#allocation98_spill] sm:$0xff]  ;;  %2808 = vperm.xlu0 %3984, %v2790_v10   ;;  %v8864_v43 = vld [vmem:[#allocation97_spill] sm:$0xff] }
 0x34e   : > { %v1359_v45 = vsel %vm1340_vm6, %v8851_v11, %v8854_v44  ;;  %v1399_v34 = vld [vmem:[#allocation5 + $0x1c8] sm:$0xff]  ;;  %v1400_v5 = vld [vmem:[#allocation5 + $0x1d0] sm:$0xff]  ;;  %v1717_v25 = vld [vmem:[#allocation5 + $0x398] sm:$0xff]  ;;  %v1262_v11 = vmul.f32 %v1230_v26, %v1202_v16  ;;  %v1423_v41 = vmul.f32 %v1391_v3, %v1367_v17  ;;  %v1424_v24 = vmul.f32 %v1392_v2, %v1363_v33  ;;  %1474 = vrot.lane.b32.xlu1 %v5546_v28, %s4538_s29 }
 0x34f   : > { %v8855_v35 = vld [vmem:[#allocation87_spill] sm:$0xff]  ;;  %v8858_v7 = vld [vmem:[#allocation76_spill] sm:$0xff]  ;;  %v1237_v54 = vld [vmem:[#allocation5 + $0xc8] sm:$0xff]  ;;  %v1425_v16 = vmul.f32 %v1393_v12, %v1359_v45  ;;  %v6382_v3 = vadd.f32 %v1747_v0, %v1261_v56  ;;  %v6384_v2 = vadd.f32 %v2450_v9, %v2256_v8  ;;  %v6396_v28 = vpop.permute.xlu0 %1500 }
 0x350   : > { %v8856_v20 = vld [vmem:[#allocation99_spill] sm:$0xff]  ;;  %v1683_v21 = vsel %vm1664_vm8, %v8847_v42, %v8858_v7  ;;  %v8860_v29 = vld [vmem:[#allocation82_spill] sm:$0xff]  ;;  %v6372_v42 = vpop.permute.xlu1 %2742  ;;  %v6380_v7 = vadd.f32 %v2451_v30, %v2257_v63  ;;  %v6386_v33 = vadd.f32 %v1748_v18, %v1262_v11  ;;  %v8868_v12 = vld [vmem:[#allocation100_spill] sm:$0xff]  ;;  %8870 = vst [vmem:[#allocation61_spill] sm:$0xff] %v6396_v28  ;;  %v6414_v30 = vadd.f32 %v5959_v60, %v1424_v24 }
 0x351   : > { %v1364_v19 = vsel %vm1340_vm6, %v8856_v20, %v8855_v35  ;;  %v1368_v47 = vsel %vm1340_vm6, %v8857_v13, %v8856_v20  ;;  %v1238_v23 = vld [vmem:[#allocation5 + $0xd0] sm:$0xff]  ;;  %8863 = vst [vmem:[#allocation166_spill] sm:$0xff] %v6372_v42  ;;  %v1239_v37 = vld [vmem:[#allocation5 + $0xd8] sm:$0xff]  ;;  %v1199_v26 = vsel %vm1179_vm4, %v8860_v29, %v8864_v43  ;;  %8866 = vst [vmem:[#allocation67_spill] sm:$0xff] %v6384_v2  ;;  %1482 = vrot.lane.b32.xlu0 %v5593_v50, %s4538_s29 }
 0x352   : > { %v8861_v39 = vld [vmem:[#allocation95_spill] sm:$0xff]  ;;  %v1431_v53 = vmul.f32 %v1399_v34, %v1368_v47  ;;  %v1432_v58 = vmul.f32 %v1400_v5, %v1364_v19  ;;  %8865 = vst [vmem:[#allocation55_spill] sm:$0xff] %v6380_v7  ;;  %8867 = vst [vmem:[#allocation48_spill] sm:$0xff] %v6386_v33  ;;  %v8869_v47 = vld [vmem:[#allocation81_spill] sm:$0xff]  ;;  %v6403_v9 = vmul.f32 %v1239_v37, %v1199_v26  ;;  %1490 = vrot.lane.b32.xlu1 %v5557_v15, %s4538_s29 }
 0x353   : > { %v1203_v51 = vsel %vm1179_vm4, %v8861_v39, %v8860_v29  ;;  %v8862_v20 = vld [vmem:[#allocation79_spill] sm:$0xff]  ;;  %v1553_v29 = vld [vmem:[#allocation5 + $0x288] sm:$0xff]  ;;  %v1529_v45 = vsel %vm1502_vm7, %v8869_v47, %v8868_v12  ;;  %8875 = vst [vmem:[#allocation73_spill] sm:$0xff] %v6414_v30  ;;  %v8879_v0 = vld [vmem:[#allocation84_spill] sm:$0xff] }
 0x354   : > { %v1207_v13 = vsel %vm1179_vm4, %v8862_v20, %v8861_v39  ;;  %v1749_v39 = vmul.f32 %v1717_v25, %v1683_v21  ;;  %v6390_v10 = vmul.f32 %v1238_v23, %v1203_v51  ;;  %v6401_v25 = vadd.f32 %v5962_v1, %v1423_v41  ;;  %v1401_v8 = vld [vmem:[#allocation5 + $0x1d8] sm:$0xff]  ;;  %v6409_v23 = vpop.permute.xlu1 %1897  ;;  %v1554_v18 = vld [vmem:[#allocation5 + $0x290] sm:$0xff]  ;;  %v1723_v24 = vld [vmem:[#allocation5 + $0x3c8] sm:$0xff] }
 0x355   : > { %v6388_v17 = vmul.f32 %v1237_v54, %v1207_v13  ;;  %v8873_v54 = vld [vmem:[#allocation101_spill] sm:$0xff]  ;;  %8874 = vst [vmem:[#allocation88_spill] sm:$0xff] %v6409_v23  ;;  %v6420_v41 = vadd.f32 %v5996_v49, %v1431_v53  ;;  %v6423_v1 = vadd.f32 %v5993_v22, %v1432_v58  ;;  %v1525_v51 = vsel %vm1502_vm7, %v8868_v12, %v8879_v0  ;;  %v8880_v56 = vld [vmem:[#allocation106_spill] sm:$0xff]  ;;  %v8881_v34 = vld [vmem:[#allocation107_spill] sm:$0xff] }
 0x356   : > { %v6398_v63 = vadd.f32 %v1749_v39, %v1263_v48  ;;  %8872 = vst [vmem:[#allocation91_spill] sm:$0xff] %v6401_v25  ;;  %v1360_v13 = vsel %vm1340_vm6, %v8855_v35, %v8873_v54  ;;  %v6417_v48 = vadd.f32 %v5965_v62, %v1425_v16  ;;  %v6431_v60 = vmul.f32 %v1553_v29, %v1529_v45  ;;  %v1724_v62 = vld [vmem:[#allocation5 + $0x3d0] sm:$0xff]  ;;  %v8882_v22 = vld [vmem:[#allocation104_spill] sm:$0xff]  ;;  %v8883_v21 = vld [vmem:[#allocation109_spill] sm:$0xff]  ;;  %v6453_v29 = vpop.permute.xlu0 %1905 }
 0x357   : > { %8877 = vst [vmem:[#allocation78_spill] sm:$0xff] %v6420_v41  ;;  %8878 = vst [vmem:[#allocation96_spill] sm:$0xff] %v6423_v1  ;;  %v1688_v49 = vsel %vm1664_vm8, %v8881_v34, %v8880_v56  ;;  %v1692_v5 = vsel %vm1664_vm8, %v8882_v22, %v8881_v34  ;;  %v1433_v35 = vmul.f32 %v1401_v8, %v1360_v13  ;;  %v1725_v19 = vld [vmem:[#allocation5 + $0x3d8] sm:$0xff]  ;;  %v1378_v53 = vld [vmem:[#allocation5 + $0x120] sm:$0xff] }
 0x358   : > { %8871 = vst [vmem:[#allocation74_spill] sm:$0xff] %v6398_v63  ;;  %8876 = vst [vmem:[#allocation94_spill] sm:$0xff] %v6417_v48  ;;  %v1684_v11 = vsel %vm1664_vm8, %v8880_v56, %v8883_v21  ;;  %v1992_v37 = vld [vmem:[#allocation5 + $0x518] sm:$0xff]  ;;  %v8887_v45 = vld [vmem:[#allocation102_spill] sm:$0xff]  ;;  %v6471_v23 = vpop.permute.xlu1 %1913  ;;  %v1755_v30 = vmul.f32 %v1723_v24, %v1692_v5 }
 0x359   : > { %v8884_v26 = vld [vmem:[#allocation111_spill] sm:$0xff]  ;;  %v8885_v58 = vld [vmem:[#allocation112_spill] sm:$0xff]  ;;  %8886 = vst [vmem:[#allocation98_spill] sm:$0xff] %v6453_v29  ;;  %v1521_v8 = vsel %vm1502_vm7, %v8879_v0, %v8887_v45  ;;  %v8890_v21 = vld [vmem:[#allocation113_spill] sm:$0xff] }
 0x35a   : > { %v1968_v16 = vsel %vm1955_vm2, %v5257_v61, %v8884_v26  ;;  %v1353_v39 = vsel %vm1340_vm6, %v8788_v38, %v8885_v58  ;;  %v1555_v12 = vld [vmem:[#allocation5 + $0x298] sm:$0xff]  ;;  %v2162_v26 = vsel %vm2149_vm3, %v8793_v40, %v8890_v21  ;;  %8893 = vst [vmem:[#allocation87_spill] sm:$0xff] %v6471_v23  ;;  %v1561_v45 = vld [vmem:[#allocation5 + $0x2c8] sm:$0xff]  ;;  %v1562_v29 = vld [vmem:[#allocation5 + $0x2d0] sm:$0xff]  ;;  %v1757_v23 = vmul.f32 %v1725_v19, %v1684_v11 }
 0x35b   : > { %v8888_v13 = vld [vmem:[#allocation92_spill] sm:$0xff]  ;;  %v8889_v56 = vld [vmem:[#allocation103_spill] sm:$0xff]  ;;  %v8895_v22 = vld [vmem:[#allocation89_spill] sm:$0xff]  ;;  %v2024_v63 = vmul.f32 %v1992_v37, %v1968_v16 }
 0x35c   : > { %v1526_v34 = vsel %vm1502_vm7, %v8889_v56, %v8888_v13  ;;  %v2186_v61 = vld [vmem:[#allocation5 + $0x618] sm:$0xff]  ;;  %v1530_v20 = vsel %vm1502_vm7, %v8895_v22, %v8889_v56  ;;  %v8896_v40 = vld [vmem:[#allocation105_spill] sm:$0xff]  ;;  %v8899_v2 = vld [vmem:[#allocation30_spill] sm:$0xff]  ;;  %v1410_v56 = vmul.f32 %v1378_v53, %v1353_v39  ;;  %v6489_v22 = vmul.f32 %v1554_v18, %v1525_v51 }
 0x35d   : > { %v2380_v38 = vld [vmem:[#allocation5 + $0x718] sm:$0xff]  ;;  %v1522_v21 = vsel %vm1502_vm7, %v8888_v13, %v8896_v40  ;;  %v1216_v42 = vld [vmem:[#allocation5 + $0x20] sm:$0xff]  ;;  %v2218_v13 = vmul.f32 %v2186_v61, %v2162_v26  ;;  %v6498_v5 = vmul.f32 %v1561_v45, %v1530_v20  ;;  %v6500_v19 = vmul.f32 %v1562_v29, %v1526_v34  ;;  %v8922_v34 = vld [vmem:[#allocation114_spill] sm:$0xff] }
 0x35e   : > { %v8891_v1 = vld [vmem:[#allocation115_spill] sm:$0xff]  ;;  %v8892_v41 = vld [vmem:[#allocation32_spill] sm:$0xff]  ;;  %v8917_v29 = vld [vmem:[#allocation121_spill] sm:$0xff] }
 0x35f   : > { %v2356_v28 = vsel %vm2343_vm5, %v8892_v41, %v8891_v1  ;;  %v8894_v0 = vld [vmem:[#allocation80_spill] sm:$0xff]  ;;  %v1756_v41 = vmul.f32 %v1724_v62, %v1688_v49  ;;  %v8897_v1 = vld [vmem:[#allocation90_spill] sm:$0xff]  ;;  %v6494_v62 = vpop.permute.xlu0 %1921  ;;  %v6496_v49 = vmul.f32 %v1555_v12, %v1521_v8  ;;  %8903 = vst [vmem:[#allocation95_spill] sm:$0xff] %v6498_v5  ;;  %8904 = vst [vmem:[#allocation97_spill] sm:$0xff] %v6500_v19 }
 0x360   : > { %1638 = vrot.lane.b32.xlu0 %v8894_v0, %s4539_s19  ;;  %v1563_v48 = vld [vmem:[#allocation5 + $0x2d8] sm:$0xff]  ;;  %1646 = vrot.lane.b32.xlu1 %v8897_v1, %s4539_s19  ;;  %v2412_v24 = vmul.f32 %v2380_v38, %v2356_v28  ;;  %8902 = vst [vmem:[#allocation82_spill] sm:$0xff] %v6494_v62  ;;  %v2250_v16 = vadd.f32 %v2218_v13, %v6183_v27  ;;  %v1386_v39 = vld [vmem:[#allocation5 + $0x160] sm:$0xff]  ;;  %v1380_v27 = vld [vmem:[#allocation5 + $0x130] sm:$0xff] }
 0x361   : > { %v8898_v7 = vld [vmem:[#allocation108_spill] sm:$0xff]  ;;  %v6502_v11 = vmul.f32 %v1563_v48, %v1522_v21  ;;  %v8907_v18 = vld [vmem:[#allocation83_spill] sm:$0xff]  ;;  %v6512_v28 = vadd.f32 %v1756_v41, %v6390_v10  ;;  %v6523_v21 = vadd.f32 %v1757_v23, %v6403_v9  ;;  %v8918_v9 = vld [vmem:[#allocation122_spill] sm:$0xff] }
 0x362   : > { %v1192_v25 = vsel %vm1179_vm4, %v8899_v2, %v8898_v7  ;;  %v8900_v33 = vld [vmem:[#allocation176_spill] sm:$0xff]  ;;  %v6504_v2 = vpop.permute.xlu1 %1929  ;;  %v2444_v53 = vadd.f32 %v2412_v24, %v6163_v55  ;;  %v1349_v23 = vsel %vm1340_vm6, %v8885_v58, %v8918_v9  ;;  %v8923_v41 = vld [vmem:[#allocation27_spill] sm:$0xff]  ;;  %v2394_v62 = vld [vmem:[#allocation5 + $0x788] sm:$0xff] }
 0x363   : > { %v6492_v59 = vadd.f32 %v8900_v33, %v1433_v35  ;;  %8905 = vst [vmem:[#allocation100_spill] sm:$0xff] %v6502_v11  ;;  %8906 = vst [vmem:[#allocation81_spill] sm:$0xff] %v6504_v2  ;;  %v6509_v33 = vadd.f32 %v1755_v30, %v6388_v17  ;;  %v6514_v51 = vmul.f32 %v1216_v42, %v1192_v25  ;;  %v1374_v35 = vld [vmem:[#allocation5 + $0x100] sm:$0xff]  ;;  %v6545_v12 = vpop.permute.xlu0 %2091 }
 0x364   : > { %1654 = vrot.lane.b32.xlu0 %v8907_v18, %s4539_s19  ;;  %8909 = vst [vmem:[#allocation84_spill] sm:$0xff] %v6512_v28  ;;  %v8911_v20 = vld [vmem:[#allocation20_spill] sm:$0xff]  ;;  %1935 = vrot.lane.b32.xlu1 %v5593_v50, %s4533_s13  ;;  %8913 = vst [vmem:[#allocation107_spill] sm:$0xff] %v6523_v21  ;;  %v6526_v17 = vadd.f32 %v2024_v63, %v6181_v14  ;;  %v8914_v30 = vld [vmem:[#allocation169_spill] sm:$0xff]  ;;  %v1354_v14 = vsel %vm1340_vm6, %v8819_v36, %v8917_v29 }
 0x365   : > { %8901 = vst [vmem:[#allocation99_spill] sm:$0xff] %v6492_v59  ;;  %8908 = vst [vmem:[#allocation101_spill] sm:$0xff] %v6509_v33  ;;  %v8912_v37 = vld [vmem:[#allocation124_spill] sm:$0xff]  ;;  %v6529_v10 = vadd.f32 %v8914_v30, %v1410_v56  ;;  %v1379_v63 = vld [vmem:[#allocation5 + $0x128] sm:$0xff]  ;;  %v1345_v36 = vsel %vm1340_vm6, %v8918_v9, %v8922_v34  ;;  %v6587_v21 = vadd.f32 %v2444_v53, %v2250_v16 }
 0x366   : > { %8910 = vst [vmem:[#allocation106_spill] sm:$0xff] %v6514_v51  ;;  %v1369_v48 = vsel %vm1340_vm6, %v8912_v37, %v8911_v20  ;;  %v1540_v42 = vld [vmem:[#allocation5 + $0x220] sm:$0xff]  ;;  %8919 = vst [vmem:[#allocation92_spill] sm:$0xff] %v6545_v12  ;;  %v8924_v56 = vld [vmem:[#allocation126_spill] sm:$0xff]  ;;  %v6559_v13 = vpop.permute.xlu1 %2099 }
 0x367   : > { %8915 = vst [vmem:[#allocation112_spill] sm:$0xff] %v6529_v10  ;;  %v8916_v25 = vld [vmem:[#allocation116_spill] sm:$0xff]  ;;  %v1406_v61 = vmul.f32 %v1374_v35, %v1369_v48  ;;  %v1693_v58 = vsel %vm1664_vm8, %v8924_v56, %v8923_v41  ;;  %8925 = vst [vmem:[#allocation103_spill] sm:$0xff] %v6559_v13  ;;  %v1217_v20 = vld [vmem:[#allocation5 + $0x28] sm:$0xff]  ;;  %v1341_v41 = vsel %vm1340_vm6, %v8922_v34, %v8912_v37  ;;  %v6591_v28 = vpop.permute.xlu0 %2107 }
 0x368   : > { %v1515_v26 = vsel %vm1502_vm7, %v8800_v57, %v8916_v25  ;;  %v1224_v45 = vld [vmem:[#allocation5 + $0x60] sm:$0xff]  ;;  %1943 = vrot.lane.b32.xlu0 %v5557_v15, %s4533_s13  ;;  %v8927_v30 = vld [vmem:[#allocation110_spill] sm:$0xff]  ;;  %v1381_v48 = vld [vmem:[#allocation5 + $0x138] sm:$0xff]  ;;  %v1411_v56 = vmul.f32 %v1379_v63, %v1349_v23  ;;  %v1412_v34 = vmul.f32 %v1380_v27, %v1345_v36  ;;  %8933 = vst [vmem:[#allocation90_spill] sm:$0xff] %v6591_v28 }
 0x369   : > { %v8920_v57 = vld [vmem:[#allocation117_spill] sm:$0xff]  ;;  %v8921_v8 = vld [vmem:[#allocation56_spill] sm:$0xff]  ;;  %v6563_v24 = vmul.f32 %v1540_v42, %v1515_v26  ;;  %v1218_v26 = vld [vmem:[#allocation5 + $0x30] sm:$0xff]  ;;  %v1413_v11 = vmul.f32 %v1381_v48, %v1341_v41 }
 0x36a   : > { %v1193_v55 = vsel %vm1179_vm4, %v8921_v8, %v8920_v57  ;;  %v1698_v38 = vld [vmem:[#allocation5 + $0x300] sm:$0xff]  ;;  %v8928_v8 = vld [vmem:[#allocation118_spill] sm:$0xff]  ;;  %v1219_v10 = vld [vmem:[#allocation5 + $0x38] sm:$0xff] }
 0x36b   : > { %8926 = vst [vmem:[#allocation32_spill] sm:$0xff] %v6563_v24  ;;  %v1184_v9 = vsel %vm1179_vm4, %v8928_v8, %v8927_v30  ;;  %v1188_v35 = vsel %vm1179_vm4, %v8898_v7, %v8928_v8  ;;  %v8929_v42 = vld [vmem:[#allocation77_spill] sm:$0xff]  ;;  %v8930_v24 = vld [vmem:[#allocation120_spill] sm:$0xff]  ;;  %v8931_v51 = vld [vmem:[#allocation18_spill] sm:$0xff]  ;;  %v1418_v8 = vmul.f32 %v1386_v39, %v1354_v14  ;;  %v6589_v37 = vmul.f32 %v1224_v45, %v1193_v55  ;;  %v6600_v39 = vpop.permute.xlu1 %2115 }
 0x36c   : > { %1951 = vrot.lane.b32.xlu1 %v8929_v42, %s4533_s13  ;;  %v1212_v40 = vld [vmem:[#allocation5] sm:$0xff]  ;;  %v1180_v25 = vsel %vm1179_vm4, %v8927_v30, %v8930_v24  ;;  %v1208_v7 = vsel %vm1179_vm4, %v8930_v24, %v8931_v51  ;;  %v1730_v59 = vmul.f32 %v1698_v38, %v1693_v58  ;;  %v6593_v33 = vmul.f32 %v1217_v20, %v1188_v35  ;;  %v8941_v23 = vld [vmem:[#allocation47_spill] sm:$0xff]  ;;  %v8943_v55 = vld [vmem:[#allocation178_spill] sm:$0xff] }
 0x36d   : > { %8932 = vst [vmem:[#allocation80_spill] sm:$0xff] %v6589_v37  ;;  %v8935_v19 = vld [vmem:[#allocation172_spill] sm:$0xff]  ;;  %v8936_v12 = vld [vmem:[#allocation125_spill] sm:$0xff]  ;;  %8938 = vst [vmem:[#allocation30_spill] sm:$0xff] %v6600_v39  ;;  %2129 = vrot.lane.b32.xlu0 %v5593_v50, %s4535_s25  ;;  %v6604_v16 = vmul.f32 %v1218_v26, %v1184_v9  ;;  %v1244_v53 = vmul.f32 %v1212_v40, %v1208_v7  ;;  %v6606_v14 = vmul.f32 %v1219_v10, %v1180_v25 }
 0x36e   : > { %8934 = vst [vmem:[#allocation108_spill] sm:$0xff] %v6593_v33  ;;  %v1859_v30 = vadd.f32 %v8935_v19, %v1406_v61  ;;  %v1548_v5 = vld [vmem:[#allocation5 + $0x260] sm:$0xff]  ;;  %v8942_v45 = vld [vmem:[#allocation135_spill] sm:$0xff]  ;;  %v6615_v27 = vadd.f32 %v8943_v55, %v1418_v8  ;;  %v8951_v9 = vld [vmem:[#allocation170_spill] sm:$0xff] }
 0x36f   : > { %v8937_v13 = vld [vmem:[#allocation65_spill] sm:$0xff]  ;;  %8939 = vst [vmem:[#allocation176_spill] sm:$0xff] %v6604_v16  ;;  %8940 = vst [vmem:[#allocation83_spill] sm:$0xff] %v6606_v14  ;;  %v1694_v19 = vsel %vm1664_vm8, %v8942_v45, %v8941_v23  ;;  %v8945_v36 = vld [vmem:[#allocation171_spill] sm:$0xff]  ;;  %v6629_v35 = vadd.f32 %v8951_v9, %v1412_v34  ;;  %v1762_v41 = vadd.f32 %v1730_v59, %v1244_v53  ;;  %v6637_v23 = vpop.permute.xlu0 %2123 }
 0x370   : > { %v1516_v51 = vsel %vm1502_vm7, %v8937_v13, %v8936_v12  ;;  %v1706_v63 = vld [vmem:[#allocation5 + $0x340] sm:$0xff]  ;;  %2137 = vrot.lane.b32.xlu1 %v5557_v15, %s4535_s25  ;;  %8944 = vst [vmem:[#allocation20_spill] sm:$0xff] %v6615_v27  ;;  %v6618_v61 = vadd.f32 %v8945_v36, %v1411_v56  ;;  %v8949_v13 = vld [vmem:[#allocation35_spill] sm:$0xff]  ;;  %v8954_v26 = vld [vmem:[#allocation38_spill] sm:$0xff] }
 0x371   : > { %v1536_v38 = vld [vmem:[#allocation5 + $0x200] sm:$0xff]  ;;  %8952 = vst [vmem:[#allocation169_spill] sm:$0xff] %v6629_v35  ;;  %v6631_v48 = vmul.f32 %v1548_v5, %v1516_v51  ;;  %8956 = vst [vmem:[#allocation122_spill] sm:$0xff] %v6637_v23  ;;  %v8960_v27 = vld [vmem:[#allocation134_spill] sm:$0xff]  ;;  %v1738_v59 = vmul.f32 %v1706_v63, %v1694_v19  ;;  %v6647_v51 = vpop.permute.xlu1 %2285  ;;  %2145 = vrot.lane.b32.xlu0 %v8929_v42, %s4535_s25 }
 0x372   : > { %8946 = vst [vmem:[#allocation124_spill] sm:$0xff] %v6618_v61  ;;  %v8947_v58 = vld [vmem:[#allocation24_spill] sm:$0xff]  ;;  %v8950_v24 = vld [vmem:[#allocation129_spill] sm:$0xff]  ;;  %8962 = vst [vmem:[#allocation56_spill] sm:$0xff] %v6647_v51 }
 0x373   : > { %v8948_v40 = vld [vmem:[#allocation128_spill] sm:$0xff]  ;;  %v1209_v20 = vsel %vm1179_vm4, %v8950_v24, %v8949_v13  ;;  %8953 = vst [vmem:[#allocation121_spill] sm:$0xff] %v6631_v48  ;;  %v8955_v7 = vld [vmem:[#allocation133_spill] sm:$0xff]  ;;  %v8963_v9 = vld [vmem:[#allocation127_spill] sm:$0xff]  ;;  %v6682_v37 = vpop.permute.xlu0 %2293 }
 0x374   : > { %v1531_v10 = vsel %vm1502_vm7, %v8948_v40, %v8947_v58  ;;  %v1220_v25 = vld [vmem:[#allocation5 + $0x40] sm:$0xff]  ;;  %v1370_v8 = vsel %vm1340_vm6, %v8955_v7, %v8954_v26  ;;  %v8959_v58 = vld [vmem:[#allocation31_spill] sm:$0xff]  ;;  %v1225_v53 = vld [vmem:[#allocation5 + $0x68] sm:$0xff]  ;;  %2323 = vrot.lane.b32.xlu1 %v5593_v50, %s4537_s24  ;;  %8972 = vst [vmem:[#allocation114_spill] sm:$0xff] %v6682_v37 }
 0x375   : > { %v1382_v56 = vld [vmem:[#allocation5 + $0x140] sm:$0xff]  ;;  %v2441_v61 = vadd.f32 %v8959_v58, %v1859_v30  ;;  %v2388_v13 = vld [vmem:[#allocation5 + $0x758] sm:$0xff]  ;;  %v1568_v26 = vmul.f32 %v1536_v38, %v1531_v10  ;;  %v1252_v30 = vmul.f32 %v1220_v25, %v1209_v20  ;;  %v8964_v58 = vld [vmem:[#allocation130_spill] sm:$0xff]  ;;  %2331 = vrot.lane.b32.xlu0 %v5557_v15, %s4537_s24 }
 0x376   : > { %v8957_v55 = vld [vmem:[#allocation173_spill] sm:$0xff]  ;;  %v1388_v19 = vld [vmem:[#allocation5 + $0x170] sm:$0xff]  ;;  %v2194_v38 = vld [vmem:[#allocation5 + $0x658] sm:$0xff] }
 0x377   : > { %v6640_v36 = vadd.f32 %v8957_v55, %v1413_v11  ;;  %v8961_v34 = vld [vmem:[#allocation69_spill] sm:$0xff]  ;;  %v1189_v11 = vsel %vm1179_vm4, %v8920_v57, %v8963_v9  ;;  %v2000_v55 = vld [vmem:[#allocation5 + $0x558] sm:$0xff]  ;;  %v1226_v12 = vld [vmem:[#allocation5 + $0x70] sm:$0xff] }
 0x378   : > { %v2357_v5 = vsel %vm2343_vm5, %v8961_v34, %v8960_v27  ;;  %v1387_v63 = vld [vmem:[#allocation5 + $0x168] sm:$0xff]  ;;  %v8966_v35 = vld [vmem:[#allocation123_spill] sm:$0xff]  ;;  %v8968_v10 = vld [vmem:[#allocation132_spill] sm:$0xff]  ;;  %v6684_v45 = vmul.f32 %v1225_v53, %v1189_v11  ;;  %2339 = vrot.lane.b32.xlu1 %v8929_v42, %s4537_s24 }
 0x379   : > { %8958 = vst [vmem:[#allocation117_spill] sm:$0xff] %v6640_v36  ;;  %v8965_v36 = vld [vmem:[#allocation59_spill] sm:$0xff]  ;;  %v8969_v25 = vld [vmem:[#allocation64_spill] sm:$0xff]  ;;  %v8976_v53 = vld [vmem:[#allocation137_spill] sm:$0xff] }
 0x37a   : > { %v1969_v34 = vsel %vm1955_vm2, %v8965_v36, %v8964_v58  ;;  %v8967_v27 = vld [vmem:[#allocation131_spill] sm:$0xff]  ;;  %v2163_v20 = vsel %vm2149_vm3, %v8969_v25, %v8968_v10  ;;  %v1414_v36 = vmul.f32 %v1382_v56, %v1370_v8  ;;  %v8970_v58 = vld [vmem:[#allocation21_spill] sm:$0xff]  ;;  %8973 = vst [vmem:[#allocation27_spill] sm:$0xff] %v6684_v45  ;;  %v9007_v10 = vld [vmem:[#allocation152_spill] sm:$0xff] }
 0x37b   : > { %v1346_v48 = vsel %vm1340_vm6, %v8967_v27, %v8966_v35  ;;  %v1350_v57 = vsel %vm1340_vm6, %v8917_v29, %v8967_v27  ;;  %v2247_v40 = vadd.f32 %v8970_v58, %v1762_v41  ;;  %v8971_v14 = vld [vmem:[#allocation119_spill] sm:$0xff]  ;;  %v2420_v27 = vmul.f32 %v2388_v13, %v2357_v5  ;;  %v1544_v13 = vld [vmem:[#allocation5 + $0x240] sm:$0xff] }
 0x37c   : > { %v1185_v16 = vsel %vm1179_vm4, %v8963_v9, %v8971_v14  ;;  %v1227_v33 = vld [vmem:[#allocation5 + $0x78] sm:$0xff]  ;;  %v1181_v29 = vsel %vm1179_vm4, %v8971_v14, %v8950_v24  ;;  %v2032_v56 = vmul.f32 %v2000_v55, %v1969_v34  ;;  %v1342_v41 = vsel %vm1340_vm6, %v8966_v35, %v8955_v7  ;;  %v6690_v9 = vpop.permute.xlu1 %2301  ;;  %v9035_v28 = vld [vmem:[#allocation149_spill] sm:$0xff] }
 0x37d   : > { %v1389_v8 = vld [vmem:[#allocation5 + $0x178] sm:$0xff]  ;;  %v1770_v58 = vadd.f32 %v1738_v59, %v1252_v30  ;;  %8974 = vst [vmem:[#allocation110_spill] sm:$0xff] %v6690_v9  ;;  %v1419_v25 = vmul.f32 %v1387_v63, %v1350_v57  ;;  %v1420_v14 = vmul.f32 %v1388_v19, %v1346_v48  ;;  %v2226_v24 = vmul.f32 %v2194_v38, %v2163_v20  ;;  %v8980_v48 = vld [vmem:[#allocation174_spill] sm:$0xff]  ;;  %v1394_v19 = vld [vmem:[#allocation5 + $0x1a0] sm:$0xff] }
 0x37e   : > { %v8975_v5 = vld [vmem:[#allocation43_spill] sm:$0xff]  ;;  %v6701_v35 = vmul.f32 %v1226_v12, %v1185_v16  ;;  %v6706_v30 = vmul.f32 %v1227_v33, %v1181_v29  ;;  %v1867_v55 = vadd.f32 %v8980_v48, %v1414_v36  ;;  %v1421_v34 = vmul.f32 %v1389_v8, %v1342_v41  ;;  %v8981_v57 = vld [vmem:[#allocation140_spill] sm:$0xff]  ;;  %v6716_v12 = vpop.permute.xlu0 %2309  ;;  %v9040_v37 = vld [vmem:[#allocation165_spill] sm:$0xff] }
 0x37f   : > { %v1532_v11 = vsel %vm1502_vm7, %v8976_v53, %v8975_v5  ;;  %v8978_v7 = vld [vmem:[#allocation191_spill] sm:$0xff]  ;;  %v2452_v63 = vadd.f32 %v2420_v27, %v6288_v32  ;;  %v1355_v38 = vsel %vm1340_vm6, %v8854_v44, %v8981_v57  ;;  %v6714_v20 = vadd.f32 %v2441_v61, %v2247_v40  ;;  %8982 = vst [vmem:[#allocation18_spill] sm:$0xff] %v6716_v12  ;;  %v1232_v33 = vld [vmem:[#allocation5 + $0xa0] sm:$0xff]  ;;  %v8986_v61 = vld [vmem:[#allocation50_spill] sm:$0xff] }
 0x380   : > { %8977 = vst [vmem:[#allocation118_spill] sm:$0xff] %v6701_v35  ;;  %v6704_v59 = vadd.f32 %v8978_v7, %v1568_v26  ;;  %8979 = vst [vmem:[#allocation120_spill] sm:$0xff] %v6706_v30  ;;  %v2255_v16 = vadd.f32 %v6290_v46, %v1770_v58  ;;  %v1576_v26 = vmul.f32 %v1544_v13, %v1532_v11  ;;  %v8983_v29 = vld [vmem:[#allocation136_spill] sm:$0xff]  ;;  %v8984_v27 = vld [vmem:[#allocation145_spill] sm:$0xff]  ;;  %v6727_v44 = vpop.permute.xlu1 %2317  ;;  %2513 = vrot.lane.b32.xlu0 %v8986_v61, %s4540_s21 }
 0x381   : > { %v1194_v36 = vsel %vm1179_vm4, %v8849_v52, %v8983_v29  ;;  %v1402_v32 = vld [vmem:[#allocation5 + $0x1e0] sm:$0xff]  ;;  %v1356_v8 = vsel %vm1340_vm6, %v8873_v54, %v8984_v27  ;;  %8985 = vst [vmem:[#allocation172_spill] sm:$0xff] %v6727_v44  ;;  %v6732_v46 = vadd.f32 %v2032_v56, %v6300_v4  ;;  %v8989_v58 = vld [vmem:[#allocation179_spill] sm:$0xff]  ;;  %v2258_v52 = vadd.f32 %v2226_v24, %v6331_v31  ;;  %v9020_v30 = vld [vmem:[#allocation146_spill] sm:$0xff] }
 0x382   : > { %v8987_v40 = vld [vmem:[#allocation180_spill] sm:$0xff]  ;;  %v6738_v13 = vadd.f32 %v8989_v58, %v1420_v14  ;;  %v8991_v5 = vld [vmem:[#allocation63_spill] sm:$0xff]  ;;  %v1426_v56 = vmul.f32 %v1394_v19, %v1355_v38  ;;  %v6757_v58 = vmul.f32 %v1232_v33, %v1194_v36  ;;  %v9000_v38 = vld [vmem:[#allocation138_spill] sm:$0xff] }
 0x383   : > { %v6735_v41 = vadd.f32 %v8987_v40, %v1419_v25  ;;  %2515 = vrot.lane.b32.xlu1 %v8991_v5, %s4540_s21  ;;  %v8992_v54 = vld [vmem:[#allocation68_spill] sm:$0xff]  ;;  %v8993_v48 = vld [vmem:[#allocation139_spill] sm:$0xff]  ;;  %v8994_v25 = vld [vmem:[#allocation141_spill] sm:$0xff]  ;;  %v6755_v24 = vadd.f32 %v2452_v63, %v2258_v52  ;;  %v6759_v5 = vpop.permute.xlu0 %2477 }
 0x384   : > { %8990 = vst [vmem:[#allocation47_spill] sm:$0xff] %v6738_v13  ;;  %v2449_v11 = vadd.f32 %v8992_v54, %v1867_v55  ;;  %v1552_v7 = vld [vmem:[#allocation5 + $0x280] sm:$0xff]  ;;  %v1533_v4 = vsel %vm1502_vm7, %v8993_v48, %v8869_v47  ;;  %v1195_v14 = vsel %vm1179_vm4, %v8864_v43, %v8994_v25  ;;  %v8995_v40 = vld [vmem:[#allocation182_spill] sm:$0xff]  ;;  %8997 = vst [vmem:[#allocation171_spill] sm:$0xff] %v6757_v58  ;;  %v6774_v33 = vpop.permute.xlu1 %2485 }
 0x385   : > { %8988 = vst [vmem:[#allocation65_spill] sm:$0xff] %v6735_v41  ;;  %v1240_v61 = vld [vmem:[#allocation5 + $0xe0] sm:$0xff]  ;;  %v6753_v31 = vadd.f32 %v8995_v40, %v1421_v34  ;;  %v1434_v55 = vmul.f32 %v1402_v32, %v1356_v8  ;;  %8998 = vst [vmem:[#allocation24_spill] sm:$0xff] %v6759_v5  ;;  %v1233_v47 = vld [vmem:[#allocation5 + $0xa8] sm:$0xff] }
 0x386   : > { %v8999_v54 = vld [vmem:[#allocation37_spill] sm:$0xff]  ;;  %v1234_v19 = vld [vmem:[#allocation5 + $0xb0] sm:$0xff]  ;;  %v9001_v48 = vld [vmem:[#allocation144_spill] sm:$0xff]  ;;  %v6772_v63 = vadd.f32 %v2449_v11, %v2255_v16  ;;  %v6778_v32 = vmul.f32 %v1240_v61, %v1195_v14 }
 0x387   : > { %8996 = vst [vmem:[#allocation178_spill] sm:$0xff] %v6753_v31  ;;  %v6762_v13 = vadd.f32 %v8999_v54, %v1576_v26  ;;  %v1186_v43 = vsel %vm1179_vm4, %v9001_v48, %v9000_v38  ;;  %v1190_v34 = vsel %vm1179_vm4, %v8983_v29, %v9001_v48  ;;  %v9002_v36 = vld [vmem:[#allocation41_spill] sm:$0xff]  ;;  %v1584_v26 = vmul.f32 %v1552_v7, %v1533_v4  ;;  %v9004_v52 = vld [vmem:[#allocation75_spill] sm:$0xff]  ;;  %v9005_v40 = vld [vmem:[#allocation150_spill] sm:$0xff] }
 0x388   : > { %2521 = vrot.lane.b32.xlu0 %v9002_v36, %s4540_s21  ;;  %9003 = vst [vmem:[#allocation35_spill] sm:$0xff] %v6778_v32  ;;  %v1390_v8 = vld [vmem:[#allocation5 + $0x180] sm:$0xff]  ;;  %v1371_v54 = vsel %vm1340_vm6, %v9005_v40, %v9004_v52  ;;  %v9006_v41 = vld [vmem:[#allocation86_spill] sm:$0xff]  ;;  %v9009_v11 = vld [vmem:[#allocation183_spill] sm:$0xff] }
 0x389   : > { %v1714_v31 = vld [vmem:[#allocation5 + $0x380] sm:$0xff]  ;;  %v1695_v16 = vsel %vm1664_vm8, %v9007_v10, %v9006_v41  ;;  %v6791_v48 = vadd.f32 %v9009_v11, %v1426_v56  ;;  %v9012_v61 = vld [vmem:[#allocation71_spill] sm:$0xff]  ;;  %v2006_v36 = vld [vmem:[#allocation5 + $0x588] sm:$0xff]  ;;  %v6805_v56 = vmul.f32 %v1233_v47, %v1190_v34  ;;  %v6807_v11 = vmul.f32 %v1234_v19, %v1186_v43 }
 0x38a   : > { %v9008_v29 = vld [vmem:[#allocation53_spill] sm:$0xff]  ;;  %v9011_v4 = vld [vmem:[#allocation156_spill] sm:$0xff]  ;;  %v2007_v58 = vld [vmem:[#allocation5 + $0x590] sm:$0xff]  ;;  %v1422_v45 = vmul.f32 %v1390_v8, %v1371_v54  ;;  %v1746_v23 = vmul.f32 %v1714_v31, %v1695_v16 }
 0x38b   : > { %2523 = vrot.lane.b32.xlu1 %v9008_v29, %s4540_s21  ;;  %9010 = vst [vmem:[#allocation129_spill] sm:$0xff] %v6791_v48  ;;  %v2005_v7 = vld [vmem:[#allocation5 + $0x580] sm:$0xff]  ;;  %v1982_v14 = vsel %vm1955_vm2, %v9012_v61, %v9011_v4  ;;  %v9014_v41 = vld [vmem:[#allocation158_spill] sm:$0xff]  ;;  %9015 = vst [vmem:[#allocation170_spill] sm:$0xff] %v6805_v56 }
 0x38c   : > { %v9013_v52 = vld [vmem:[#allocation157_spill] sm:$0xff]  ;;  %9016 = vst [vmem:[#allocation38_spill] sm:$0xff] %v6807_v11  ;;  %v9017_v48 = vld [vmem:[#allocation186_spill] sm:$0xff]  ;;  %v9019_v10 = vld [vmem:[#allocation72_spill] sm:$0xff] }
 0x38d   : > { %v1978_v32 = vsel %vm1955_vm2, %v9011_v4, %v9013_v52  ;;  %v1974_v29 = vsel %vm1955_vm2, %v9013_v52, %v9014_v41  ;;  %v6810_v53 = vadd.f32 %v9017_v48, %v1434_v55  ;;  %v1228_v61 = vld [vmem:[#allocation5 + $0x80] sm:$0xff]  ;;  %v1210_v35 = vsel %vm1179_vm4, %v9020_v30, %v9019_v10  ;;  %v6816_v4 = vpop.permute.xlu0 %2493  ;;  %v2008_v44 = vld [vmem:[#allocation5 + $0x598] sm:$0xff]  ;;  %v9023_v55 = vld [vmem:[#allocation22_spill] sm:$0xff]  ;;  %v6826_v48 = vpop.permute.xlu1 %2501 }
 0x38e   : > { %v9021_v39 = vld [vmem:[#allocation159_spill] sm:$0xff]  ;;  %v2571_v19 = vld [vmem:[#allocation5 + $0x800] sm:$0xff]  ;;  %v9024_v10 = vld [vmem:[#allocation54_spill] sm:$0xff]  ;;  %v2037_v52 = vmul.f32 %v2005_v7, %v1982_v14  ;;  %v2038_v8 = vmul.f32 %v2006_v36, %v1978_v32  ;;  %v2039_v31 = vmul.f32 %v2007_v58, %v1974_v29 }
 0x38f   : > { %9018 = vst [vmem:[#allocation133_spill] sm:$0xff] %v6810_v53  ;;  %v1970_v47 = vsel %vm1955_vm2, %v9014_v41, %v9021_v39  ;;  %v9022_v43 = vld [vmem:[#allocation25_spill] sm:$0xff]  ;;  %2529 = vrot.lane.b32.xlu0 %v9024_v10, %s4540_s21  ;;  %v9026_v53 = vld [vmem:[#allocation66_spill] sm:$0xff]  ;;  %v1260_v39 = vmul.f32 %v1228_v61, %v1210_v35  ;;  %v9028_v7 = vld [vmem:[#allocation148_spill] sm:$0xff] }
 0x390   : > { %v2562_v34 = vsel %vm2537_vm9, %v9023_v55, %v9022_v43  ;;  %v2572_v54 = vld [vmem:[#allocation5 + $0x808] sm:$0xff]  ;;  %2531 = vrot.lane.b32.xlu1 %v9026_v53, %s4540_s21  ;;  %v6840_v55 = vsel %vm1179_vm4, %v9000_v38, %v9020_v30  ;;  %v6852_v32 = vsel %vm1340_vm6, %v8981_v57, %v9028_v7  ;;  %v2040_v53 = vmul.f32 %v2008_v44, %v1970_v47  ;;  %v2199_v14 = vld [vmem:[#allocation5 + $0x680] sm:$0xff]  ;;  %v9034_v56 = vld [vmem:[#allocation143_spill] sm:$0xff] }
 0x391   : > { %v9025_v16 = vld [vmem:[#allocation29_spill] sm:$0xff]  ;;  %v9027_v10 = vld [vmem:[#allocation142_spill] sm:$0xff]  ;;  %v9031_v29 = vld [vmem:[#allocation160_spill] sm:$0xff]  ;;  %v6862_v11 = vpop.permute.xlu0 %2509  ;;  %v6868_v57 = vsel %vm1179_vm4, %v9035_v28, %v9034_v56  ;;  %v6875_v9 = vadd.f32 %v2037_v52, %v1584_v26 }
 0x392   : > { %v2558_v41 = vsel %vm2537_vm9, %v9022_v43, %v9025_v16  ;;  %v6846_v58 = vsel %vm1340_vm6, %v9028_v7, %v9027_v10  ;;  %v9030_v36 = vld [vmem:[#allocation161_spill] sm:$0xff]  ;;  %v9032_v38 = vld [vmem:[#allocation162_spill] sm:$0xff]  ;;  %v2603_v43 = vmul.f32 %v2571_v19, %v2562_v34  ;;  %9033 = vst [vmem:[#allocation31_spill] sm:$0xff] %v6862_v11  ;;  %9036 = vst [vmem:[#allocation69_spill] sm:$0xff] %v6868_v57 }
 0x393   : > { %9029 = vst [vmem:[#allocation173_spill] sm:$0xff] %v6846_v58  ;;  %v2176_v30 = vsel %vm2149_vm3, %v9031_v29, %v9030_v36  ;;  %v2200_v35 = vld [vmem:[#allocation5 + $0x688] sm:$0xff]  ;;  %v2172_v61 = vsel %vm2149_vm3, %v9030_v36, %v9032_v38  ;;  %v9037_v44 = vld [vmem:[#allocation175_spill] sm:$0xff]  ;;  %v1778_v7 = vadd.f32 %v1746_v23, %v1260_v39  ;;  %v2604_v12 = vmul.f32 %v2572_v54, %v2558_v41  ;;  %v6871_v29 = vpop.permute.xlu1 %2747  ;;  %v2393_v36 = vld [vmem:[#allocation5 + $0x780] sm:$0xff] }
 0x394   : > { %v1875_v47 = vadd.f32 %v9037_v44, %v1422_v45  ;;  %9038 = vst [vmem:[#allocation127_spill] sm:$0xff] %v6871_v29  ;;  %1476 = vrot.lane.b32.xlu0 %v8894_v0, %s4538_s29  ;;  %v6878_v19 = vadd.f32 %v2038_v8, %v6431_v60  ;;  %v6881_v34 = vadd.f32 %v2039_v31, %v6489_v22  ;;  %v9039_v51 = vld [vmem:[#allocation167_spill] sm:$0xff]  ;;  %v2579_v0 = vld [vmem:[#allocation5 + $0x840] sm:$0xff]  ;;  %v9051_v29 = vld [vmem:[#allocation58_spill] sm:$0xff] }
 0x395   : > { %v2370_v39 = vsel %vm2343_vm5, %v9040_v37, %v9039_v51  ;;  %1484 = vrot.lane.b32.xlu1 %v8897_v1, %s4538_s29  ;;  %v2231_v45 = vmul.f32 %v2199_v14, %v2176_v30  ;;  %v2232_v23 = vmul.f32 %v2200_v35, %v2172_v61  ;;  %v9041_v26 = vld [vmem:[#allocation33_spill] sm:$0xff]  ;;  %v9042_v52 = vld [vmem:[#allocation192_spill] sm:$0xff]  ;;  %v2573_v8 = vld [vmem:[#allocation5 + $0x810] sm:$0xff]  ;;  %v6898_v54 = vadd.f32 %v2040_v53, %v6496_v49  ;;  %v6909_v37 = vpop.permute.xlu0 %2793 }
 0x396   : > { %v2563_v60 = vsel %vm2537_vm9, %v9042_v52, %v9041_v26  ;;  %v9043_v22 = vld [vmem:[#allocation52_spill] sm:$0xff]  ;;  %v2201_v41 = vld [vmem:[#allocation5 + $0x690] sm:$0xff]  ;;  %v2635_v30 = vadd.f32 %v2603_v43, %v6704_v59  ;;  %9046 = vst [vmem:[#allocation59_spill] sm:$0xff] %v6909_v37  ;;  %v2425_v53 = vmul.f32 %v2393_v36, %v2370_v39  ;;  %v2559_v36 = vsel %vm2537_vm9, %v9041_v26, %v9051_v29 }
 0x397   : > { %v2554_v31 = vsel %vm2537_vm9, %v9025_v16, %v9043_v22  ;;  %v9044_v44 = vld [vmem:[#allocation163_spill] sm:$0xff]  ;;  %v9045_v61 = vld [vmem:[#allocation60_spill] sm:$0xff]  ;;  %v6920_v27 = vpop.permute.xlu1 %2798 }
 0x398   : > { %v2168_v14 = vsel %vm2149_vm3, %v9032_v38, %v9044_v44  ;;  %v2574_v35 = vld [vmem:[#allocation5 + $0x818] sm:$0xff]  ;;  %v2550_v52 = vsel %vm2537_vm9, %v9043_v22, %v9045_v61  ;;  %v9049_v38 = vld [vmem:[#allocation26_spill] sm:$0xff]  ;;  %9050 = vst [vmem:[#allocation123_spill] sm:$0xff] %v6920_v27  ;;  %1492 = vrot.lane.b32.xlu0 %v8907_v18, %s4538_s29  ;;  %v2611_v22 = vmul.f32 %v2579_v0, %v2563_v60 }
 0x399   : > { %v2202_v16 = vld [vmem:[#allocation5 + $0x698] sm:$0xff]  ;;  %v2636_v43 = vadd.f32 %v2604_v12, %v9049_v38  ;;  %v2580_v61 = vld [vmem:[#allocation5 + $0x848] sm:$0xff]  ;;  %v2605_v39 = vmul.f32 %v2573_v8, %v2554_v31  ;;  %1937 = vrot.lane.b32.xlu1 %v8897_v1, %s4533_s13  ;;  %v2263_v12 = vadd.f32 %v2231_v45, %v1778_v7  ;;  %v6935_v38 = vadd.f32 %v2232_v23, %v6382_v3 }
 0x39a   : > { %v9047_v2 = vld [vmem:[#allocation164_spill] sm:$0xff]  ;;  %v2233_v0 = vmul.f32 %v2201_v41, %v2168_v14  ;;  %v2606_v60 = vmul.f32 %v2574_v35, %v2550_v52  ;;  %v2699_v26 = vadd.f32 %v6714_v20, %v2635_v30  ;;  %v9053_v31 = vld [vmem:[#allocation62_spill] sm:$0xff]  ;;  %v2457_v57 = vadd.f32 %v2425_v53, %v1875_v47  ;;  %v9057_v47 = vld [vmem:[#allocation93_spill] sm:$0xff] }
 0x39b   : > { %v2164_v49 = vsel %vm2149_vm3, %v9044_v44, %v9047_v2  ;;  %v9048_v56 = vld [vmem:[#allocation168_spill] sm:$0xff]  ;;  %v2581_v44 = vld [vmem:[#allocation5 + $0x850] sm:$0xff]  ;;  %v2612_v45 = vmul.f32 %v2580_v61, %v2559_v36  ;;  %v6945_v23 = vpop.permute.xlu1 %1634  ;;  %v2643_v52 = vadd.f32 %v2611_v22, %v6762_v13  ;;  %v9059_v61 = vld [vmem:[#allocation185_spill] sm:$0xff] }
 0x39c   : > { %v2366_v59 = vsel %vm2343_vm5, %v9039_v51, %v9048_v56  ;;  %v9052_v2 = vld [vmem:[#allocation44_spill] sm:$0xff]  ;;  %v2234_v42 = vmul.f32 %v2202_v16, %v2164_v49  ;;  %1945 = vrot.lane.b32.xlu0 %v8907_v18, %s4533_s13  ;;  %v2395_v30 = vld [vmem:[#allocation5 + $0x790] sm:$0xff]  ;;  %v2638_v49 = vadd.f32 %v2606_v60, %v6526_v17 }
 0x39d   : > { %v2555_v51 = vsel %vm2537_vm9, %v9051_v29, %v9052_v2  ;;  %v2426_v10 = vmul.f32 %v2394_v62, %v2366_v59  ;;  %v2582_v8 = vld [vmem:[#allocation5 + $0x858] sm:$0xff]  ;;  %v2551_v40 = vsel %vm2537_vm9, %v9052_v2, %v9053_v31  ;;  %v6942_v29 = vpop.permute.xlu0 %1632  ;;  %v9055_v62 = vld [vmem:[#allocation181_spill] sm:$0xff]  ;;  %v9056_v2 = vld [vmem:[#allocation34_spill] sm:$0xff]  ;;  %1953 = vrot.lane.b32.xlu1 %v9057_v47, %s4533_s13  ;;  %s8266_s13 = scalar_lea.vmem [#allocation10], %s3862_s27 }
 0x39e   : > { %v9054_v58 = vld [vmem:[#allocation36_spill] sm:$0xff]  ;;  %v2613_v3 = vmul.f32 %v2581_v44, %v2555_v51  ;;  %v2362_v20 = vsel %vm2343_vm5, %v9048_v56, %v9055_v62  ;;  %v2637_v41 = vadd.f32 %v2605_v39, %v9056_v2  ;;  %v2358_v16 = vsel %vm2343_vm5, %v9055_v62, %v9059_v61  ;;  %v9062_v36 = vld [vmem:[#allocation91_spill] sm:$0xff]  ;;  %v9063_v62 = vld [vmem:[#allocation57_spill] sm:$0xff]  ;;  %s3749_s29 = sshll.u32 %s8266_s13, 4  ;;  %s8284_s29 = int_to_ptr.vmem [resolvable:$true] %s3749_s29 }
 0x39f   : > { %v2700_v7 = vadd.f32 %v9054_v58, %v2636_v43  ;;  %v9058_v58 = vld [vmem:[#allocation45_spill] sm:$0xff]  ;;  %v2396_v35 = vld [vmem:[#allocation5 + $0x798] sm:$0xff]  ;;  %v2614_v53 = vmul.f32 %v2582_v8, %v2551_v40  ;;  %v9061_v43 = vld [vmem:[#allocation74_spill] sm:$0xff]  ;;  %v2458_v39 = vadd.f32 %v2426_v10, %v9062_v36  ;;  %v2644_v17 = vadd.f32 %v2612_v45, %v9063_v62  ;;  %v6980_v8 = vpop.permute.xlu1 %1642  ;;  %s4450_s18 = scalar_lea.vmem %s8284_s29, 1024 }
 0x3a0   : > { %v2755_v14 = vmul.f32 %v9058_v58, %v2699_v26  ;;  %v9060_v13 = vld [vmem:[#allocation48_spill] sm:$0xff]  ;;  %v6968_v22 = vadd.f32 %v2234_v42, %v9061_v43  ;;  %v6976_v26 = vadd.f32 %v2457_v57, %v2263_v12  ;;  %v9064_v40 = vld [vmem:[#allocation49_spill] sm:$0xff]  ;;  %2131 = vrot.lane.b32.xlu0 %v8897_v1, %s4535_s25  ;;  %v2427_v10 = vmul.f32 %v2395_v30, %v2362_v20  ;;  %v2589_v20 = vld [vmem:[#allocation5 + $0x890] sm:$0xff]  ;;  %p4451_p10 = scmp.ne.s32.totalorder %s8284_s29, %s4450_s18 }
 0x3a1   : > { %v2756_v56 = vmul.f32 %v9058_v58, %v2700_v7  ;;  %v6965_v59 = vadd.f32 %v2233_v0, %v9060_v13  ;;  %v6971_v44 = vpop.permute.xlu0 %1640  ;;  %v2645_v60 = vadd.f32 %v2613_v3, %v9064_v40  ;;  %v2428_v0 = vmul.f32 %v2396_v35, %v2358_v16  ;;  %v9065_v2 = vld [vmem:[#allocation40_spill] sm:$0xff]  ;;  %2139 = vrot.lane.b32.xlu1 %v8907_v18, %s4535_s25  ;;  %v9066_v16 = vld [vmem:[#allocation67_spill] sm:$0xff] }
 0x3a2   : > { %v6974_v51 = vadd.f32 %v6909_v37, %v2755_v14  ;;  %v2707_v7 = vadd.f32 %v6772_v63, %v2643_v52  ;;  %v2701_v14 = vadd.f32 %v9065_v2, %v2637_v41  ;;  %v2702_v57 = vadd.f32 %v6587_v21, %v2638_v49  ;;  %v2587_v45 = vld [vmem:[#allocation5 + $0x880] sm:$0xff]  ;;  %v2590_v52 = vld [vmem:[#allocation5 + $0x898] sm:$0xff]  ;;  %p4452_p3 = pnand %p4451_p10, %p4763_p5 }
 0x3a3   : > { %v6985_v42 = vadd.f32 %v6909_v37, %v2756_v56  ;;  %v2646_v12 = vadd.f32 %v2614_v53, %v6732_v46  ;;  %v2564_v3 = vsel %vm2537_vm9, %v6759_v5, %v6774_v33  ;;  %v2588_v56 = vld [vmem:[#allocation5 + $0x888] sm:$0xff]  ;;  %v2560_v63 = vsel %vm2537_vm9, %v6774_v33, %v6816_v4  ;;  %v9067_v49 = vld [vmem:[#allocation55_spill] sm:$0xff]  ;;  %v7015_v13 = vpop.permute.xlu1 %1650 }
 0x3a4   : > { %v2556_v21 = vsel %vm2537_vm9, %v6816_v4, %v6826_v48  ;;  %v2552_v46 = vsel %vm2537_vm9, %v6826_v48, %v6862_v11  ;;  %v2843_v30 = vsub.f32 0.0, %v6974_v51  ;;  %v2757_v35 = vmul.f32 %v9058_v58, %v2701_v14  ;;  %2147 = vrot.lane.b32.xlu0 %v9057_v47, %s4535_s25  ;;  %s3895_s25 = sshll.u32 %s4638_s17, 10  ;;  %p4453_p7 = pneg %p4452_p3 }
 0x3a5   : > { %v7009_v41 = vpop.permute.xlu0 %1648  ;;  %v2708_v33 = vadd.f32 %v9066_v16, %v2644_v17  ;;  %v2709_v53 = vadd.f32 %v9067_v49, %v2645_v60  ;;  %v2844_v4 = vsub.f32 0.0, %v6985_v42  ;;  %v2758_v43 = vmul.f32 %v9058_v58, %v2702_v57  ;;  %2325 = vrot.lane.b32.xlu1 %v8897_v1, %s4537_s24  ;;  %v9068_v17 = vld [vmem:[#allocation166_spill] sm:$0xff]  ;;  %v9069_v49 = vld [vmem:[#allocation73_spill] sm:$0xff]  ;;  %v1405_v58 = vld [vmem:[#allocation5 + $0x1f8] sm:$0xff]  ;;  %s4541_s17 = smov [#allocation10]  }
 0x3a6   : > { %v2619_v48 = vmul.f32 %v2587_v45, %v2564_v3  ;;  %v2620_v36 = vmul.f32 %v2588_v56, %v2560_v63  ;;  %v7024_v62 = vadd.f32 %v6909_v37, %v2757_v35  ;;  %v2763_v40 = vmul.f32 %v9068_v17, %v2707_v7  ;;  %v9071_v63 = vld [vmem:[#allocation94_spill] sm:$0xff] }
 0x3a7   : > { %v2710_v60 = vadd.f32 %v6755_v24, %v2646_v12  ;;  %v2621_v2 = vmul.f32 %v2589_v20, %v2556_v21  ;;  %v2622_v14 = vmul.f32 %v2590_v52, %v2552_v46  ;;  %v7029_v16 = vadd.f32 %v6909_v37, %v2758_v43  ;;  %v7039_v7 = vpop.permute.xlu1 %2487  ;;  %v1398_v37 = vld [vmem:[#allocation5 + $0x1c0] sm:$0xff] }
 0x3a8   : > { %v2459_v5 = vadd.f32 %v2427_v10, %v9069_v49  ;;  %v2875_v45 = vmul.f32 1.442695, %v2843_v30  ;;  %v2764_v3 = vmul.f32 %v9068_v17, %v2708_v33  ;;  %v7036_v56 = vadd.f32 %v6920_v27, %v2763_v40  ;;  %2333 = vrot.lane.b32.xlu0 %v8907_v18, %s4537_s24 }
 0x3a9   : > { %v7032_v57 = vpop.permute.xlu0 %2479  ;;  %v2460_v35 = vadd.f32 %v2428_v0, %v9071_v63  ;;  %v2877_v24 = vmul.f32 1.442695, %v2844_v4  ;;  %v2765_v12 = vmul.f32 %v9068_v17, %v2709_v53  ;;  %v2766_v10 = vmul.f32 %v9068_v17, %v2710_v60  ;;  %2341 = vrot.lane.b32.xlu1 %v9057_v47, %s4537_s24  ;;  %v1241_v60 = vld [vmem:[#allocation5 + $0xe8] sm:$0xff]  ;;  %s9278_s24 = sld [smem:[#allocation193_spill]] }
 0x3aa   : > { %9070 = vst [vmem:[#allocation131_spill] sm:$0xff] %v7032_v57  ;;  %v2651_v20 = vadd.f32 %v2619_v48, %v6875_v9  ;;  %v2652_v21 = vadd.f32 %v2620_v36, %v6878_v19  ;;  %v2845_v52 = vsub.f32 0.0, %v7024_v62  ;;  %v7051_v0 = vadd.f32 %v6920_v27, %v2764_v3  ;;  %v1235_v48 = vld [vmem:[#allocation5 + $0xb8] sm:$0xff]  ;;  %v1395_v36 = vld [vmem:[#allocation5 + $0x1a8] sm:$0xff] }
 0x3ab   : > { %v2653_v46 = vadd.f32 %v2621_v2, %v6881_v34  ;;  %v2654_v30 = vadd.f32 %v2622_v14, %v6898_v54  ;;  %v2846_v33 = vsub.f32 0.0, %v7029_v16  ;;  %v7057_v53 = vadd.f32 %v6920_v27, %v2765_v12  ;;  %v1242_v2 = vld [vmem:[#allocation5 + $0xf0] sm:$0xff] }
 0x3ac   : > { %v2684_v9 = vadd.f32 %v2458_v39, %v6935_v38  ;;  %4124 = vpow2.f32 %v2875_v45  ;;  %v2851_v4 = vsub.f32 0.0, %v7036_v56  ;;  %v7064_v43 = vadd.f32 %v6920_v27, %v2766_v10  ;;  %v7072_v38 = vpop.permute.xlu1 %2503  ;;  %2517 = vrot.lane.b32.xlu0 %v5593_v50, %s4540_s21  ;;  %v1396_v39 = vld [vmem:[#allocation5 + $0x1b0] sm:$0xff]  ;;  %v9076_v10 = vld [vmem:[#allocation69_spill] sm:$0xff]  ;;  %v9097_v27 = vld [vmem:[#allocation184_spill] sm:$0xff] }
 0x3ad   : > { %v7060_v19 = vpop.permute.xlu0 %2495  ;;  %v1191_v34 = vsel %vm1179_vm4, %v8994_v25, %v9035_v28  ;;  %v2685_v54 = vadd.f32 %v2459_v5, %v6965_v59  ;;  %v2686_v40 = vadd.f32 %v2460_v35, %v6968_v22  ;;  %4126 = vpow2.f32 %v2877_v24  ;;  %2525 = vrot.lane.b32.xlu1 %v5557_v15, %s4540_s21  ;;  %v9074_v24 = vld [vmem:[#allocation173_spill] sm:$0xff] }
 0x3ae   : > { %v2715_v14 = vadd.f32 %v6976_v26, %v2651_v20  ;;  %v2716_v49 = vadd.f32 %v2684_v9, %v2652_v21  ;;  %v2879_v28 = vmul.f32 1.442695, %v2845_v52  ;;  %v2852_v25 = vsub.f32 0.0, %v7051_v0  ;;  %v9078_v21 = vld [vmem:[#allocation150_spill] sm:$0xff] }
 0x3af   : > { %v2717_v5 = vadd.f32 %v2685_v54, %v2653_v46  ;;  %v2718_v59 = vadd.f32 %v2686_v40, %v2654_v30  ;;  %v2881_v22 = vmul.f32 1.442695, %v2846_v33  ;;  %v2853_v45 = vsub.f32 0.0, %v7057_v53  ;;  %v9079_v52 = vld [vmem:[#allocation142_spill] sm:$0xff]  ;;  %v9082_v33 = vld [vmem:[#allocation127_spill] sm:$0xff] }
 0x3b0   : > { %v7082_v50 = vmul.f32 %v1235_v48, %v6840_v55  ;;  %v1427_v3 = vmul.f32 %v1395_v36, %v6852_v32  ;;  %v2891_v26 = vmul.f32 1.442695, %v2851_v4  ;;  %v2854_v35 = vsub.f32 0.0, %v7064_v43  ;;  %v7098_v46 = vpop.permute.xlu1 %2752  ;;  %v9081_v32 = vld [vmem:[#allocation77_spill] sm:$0xff]  ;;  %v1397_v48 = vld [vmem:[#allocation5 + $0x1b8] sm:$0xff] }
 0x3b1   : > { %v7085_v63 = vpop.permute.xlu0 %2511  ;;  %v1428_v15 = vmul.f32 %v1396_v39, %v9074_v24  ;;  %v7089_v12 = vmul.f32 %v1241_v60, %v1191_v34  ;;  %v7092_v20 = vmul.f32 %v1242_v2, %v9076_v10  ;;  %v1343_v55 = vsel %vm1340_vm6, %v9079_v52, %v9078_v21  ;;  %9080 = vst [vmem:[#allocation191_spill] sm:$0xff] %v7098_v46  ;;  %v9083_v40 = vld [vmem:[#allocation187_spill] sm:$0xff]  ;;  %v9085_v60 = vld [vmem:[#allocation153_spill] sm:$0xff] }
 0x3b2   : > { %9072 = vst [vmem:[#allocation64_spill] sm:$0xff] %v7082_v50  ;;  %9073 = vst [vmem:[#allocation21_spill] sm:$0xff] %v7085_v63  ;;  %2533 = vrot.lane.b32.xlu0 %v9081_v32, %s4540_s21  ;;  %2519 = vrot.lane.b32.xlu1 %v8897_v1, %s4540_s21  ;;  %4128 = vpow2.f32 %v2879_v28  ;;  %v2893_v30 = vmul.f32 1.442695, %v2852_v25  ;;  %v2771_v9 = vmul.f32 %v9082_v33, %v2715_v14  ;;  %v2895_v36 = vmul.f32 1.442695, %v2853_v45 }
 0x3b3   : > { %9075 = vst [vmem:[#allocation119_spill] sm:$0xff] %v7089_v12  ;;  %9077 = vst [vmem:[#allocation43_spill] sm:$0xff] %v7092_v20  ;;  %v2772_v4 = vmul.f32 %v9082_v33, %v2716_v49  ;;  %4130 = vpow2.f32 %v2881_v22  ;;  %v2773_v34 = vmul.f32 %v9082_v33, %v2717_v5  ;;  %v2774_v54 = vmul.f32 %v9082_v33, %v2718_v59  ;;  %v9086_v2 = vld [vmem:[#allocation145_spill] sm:$0xff]  ;;  %v9090_v24 = vld [vmem:[#allocation143_spill] sm:$0xff] }
 0x3b4   : > { %v7109_v39 = vadd.f32 %v9083_v40, %v1427_v3  ;;  %v1352_v1 = vsel %vm1340_vm6, %v9086_v2, %v9085_v60  ;;  %4132 = vpow2.f32 %v2891_v26  ;;  %v2897_v14 = vmul.f32 1.442695, %v2854_v35  ;;  %v1403_v49 = vld [vmem:[#allocation5 + $0x1e8] sm:$0xff]  ;;  %v7117_v25 = vpop.permute.xlu1 %1478  ;;  %v9089_v35 = vld [vmem:[#allocation151_spill] sm:$0xff]  ;;  %v1722_v2 = vld [vmem:[#allocation5 + $0x3c0] sm:$0xff] }
 0x3b5   : > { %v7115_v28 = vpop.permute.xlu0 %2803  ;;  %9088 = vst [vmem:[#allocation136_spill] sm:$0xff] %v7117_v25  ;;  %v1429_v26 = vmul.f32 %v1397_v48, %v1343_v55  ;;  %v1183_v10 = vsel %vm1179_vm4, %v9090_v24, %v9089_v35  ;;  %v9091_v21 = vld [vmem:[#allocation147_spill] sm:$0xff]  ;;  %4134 = vpow2.f32 %v2893_v30  ;;  %v1435_v40 = vmul.f32 %v1403_v49, %v1352_v1  ;;  %v9094_v24 = vld [vmem:[#allocation154_spill] sm:$0xff]  ;;  %v9113_v20 = vld [vmem:[#allocation61_spill] sm:$0xff] }
 0x3b6   : > { %9084 = vst [vmem:[#allocation174_spill] sm:$0xff] %v7109_v39  ;;  %9087 = vst [vmem:[#allocation140_spill] sm:$0xff] %v7115_v28  ;;  %2527 = vrot.lane.b32.xlu0 %v8907_v18, %s4540_s21  ;;  %v7122_v5 = vadd.f32 %v7115_v28, %v2771_v9  ;;  %v7125_v59 = vadd.f32 %v7115_v28, %v2772_v4  ;;  %v7128_v22 = vadd.f32 %v7115_v28, %v2773_v34  ;;  %v4125_v3 = vpop.eup %4124  ;;  %v1404_v18 = vld [vmem:[#allocation5 + $0x1f0] sm:$0xff]  ;;  %v1236_v9 = vld [vmem:[#allocation5 + $0xc0] sm:$0xff] }
 0x3b7   : > { %v7131_v45 = vadd.f32 %v7115_v28, %v2774_v54  ;;  %v1348_v52 = vsel %vm1340_vm6, %v9085_v60, %v9091_v21  ;;  %2535 = vrot.lane.b32.xlu1 %v9057_v47, %s4540_s21  ;;  %v4127_v32 = vpop.eup %4126  ;;  %v1243_v4 = vld [vmem:[#allocation5 + $0xf8] sm:$0xff]  ;;  %4136 = vpow2.f32 %v2895_v36  ;;  %v2939_v36 = vadd.f32 1.0, %v4125_v3  ;;  %v9121_v12 = vld [vmem:[#allocation177_spill] sm:$0xff] }
 0x3b8   : > { %v9092_v34 = vld [vmem:[#allocation79_spill] sm:$0xff]  ;;  %v2859_v48 = vsub.f32 0.0, %v7122_v5  ;;  %v2860_v54 = vsub.f32 0.0, %v7125_v59  ;;  %v9093_v60 = vld [vmem:[#allocation104_spill] sm:$0xff]  ;;  %4138 = vpow2.f32 %v2897_v14  ;;  %v2861_v28 = vsub.f32 0.0, %v7128_v22  ;;  %v7156_v11 = vpop.permute.xlu1 %1486 }
 0x3b9   : > { %v1211_v55 = vsel %vm1179_vm4, %v9089_v35, %v9092_v34  ;;  %v1696_v47 = vsel %vm1664_vm8, %v9094_v24, %v9093_v60  ;;  %v7153_v30 = vpop.permute.xlu0 %1480  ;;  %v1436_v33 = vmul.f32 %v1404_v18, %v1348_v52  ;;  %9096 = vst [vmem:[#allocation180_spill] sm:$0xff] %v7156_v11  ;;  %v2862_v34 = vsub.f32 0.0, %v7131_v45  ;;  %v9100_v14 = vld [vmem:[#allocation155_spill] sm:$0xff]  ;;  %v9101_v52 = vld [vmem:[#allocation85_spill] sm:$0xff] }
 0x3ba   : > { %9095 = vst [vmem:[#allocation50_spill] sm:$0xff] %v7153_v30  ;;  %v2907_v35 = vmul.f32 1.442695, %v2859_v48  ;;  %v7160_v1 = vadd.f32 %v9097_v27, %v1428_v15  ;;  %v1268_v49 = vmul.f32 %v1236_v9, %v1211_v55  ;;  %v7162_v17 = vmul.f32 %v1243_v4, %v1183_v10  ;;  %v9102_v15 = vld [vmem:[#allocation188_spill] sm:$0xff] }
 0x3bb   : > { %v2940_v39 = vadd.f32 1.0, %v4127_v32  ;;  %v1754_v60 = vmul.f32 %v1722_v2, %v1696_v47  ;;  %v1344_v18 = vsel %vm1340_vm6, %v9091_v21, %v9100_v14  ;;  %v1372_v3 = vsel %vm1340_vm6, %v9100_v14, %v9101_v52  ;;  %v2013_v10 = vld [vmem:[#allocation5 + $0x5c0] sm:$0xff]  ;;  %v9104_v32 = vld [vmem:[#allocation98_spill] sm:$0xff] }
 0x3bc   : > { %9098 = vst [vmem:[#allocation179_spill] sm:$0xff] %v7160_v1  ;;  %9099 = vst [vmem:[#allocation63_spill] sm:$0xff] %v7162_v17  ;;  %v2909_v48 = vmul.f32 1.442695, %v2860_v54  ;;  %v4129_v27 = vpop.eup %4128  ;;  %v7173_v9 = vadd.f32 %v9102_v15, %v1429_v26  ;;  %v9105_v4 = vld [vmem:[#allocation88_spill] sm:$0xff]  ;;  %4140 = vpow2.f32 %v2907_v35  ;;  %v9107_v1 = vld [vmem:[#allocation190_spill] sm:$0xff]  ;;  %v7187_v52 = vpop.permute.xlu1 %1636  ;;  %v1437_v61 = vmul.f32 %v1405_v58, %v1344_v18 }
 0x3bd   : > { %v1983_v55 = vsel %vm1955_vm2, %v9105_v4, %v9104_v32  ;;  %v7179_v2 = vpop.permute.xlu0 %1488  ;;  %v2911_v21 = vmul.f32 1.442695, %v2861_v28  ;;  %v4131_v47 = vpop.eup %4130  ;;  %v7182_v31 = vadd.f32 %v9107_v1, %v1435_v40  ;;  %v9109_v14 = vld [vmem:[#allocation189_spill] sm:$0xff]  ;;  %9111 = vst [vmem:[#allocation138_spill] sm:$0xff] %v7187_v52  ;;  %4142 = vrcp.f32 %v2939_v36  ;;  %v9115_v58 = vld [vmem:[#allocation82_spill] sm:$0xff]  ;;  %v9125_v52 = vld [vmem:[#allocation56_spill] sm:$0xff] }
 0x3be   : > { %9103 = vst [vmem:[#allocation68_spill] sm:$0xff] %v7173_v9  ;;  %9106 = vst [vmem:[#allocation141_spill] sm:$0xff] %v7179_v2  ;;  %v7185_v54 = vadd.f32 %v9109_v14, %v1436_v33  ;;  %v2913_v26 = vmul.f32 1.442695, %v2862_v34  ;;  %v4133_v15 = vpop.eup %4132  ;;  %v1430_v9 = vmul.f32 %v1398_v37, %v1372_v3  ;;  %v1560_v17 = vld [vmem:[#allocation5 + $0x2c0] sm:$0xff]  ;;  %4144 = vrcp.f32 %v2940_v39  ;;  %v2014_v1 = vld [vmem:[#allocation5 + $0x5c8] sm:$0xff] }
 0x3bf   : > { %9108 = vst [vmem:[#allocation182_spill] sm:$0xff] %v7182_v31  ;;  %v9112_v4 = vld [vmem:[#allocation89_spill] sm:$0xff]  ;;  %v7193_v35 = vadd.f32 %v1754_v60, %v1268_v49  ;;  %v2045_v40 = vmul.f32 %v2013_v10, %v1983_v55  ;;  %v9114_v33 = vld [vmem:[#allocation87_spill] sm:$0xff]  ;;  %4146 = vpow2.f32 %v2909_v48  ;;  %v4135_v34 = vpop.eup %4134  ;;  %v2941_v60 = vadd.f32 1.0, %v4129_v27  ;;  %v9119_v14 = vld [vmem:[#allocation92_spill] sm:$0xff] }
 0x3c0   : > { %9110 = vst [vmem:[#allocation37_spill] sm:$0xff] %v7185_v54  ;;  %v1534_v28 = vsel %vm1502_vm7, %v9113_v20, %v9112_v4  ;;  %v1979_v36 = vsel %vm1955_vm2, %v9104_v32, %v9114_v33  ;;  %v2015_v37 = vld [vmem:[#allocation5 + $0x5d0] sm:$0xff]  ;;  %v1975_v18 = vsel %vm1955_vm2, %v9114_v33, %v9115_v58  ;;  %v2016_v3 = vld [vmem:[#allocation5 + $0x5d8] sm:$0xff]  ;;  %v9116_v4 = vld [vmem:[#allocation81_spill] sm:$0xff]  ;;  %4148 = vpow2.f32 %v2911_v21  ;;  %v7213_v31 = vpop.permute.xlu1 %1652 }
 0x3c1   : > { %v1971_v39 = vsel %vm1955_vm2, %v9115_v58, %v9116_v4  ;;  %v7207_v49 = vpop.permute.xlu0 %1644  ;;  %v4137_v10 = vpop.eup %4136  ;;  %v1592_v32 = vmul.f32 %v1560_v17, %v1534_v28  ;;  %v2207_v48 = vld [vmem:[#allocation5 + $0x6c0] sm:$0xff]  ;;  %v9118_v55 = vld [vmem:[#allocation103_spill] sm:$0xff]  ;;  %9120 = vst [vmem:[#allocation41_spill] sm:$0xff] %v7213_v31  ;;  %v2942_v33 = vadd.f32 1.0, %v4131_v47  ;;  %4150 = vpow2.f32 %v2913_v26 }
 0x3c2   : > { %9117 = vst [vmem:[#allocation144_spill] sm:$0xff] %v7207_v49  ;;  %v2177_v54 = vsel %vm2149_vm3, %v9119_v14, %v9118_v55  ;;  %v4139_v20 = vpop.eup %4138  ;;  %v1883_v24 = vadd.f32 %v9121_v12, %v1430_v9  ;;  %v9122_v58 = vld [vmem:[#allocation28_spill] sm:$0xff]  ;;  %v2046_v27 = vmul.f32 %v2014_v1, %v1979_v36  ;;  %v2947_v21 = vadd.f32 1.0, %v4133_v15  ;;  %v9124_v14 = vld [vmem:[#allocation114_spill] sm:$0xff] }
 0x3c3   : > { %v7217_v4 = vadd.f32 %v9122_v58, %v1437_v61  ;;  %v7219_v50 = vadd.f32 %v2045_v40, %v1592_v32  ;;  %v2047_v17 = vmul.f32 %v2015_v37, %v1975_v18  ;;  %v2048_v28 = vmul.f32 %v2016_v3, %v1971_v39  ;;  %v2401_v49 = vld [vmem:[#allocation5 + $0x7c0] sm:$0xff]  ;;  %v2402_v61 = vld [vmem:[#allocation5 + $0x7c8] sm:$0xff]  ;;  %v2403_v40 = vld [vmem:[#allocation5 + $0x7d0] sm:$0xff] }
 0x3c4   : > { %v2948_v2 = vadd.f32 1.0, %v4135_v34  ;;  %v2239_v11 = vmul.f32 %v2207_v48, %v2177_v54  ;;  %v2371_v47 = vsel %vm2343_vm5, %v9125_v52, %v9124_v14  ;;  %4152 = vrcp.f32 %v2941_v60  ;;  %v9127_v9 = vld [vmem:[#allocation110_spill] sm:$0xff]  ;;  %v7235_v36 = vpop.permute.xlu1 %1933  ;;  %v2404_v48 = vld [vmem:[#allocation5 + $0x7d8] sm:$0xff] }
 0x3c5   : > { %9123 = vst [vmem:[#allocation75_spill] sm:$0xff] %v7217_v4  ;;  %v7225_v26 = vpop.permute.xlu0 %1931  ;;  %v2949_v12 = vadd.f32 1.0, %v4137_v10  ;;  %v2367_v15 = vsel %vm2343_vm5, %v9124_v14, %v9127_v9  ;;  %v9128_v1 = vld [vmem:[#allocation18_spill] sm:$0xff]  ;;  %9129 = vst [vmem:[#allocation53_spill] sm:$0xff] %v7235_v36  ;;  %4154 = vrcp.f32 %v2942_v33  ;;  %v2950_v34 = vadd.f32 1.0, %v4139_v20  ;;  %v9132_v14 = vld [vmem:[#allocation172_spill] sm:$0xff] }
 0x3c6   : > { %9126 = vst [vmem:[#allocation86_spill] sm:$0xff] %v7225_v26  ;;  %v2363_v54 = vsel %vm2343_vm5, %v9127_v9, %v9128_v1  ;;  %v4141_v37 = vpop.eup %4140  ;;  %v2208_v18 = vld [vmem:[#allocation5 + $0x6c8] sm:$0xff]  ;;  %v2209_v60 = vld [vmem:[#allocation5 + $0x6d0] sm:$0xff]  ;;  %v2359_v33 = vsel %vm2343_vm5, %v9128_v1, %v9132_v14  ;;  %4156 = vrcp.f32 %v2947_v21  ;;  %v2433_v4 = vmul.f32 %v2401_v49, %v2371_v47  ;;  %v2210_v36 = vld [vmem:[#allocation5 + $0x6d8] sm:$0xff] }
 0x3c7   : > { %v9130_v3 = vld [vmem:[#allocation90_spill] sm:$0xff]  ;;  %v4143_v20 = vpop.eup %4142  ;;  %v9133_v58 = vld [vmem:[#allocation95_spill] sm:$0xff]  ;;  %4158 = vrcp.f32 %v2948_v2  ;;  %v2434_v31 = vmul.f32 %v2402_v61, %v2367_v15  ;;  %v2435_v46 = vmul.f32 %v2403_v40, %v2363_v54  ;;  %v9135_v49 = vld [vmem:[#allocation97_spill] sm:$0xff]  ;;  %v2271_v61 = vadd.f32 %v2239_v11, %v7193_v35 }
 0x3c8   : > { %v2173_v39 = vsel %vm2149_vm3, %v9118_v55, %v9130_v3  ;;  %v9131_v10 = vld [vmem:[#allocation30_spill] sm:$0xff]  ;;  %v7250_v9 = vadd.f32 %v2046_v27, %v9133_v58  ;;  %v2955_v55 = vadd.f32 1.0, %v4141_v37  ;;  %v4145_v52 = vpop.eup %4144  ;;  %4160 = vrcp.f32 %v2949_v12  ;;  %v7258_v58 = vpop.permute.xlu1 %1941  ;;  %v9136_v37 = vld [vmem:[#allocation100_spill] sm:$0xff] }
 0x3c9   : > { %v2169_v32 = vsel %vm2149_vm3, %v9130_v3, %v9131_v10  ;;  %v9134_v26 = vld [vmem:[#allocation122_spill] sm:$0xff]  ;;  %v7256_v30 = vpop.permute.xlu0 %1939  ;;  %v4147_v21 = vpop.eup %4146  ;;  %v2240_v1 = vmul.f32 %v2208_v18, %v2173_v39  ;;  %v2436_v27 = vmul.f32 %v2404_v48, %v2359_v33  ;;  %4162 = vrcp.f32 %v2950_v34  ;;  %v9139_v48 = vld [vmem:[#allocation101_spill] sm:$0xff] }
 0x3ca   : > { %v2165_v3 = vsel %vm2149_vm3, %v9131_v10, %v9134_v26  ;;  %v2241_v14 = vmul.f32 %v2209_v60, %v2169_v32  ;;  %v4149_v2 = vpop.eup %4148  ;;  %v7261_v47 = vadd.f32 %v2047_v17, %v9135_v49  ;;  %v7264_v25 = vadd.f32 %v2048_v28, %v9136_v37  ;;  %v9137_v39 = vld [vmem:[#allocation78_spill] sm:$0xff]  ;;  %v9138_v10 = vld [vmem:[#allocation96_spill] sm:$0xff]  ;;  %v9141_v37 = vld [vmem:[#allocation99_spill] sm:$0xff] }
 0x3cb   : > { %v2956_v15 = vadd.f32 1.0, %v4147_v21  ;;  %v4151_v40 = vpop.eup %4150  ;;  %v2242_v54 = vmul.f32 %v2210_v36, %v2165_v3  ;;  %v2465_v12 = vadd.f32 %v2433_v4, %v1883_v24  ;;  %4164 = vrcp.f32 %v2955_v55  ;;  %v9140_v28 = vld [vmem:[#allocation84_spill] sm:$0xff]  ;;  %v9142_v36 = vld [vmem:[#allocation39_spill] sm:$0xff] }
 0x3cc   : > { %v2957_v18 = vadd.f32 1.0, %v4149_v2  ;;  %v2466_v60 = vadd.f32 %v2434_v31, %v9137_v39  ;;  %v2467_v32 = vadd.f32 %v2435_v46, %v9138_v10  ;;  %v2958_v17 = vadd.f32 1.0, %v4151_v40  ;;  %v7274_v35 = vpop.permute.xlu1 %1949  ;;  %v1702_v4 = vld [vmem:[#allocation5 + $0x320] sm:$0xff] }
 0x3cd   : > { %v7269_v34 = vpop.permute.xlu0 %1947  ;;  %4166 = vrcp.f32 %v2956_v15  ;;  %v2272_v33 = vadd.f32 %v2240_v1, %v9139_v48  ;;  %v2273_v49 = vadd.f32 %v2241_v14, %v9140_v28  ;;  %v2468_v11 = vadd.f32 %v2436_v27, %v9141_v37  ;;  %v2595_v46 = vld [vmem:[#allocation5 + $0x8c0] sm:$0xff]  ;;  %v9145_v1 = vld [vmem:[#allocation107_spill] sm:$0xff]  ;;  %v2596_v15 = vld [vmem:[#allocation5 + $0x8c8] sm:$0xff] }
 0x3ce   : > { %4168 = vrcp.f32 %v2957_v18  ;;  %v4153_v24 = vpop.eup %4152  ;;  %v1677_v31 = vsel %vm1664_vm8, %v9142_v36, %v6942_v29  ;;  %v2565_v55 = vsel %vm2537_vm9, %v7032_v57, %v7039_v7  ;;  %v7285_v14 = vmul.f32 %v4143_v20, %v6974_v51  ;;  %v1710_v20 = vld [vmem:[#allocation5 + $0x360] sm:$0xff] }
 0x3cf   : > { %v7288_v3 = vmul.f32 %v4145_v52, %v6985_v42  ;;  %v4155_v21 = vpop.eup %4154  ;;  %v2274_v27 = vadd.f32 %v2242_v54, %v9145_v1  ;;  %v7291_v2 = vadd.f32 %v2465_v12, %v2271_v61  ;;  %v2561_v40 = vsel %vm2537_vm9, %v7039_v7, %v7060_v19  ;;  %v9146_v42 = vld [vmem:[#allocation70_spill] sm:$0xff] }
 0x3d0   : > { %9143 = vst [vmem:[#allocation183_spill] sm:$0xff] %v7285_v14  ;;  %4170 = vrcp.f32 %v2958_v17  ;;  %v4157_v18 = vpop.eup %4156  ;;  %v7297_v39 = vadd.f32 %v2466_v60, %v2272_v33  ;;  %v7299_v51 = vadd.f32 %v2467_v32, %v2273_v49  ;;  %v1678_v52 = vsel %vm1664_vm8, %v9146_v42, %v6945_v23  ;;  %v2597_v61 = vld [vmem:[#allocation5 + $0x8d0] sm:$0xff]  ;;  %v2598_v17 = vld [vmem:[#allocation5 + $0x8d8] sm:$0xff]  ;;  %v7317_v33 = vpop.permute.xlu1 %2127  ;;  %v1711_v1 = vld [vmem:[#allocation5 + $0x368] sm:$0xff] }
 0x3d1   : > { %9144 = vst [vmem:[#allocation156_spill] sm:$0xff] %v7288_v3  ;;  %v2557_v54 = vsel %vm2537_vm9, %v7060_v19, %v7072_v38  ;;  %v7309_v12 = vpop.permute.xlu0 %2125  ;;  %v4159_v7 = vpop.eup %4158  ;;  %v7311_v10 = vadd.f32 %v2468_v11, %v2274_v27  ;;  %v1734_v60 = vmul.f32 %v1702_v4, %v1677_v31  ;;  %v2627_v32 = vmul.f32 %v2595_v46, %v2565_v55  ;;  %v1703_v55 = vld [vmem:[#allocation5 + $0x328] sm:$0xff] }
 0x3d2   : > { %v2553_v48 = vsel %vm2537_vm9, %v7072_v38, %v7085_v63  ;;  %v4161_v28 = vpop.eup %4160  ;;  %v2628_v49 = vmul.f32 %v2596_v15, %v2561_v40  ;;  %v3035_v19 = vadd.f32 %v7288_v3, %v7285_v14  ;;  %v7322_v37 = vmul.f32 %v4153_v24, %v7024_v62  ;;  %v9149_v62 = vld [vmem:[#allocation126_spill] sm:$0xff]  ;;  %v9183_v3 = vld [vmem:[#allocation53_spill] sm:$0xff] }
 0x3d3   : > { %v7325_v11 = vmul.f32 %v4155_v21, %v7029_v16  ;;  %v4163_v4 = vpop.eup %4162  ;;  %v1742_v36 = vmul.f32 %v1710_v20, %v1678_v52  ;;  %v1673_v38 = vsel %vm1664_vm8, %v6942_v29, %v6971_v44  ;;  %v1674_v31 = vsel %vm1664_vm8, %v6945_v23, %v6980_v8  ;;  %v1704_v23 = vld [vmem:[#allocation5 + $0x330] sm:$0xff] }
 0x3d4   : > { %9147 = vst [vmem:[#allocation157_spill] sm:$0xff] %v7322_v37  ;;  %v2629_v46 = vmul.f32 %v2597_v61, %v2557_v54  ;;  %v1665_v16 = vsel %vm1664_vm8, %v7009_v41, %v9149_v62  ;;  %v2630_v24 = vmul.f32 %v2598_v17, %v2553_v48  ;;  %v7342_v27 = vmul.f32 %v4157_v18, %v7036_v56  ;;  %v9152_v20 = vld [vmem:[#allocation135_spill] sm:$0xff]  ;;  %v7360_v18 = vpop.permute.xlu1 %2135 }
 0x3d5   : > { %9148 = vst [vmem:[#allocation158_spill] sm:$0xff] %v7325_v11  ;;  %v7339_v21 = vpop.permute.xlu0 %2133  ;;  %3036 = vadd.xlane.f32.xlu0 %v3035_v19  ;;  %v7345_v29 = vmul.f32 %v4159_v7, %v7051_v0  ;;  %v4165_v15 = vpop.eup %4164  ;;  %v1669_v40 = vsel %vm1664_vm8, %v6971_v44, %v7009_v41  ;;  %v1666_v42 = vsel %vm1664_vm8, %v7015_v13, %v9152_v20  ;;  %v1705_v61 = vld [vmem:[#allocation5 + $0x338] sm:$0xff]  ;;  %v1712_v54 = vld [vmem:[#allocation5 + $0x370] sm:$0xff] }
 0x3d6   : > { %9150 = vst [vmem:[#allocation186_spill] sm:$0xff] %v7342_v27  ;;  %v1670_v56 = vsel %vm1664_vm8, %v6980_v8, %v7015_v13  ;;  %v2659_v0 = vadd.f32 %v2627_v32, %v7219_v50  ;;  %v1713_v7 = vld [vmem:[#allocation5 + $0x378] sm:$0xff]  ;;  %v2660_v44 = vadd.f32 %v2628_v49, %v7250_v9  ;;  %v3161_v41 = vadd.f32 %v7325_v11, %v7322_v37  ;;  %v9155_v13 = vld [vmem:[#allocation106_spill] sm:$0xff] }
 0x3d7   : > { %9151 = vst [vmem:[#allocation72_spill] sm:$0xff] %v7345_v29  ;;  %v4167_v52 = vpop.eup %4166  ;;  %v7366_v17 = vmul.f32 %v4161_v28, %v7057_v53  ;;  %v7369_v48 = vmul.f32 %v4163_v4, %v7064_v43  ;;  %v7372_v50 = vadd.f32 %v1734_v60, %v9155_v13  ;;  %v1735_v32 = vmul.f32 %v1703_v55, %v1673_v38  ;;  %v1994_v11 = vld [vmem:[#allocation5 + $0x528] sm:$0xff] }
 0x3d8   : > { %v4169_v8 = vpop.eup %4168  ;;  %v1743_v19 = vmul.f32 %v1711_v1, %v1674_v31  ;;  %v2661_v62 = vadd.f32 %v2629_v46, %v7261_v47  ;;  %v2662_v20 = vadd.f32 %v2630_v24, %v7264_v25  ;;  %v3038_v53 = vadd.f32 %v7345_v29, %v7342_v27  ;;  %v7386_v47 = vpop.permute.xlu1 %2143  ;;  %v9160_v24 = vld [vmem:[#allocation108_spill] sm:$0xff]  ;;  %v2002_v37 = vld [vmem:[#allocation5 + $0x568] sm:$0xff] }
 0x3d9   : > { %9153 = vst [vmem:[#allocation146_spill] sm:$0xff] %v7366_v17  ;;  %9154 = vst [vmem:[#allocation25_spill] sm:$0xff] %v7369_v48  ;;  %v7376_v9 = vpop.permute.xlu0 %2141  ;;  %3162 = vadd.xlane.f32.xlu0 %v3161_v41  ;;  %v7381_v28 = vmul.f32 %v4165_v15, %v7122_v5  ;;  %v7384_v43 = vmul.f32 %v4167_v52, %v7125_v59  ;;  %v1736_v49 = vmul.f32 %v1704_v23, %v1669_v40  ;;  %v9159_v59 = vld [vmem:[#allocation80_spill] sm:$0xff]  ;;  %v9169_v41 = vld [vmem:[#allocation50_spill] sm:$0xff] }
 0x3da   : > { %v4171_v60 = vpop.eup %4170  ;;  %v1737_v4 = vmul.f32 %v1705_v61, %v1665_v16  ;;  %v1744_v38 = vmul.f32 %v1712_v54, %v1670_v56  ;;  %v1745_v31 = vmul.f32 %v1713_v7, %v1666_v42  ;;  %v2723_v25 = vadd.f32 %v7291_v2, %v2659_v0  ;;  %v9162_v2 = vld [vmem:[#allocation27_spill] sm:$0xff]  ;;  %v1541_v42 = vld [vmem:[#allocation5 + $0x228] sm:$0xff]  ;;  %v9163_v56 = vld [vmem:[#allocation136_spill] sm:$0xff] }
 0x3db   : > { %9156 = vst [vmem:[#allocation54_spill] sm:$0xff] %v7381_v28  ;;  %9157 = vst [vmem:[#allocation29_spill] sm:$0xff] %v7384_v43  ;;  %v2724_v46 = vadd.f32 %v7297_v39, %v2660_v44  ;;  %3039 = vadd.xlane.f32.xlu1 %v3038_v53  ;;  %v3164_v55 = vadd.f32 %v7369_v48, %v7366_v17  ;;  %v7393_v5 = vmul.f32 %v4169_v8, %v7128_v22  ;;  %v9164_v22 = vld [vmem:[#allocation116_spill] sm:$0xff]  ;;  %v9166_v61 = vld [vmem:[#allocation83_spill] sm:$0xff] }
 0x3dc   : > { %v7396_v1 = vadd.f32 %v1742_v36, %v9159_v59  ;;  %v7399_v16 = vadd.f32 %v1735_v32, %v9160_v24  ;;  %v2725_v15 = vadd.f32 %v7299_v51, %v2661_v62  ;;  %v7403_v23 = vmul.f32 %v4171_v60, %v7131_v45  ;;  %v9165_v52 = vld [vmem:[#allocation176_spill] sm:$0xff]  ;;  %v9167_v7 = vld [vmem:[#allocation118_spill] sm:$0xff]  ;;  %v9170_v8 = vld [vmem:[#allocation125_spill] sm:$0xff]  ;;  %v7430_v32 = vpop.permute.xlu1 %2321 }
 0x3dd   : > { %9158 = vst [vmem:[#allocation66_spill] sm:$0xff] %v7393_v5  ;;  %v7406_v39 = vadd.f32 %v1743_v19, %v9162_v2  ;;  %v2726_v40 = vadd.f32 %v7311_v10, %v2662_v20  ;;  %v1511_v36 = vsel %vm1502_vm7, %v9164_v22, %v9163_v56  ;;  %v7413_v0 = vpop.permute.xlu0 %2319  ;;  %3165 = vadd.xlane.f32.xlu0 %v3164_v55  ;;  %v1549_v44 = vld [vmem:[#allocation5 + $0x268] sm:$0xff]  ;;  %v9171_v19 = vld [vmem:[#allocation120_spill] sm:$0xff]  ;;  %v9173_v53 = vld [vmem:[#allocation191_spill] sm:$0xff] }
 0x3de   : > { %9161 = vst [vmem:[#allocation148_spill] sm:$0xff] %v7403_v23  ;;  %v3041_v51 = vadd.f32 %v7384_v43, %v7381_v28  ;;  %v7418_v45 = vadd.f32 %v1736_v49, %v9165_v52  ;;  %v7421_v54 = vadd.f32 %v1737_v4, %v9166_v61  ;;  %v7424_v10 = vadd.f32 %v1744_v38, %v9167_v7  ;;  %v1718_v38 = vld [vmem:[#allocation5 + $0x3a0] sm:$0xff]  ;;  %v9174_v55 = vld [vmem:[#allocation138_spill] sm:$0xff]  ;;  %v9182_v28 = vld [vmem:[#allocation111_spill] sm:$0xff] }
 0x3df   : > { %v1512_v13 = vsel %vm1502_vm7, %v9170_v8, %v9169_v41  ;;  %v7433_v62 = vadd.f32 %v1745_v31, %v9171_v19  ;;  %v3167_v20 = vadd.f32 %v7403_v23, %v7393_v5  ;;  %v7438_v60 = vmul.f32 %v9173_v53, %v2723_v25  ;;  %v9175_v59 = vld [vmem:[#allocation76_spill] sm:$0xff]  ;;  %v1719_v31 = vld [vmem:[#allocation5 + $0x3a8] sm:$0xff]  ;;  %v1542_v52 = vld [vmem:[#allocation5 + $0x230] sm:$0xff] }
 0x3e0   : > { %9168 = vst [vmem:[#allocation161_spill] sm:$0xff] %v7424_v10  ;;  %3042 = vadd.xlane.f32.xlu1 %v3041_v51  ;;  %v7441_v49 = vmul.f32 %v9173_v53, %v2724_v46  ;;  %v7443_v4 = vmul.f32 %v1541_v42, %v1511_v36  ;;  %v1679_v24 = vsel %vm1664_vm8, %v9175_v59, %v9174_v55  ;;  %v9176_v2 = vld [vmem:[#allocation144_spill] sm:$0xff]  ;;  %v1720_v36 = vld [vmem:[#allocation5 + $0x3b0] sm:$0xff]  ;;  %v9179_v7 = vld [vmem:[#allocation41_spill] sm:$0xff]  ;;  %v7481_v29 = vpop.permute.xlu1 %2329 }
 0x3e1   : > { %9172 = vst [vmem:[#allocation162_spill] sm:$0xff] %v7433_v62  ;;  %v1675_v22 = vsel %vm1664_vm8, %v9174_v55, %v9176_v2  ;;  %v2781_v25 = vmul.f32 %v9173_v53, %v2725_v15  ;;  %v1581_v51 = vmul.f32 %v1549_v44, %v1512_v13  ;;  %v9177_v46 = vld [vmem:[#allocation128_spill] sm:$0xff]  ;;  %v1671_v8 = vsel %vm1664_vm8, %v9176_v2, %v9179_v7  ;;  %v7462_v19 = vpop.permute.xlu0 %2327  ;;  %v9181_v43 = vld [vmem:[#allocation86_spill] sm:$0xff]  ;;  %v9185_v23 = vld [vmem:[#allocation137_spill] sm:$0xff] }
 0x3e2   : > { %v9178_v61 = vld [vmem:[#allocation180_spill] sm:$0xff]  ;;  %3168 = vadd.xlane.f32.xlu0 %v3167_v20  ;;  %v2782_v55 = vmul.f32 %v9173_v53, %v2726_v40  ;;  %v1964_v2 = vsel %vm1955_vm2, %v9182_v28, %v9181_v43  ;;  %v9184_v40 = vld [vmem:[#allocation130_spill] sm:$0xff]  ;;  %v9186_v5 = vld [vmem:[#allocation141_spill] sm:$0xff]  ;;  %v1751_v48 = vmul.f32 %v1719_v31, %v1675_v22  ;;  %v1752_v17 = vmul.f32 %v1720_v36, %v1671_v8 }
 0x3e3   : > { %v1503_v42 = vsel %vm1502_vm7, %v9178_v61, %v9177_v46  ;;  %v1507_v15 = vsel %vm1502_vm7, %v9163_v56, %v9178_v61  ;;  %v1721_v44 = vld [vmem:[#allocation5 + $0x3b8] sm:$0xff]  ;;  %v1993_v46 = vld [vmem:[#allocation5 + $0x520] sm:$0xff]  ;;  %v1965_v14 = vsel %vm1955_vm2, %v9184_v40, %v9183_v3  ;;  %v1550_v61 = vld [vmem:[#allocation5 + $0x270] sm:$0xff]  ;;  %v1508_v28 = vsel %vm1502_vm7, %v9169_v41, %v9186_v5 }
 0x3e4   : > { %v9180_v13 = vld [vmem:[#allocation152_spill] sm:$0xff]  ;;  %v1960_v40 = vsel %vm1955_vm2, %v9181_v43, %v7256_v30  ;;  %v1995_v53 = vld [vmem:[#allocation5 + $0x530] sm:$0xff]  ;;  %v9187_v22 = vld [vmem:[#allocation17_spill] sm:$0xff]  ;;  %v1574_v8 = vmul.f32 %v1542_v52, %v1507_v15  ;;  %v7509_v26 = vpop.permute.xlu1 %2337 }
 0x3e5   : > { %v1667_v59 = vsel %vm1664_vm8, %v9179_v7, %v9180_v13  ;;  %v2001_v20 = vld [vmem:[#allocation5 + $0x560] sm:$0xff]  ;;  %v1543_v56 = vld [vmem:[#allocation5 + $0x238] sm:$0xff]  ;;  %v1504_v7 = vsel %vm1502_vm7, %v9186_v5, %v9185_v23  ;;  %v1750_v13 = vmul.f32 %v1718_v38, %v1679_v24  ;;  %v1961_v23 = vsel %vm1955_vm2, %v9183_v3, %v7258_v58  ;;  %v7507_v36 = vpop.permute.xlu0 %2335 }
 0x3e6   : > { %v1551_v27 = vld [vmem:[#allocation5 + $0x278] sm:$0xff]  ;;  %v1956_v5 = vsel %vm1955_vm2, %v7256_v30, %v7269_v34  ;;  %v1753_v41 = vmul.f32 %v1721_v44, %v1667_v59  ;;  %v2025_v38 = vmul.f32 %v1993_v46, %v1964_v2  ;;  %v2033_v24 = vmul.f32 %v2001_v20, %v1965_v14  ;;  %v2003_v44 = vld [vmem:[#allocation5 + $0x570] sm:$0xff] }
 0x3e7   : > { %v1996_v31 = vld [vmem:[#allocation5 + $0x538] sm:$0xff]  ;;  %v1984_v43 = vsel %vm1955_vm2, %v7269_v34, %v9187_v22  ;;  %v1575_v57 = vmul.f32 %v1543_v56, %v1503_v42  ;;  %v1582_v3 = vmul.f32 %v1550_v61, %v1508_v28  ;;  %v1583_v63 = vmul.f32 %v1551_v27, %v1504_v7  ;;  %v9189_v34 = vld [vmem:[#allocation170_spill] sm:$0xff]  ;;  %v9196_v61 = vld [vmem:[#allocation121_spill] sm:$0xff] }
 0x3e8   : > { %v2026_v62 = vmul.f32 %v1994_v11, %v1960_v40  ;;  %v2034_v10 = vmul.f32 %v2002_v37, %v1961_v23  ;;  %v2027_v30 = vmul.f32 %v1995_v53, %v1956_v5  ;;  %v1957_v14 = vsel %vm1955_vm2, %v7258_v58, %v7274_v35  ;;  %v9188_v59 = vld [vmem:[#allocation171_spill] sm:$0xff]  ;;  %v9190_v27 = vld [vmem:[#allocation42_spill] sm:$0xff]  ;;  %v9193_v15 = vld [vmem:[#allocation64_spill] sm:$0xff] }
 0x3e9   : > { %v7516_v46 = vadd.f32 %v1750_v13, %v9188_v59  ;;  %v7519_v2 = vadd.f32 %v1751_v48, %v9189_v34  ;;  %v2028_v52 = vmul.f32 %v1996_v31, %v1984_v43  ;;  %v2004_v42 = vld [vmem:[#allocation5 + $0x578] sm:$0xff]  ;;  %v1985_v37 = vsel %vm1955_vm2, %v7274_v35, %v9190_v27  ;;  %v9191_v11 = vld [vmem:[#allocation38_spill] sm:$0xff]  ;;  %v7537_v48 = vpop.permute.xlu0 %2808  ;;  %v7539_v13 = vpop.permute.xlu1 %1474  ;;  %v2187_v31 = vld [vmem:[#allocation5 + $0x620] sm:$0xff] }
 0x3ea   : > { %v7526_v53 = vadd.f32 %v1752_v17, %v9191_v11  ;;  %v7529_v20 = vadd.f32 %v1753_v41, %v9193_v15  ;;  %v9195_v58 = vld [vmem:[#allocation32_spill] sm:$0xff]  ;;  %v7535_v7 = vadd.f32 %v2033_v24, %v9196_v61  ;;  %9198 = vst [vmem:[#allocation33_spill] sm:$0xff] %v7537_v48  ;;  %v2035_v28 = vmul.f32 %v2003_v44, %v1957_v14 }
 0x3eb   : > { %v7532_v56 = vadd.f32 %v2025_v38, %v9195_v58  ;;  %v7542_v40 = vadd.f32 %v7537_v48, %v2781_v25  ;;  %v7545_v35 = vadd.f32 %v7537_v48, %v2782_v55  ;;  %v7549_v17 = vadd.f32 %v7537_v48, %v7438_v60  ;;  %v9203_v25 = vld [vmem:[#allocation113_spill] sm:$0xff] }
 0x3ec   : > { %9192 = vst [vmem:[#allocation149_spill] sm:$0xff] %v7526_v53  ;;  %9194 = vst [vmem:[#allocation175_spill] sm:$0xff] %v7529_v20  ;;  %v7552_v23 = vadd.f32 %v2026_v62, %v7443_v4  ;;  %v7554_v5 = vadd.f32 %v2034_v10, %v1581_v51  ;;  %v7556_v41 = vadd.f32 %v2027_v30, %v1574_v8  ;;  %v2195_v43 = vld [vmem:[#allocation5 + $0x660] sm:$0xff]  ;;  %v2188_v4 = vld [vmem:[#allocation5 + $0x628] sm:$0xff] }
 0x3ed   : > { %9197 = vst [vmem:[#allocation167_spill] sm:$0xff] %v7535_v7  ;;  %v2036_v38 = vmul.f32 %v2004_v42, %v1985_v37  ;;  %v7558_v24 = vadd.f32 %v2028_v52, %v1575_v57  ;;  %v2158_v55 = vsel %vm2149_vm3, %v9203_v25, %v7309_v12  ;;  %v2869_v22 = vsub.f32 0.0, %v7542_v40  ;;  %v9204_v62 = vld [vmem:[#allocation132_spill] sm:$0xff]  ;;  %v1483_v51 = vpop.permute.xlu0 %1482  ;;  %v7586_v59 = vpop.permute.xlu1 %1490 }
 0x3ee   : > { %9199 = vst [vmem:[#allocation52_spill] sm:$0xff] %v7552_v23  ;;  %9200 = vst [vmem:[#allocation163_spill] sm:$0xff] %v7554_v5  ;;  %v2870_v60 = vsub.f32 0.0, %v7545_v35  ;;  %v2159_v10 = vsel %vm2149_vm3, %v9204_v62, %v7317_v33  ;;  %v2154_v57 = vsel %vm2149_vm3, %v7309_v12, %v7339_v21  ;;  %v7576_v8 = vadd.f32 %v7537_v48, %v7441_v49  ;;  %v2381_v58 = vld [vmem:[#allocation5 + $0x720] sm:$0xff] }
 0x3ef   : > { %9201 = vst [vmem:[#allocation168_spill] sm:$0xff] %v7556_v41  ;;  %9202 = vst [vmem:[#allocation26_spill] sm:$0xff] %v7558_v24  ;;  %v2867_v30 = vsub.f32 0.0, %v7549_v17  ;;  %v7579_v44 = vadd.f32 %v2035_v28, %v1582_v3  ;;  %v7584_v14 = vsel %vm1502_vm7, %v7539_v13, %v1483_v51  ;;  %v2927_v34 = vmul.f32 1.442695, %v2869_v22  ;;  %v9208_v22 = vld [vmem:[#allocation134_spill] sm:$0xff] }
 0x3f0   : > { %v2929_v52 = vmul.f32 1.442695, %v2870_v60  ;;  %v7588_v42 = vadd.f32 %v2036_v38, %v1583_v63  ;;  %v2219_v12 = vmul.f32 %v2187_v31, %v2158_v55  ;;  %v7593_v49 = vsel %vm1502_vm7, %v1483_v51, %v7586_v59  ;;  %v9207_v63 = vld [vmem:[#allocation115_spill] sm:$0xff]  ;;  %v2196_v31 = vld [vmem:[#allocation5 + $0x668] sm:$0xff]  ;;  %v2389_v55 = vld [vmem:[#allocation5 + $0x760] sm:$0xff] }
 0x3f1   : > { %9205 = vst [vmem:[#allocation58_spill] sm:$0xff] %v7579_v44  ;;  %v2868_v3 = vsub.f32 0.0, %v7576_v8  ;;  %v2227_v27 = vmul.f32 %v2195_v43, %v2159_v10  ;;  %v2220_v37 = vmul.f32 %v2188_v4, %v2154_v57  ;;  %4172 = vpow2.f32 %v2927_v34  ;;  %v7604_v28 = vpop.permute.xlu0 %1638  ;;  %v2382_v60 = vld [vmem:[#allocation5 + $0x728] sm:$0xff]  ;;  %v7618_v62 = vpop.permute.xlu1 %1646  ;;  %v2189_v10 = vld [vmem:[#allocation5 + $0x630] sm:$0xff]  ;;  %v2384_v44 = vld [vmem:[#allocation5 + $0x738] sm:$0xff] }
 0x3f2   : > { %9206 = vst [vmem:[#allocation44_spill] sm:$0xff] %v7588_v42  ;;  %v2923_v11 = vmul.f32 1.442695, %v2867_v30  ;;  %v2155_v15 = vsel %vm2149_vm3, %v7317_v33, %v7360_v18  ;;  %v2352_v61 = vsel %vm2343_vm5, %v9207_v63, %v7413_v0  ;;  %4174 = vpow2.f32 %v2929_v52  ;;  %v2390_v4 = vld [vmem:[#allocation5 + $0x768] sm:$0xff]  ;;  %v2383_v57 = vld [vmem:[#allocation5 + $0x730] sm:$0xff]  ;;  %v2190_v30 = vld [vmem:[#allocation5 + $0x638] sm:$0xff] }
 0x3f3   : > { %v2925_v38 = vmul.f32 1.442695, %v2868_v3  ;;  %v2150_v25 = vsel %vm2149_vm3, %v7339_v21, %v7376_v9  ;;  %v2353_v33 = vsel %vm2343_vm5, %v9208_v22, %v7430_v32  ;;  %v2348_v43 = vsel %vm2343_vm5, %v7413_v0, %v7462_v19  ;;  %v9209_v34 = vld [vmem:[#allocation19_spill] sm:$0xff] }
 0x3f4   : > { %4176 = vpow2.f32 %v2923_v11  ;;  %v2349_v21 = vsel %vm2343_vm5, %v7430_v32, %v7481_v29  ;;  %v2344_v51 = vsel %vm2343_vm5, %v7462_v19, %v7507_v36  ;;  %v7632_v0 = vsel %vm1664_vm8, %v7604_v28, %v7618_v62  ;;  %v2197_v32 = vld [vmem:[#allocation5 + $0x670] sm:$0xff]  ;;  %v2198_v3 = vld [vmem:[#allocation5 + $0x678] sm:$0xff] }
 0x3f5   : > { %4178 = vpow2.f32 %v2925_v38  ;;  %v2178_v52 = vsel %vm2149_vm3, %v7376_v9, %v9209_v34  ;;  %v2151_v19 = vsel %vm2149_vm3, %v7360_v18, %v7386_v47  ;;  %v9210_v11 = vld [vmem:[#allocation46_spill] sm:$0xff]  ;;  %v2413_v22 = vmul.f32 %v2381_v58, %v2352_v61  ;;  %v9211_v24 = vld [vmem:[#allocation23_spill] sm:$0xff]  ;;  %v1655_v34 = vpop.permute.xlu0 %1654  ;;  %v1936_v20 = vpop.permute.xlu1 %1935 }
 0x3f6   : > { %v2179_v63 = vsel %vm2149_vm3, %v7386_v47, %v9210_v11  ;;  %v2228_v38 = vmul.f32 %v2196_v31, %v2155_v15  ;;  %v2421_v48 = vmul.f32 %v2389_v55, %v2353_v33  ;;  %v2414_v42 = vmul.f32 %v2382_v60, %v2348_v43  ;;  %v2391_v58 = vld [vmem:[#allocation5 + $0x770] sm:$0xff]  ;;  %v9214_v33 = vld [vmem:[#allocation124_spill] sm:$0xff]  ;;  %v9220_v11 = vld [vmem:[#allocation117_spill] sm:$0xff] }
 0x3f7   : > { %v2372_v9 = vsel %vm2343_vm5, %v7507_v36, %v9211_v24  ;;  %v2251_v41 = vadd.f32 %v2219_v12, %v7372_v50  ;;  %v2221_v5 = vmul.f32 %v2189_v10, %v2150_v25  ;;  %v2422_v18 = vmul.f32 %v2390_v4, %v2349_v21  ;;  %v9212_v24 = vld [vmem:[#allocation112_spill] sm:$0xff]  ;;  %v9215_v10 = vld [vmem:[#allocation51_spill] sm:$0xff] }
 0x3f8   : > { %v2415_v23 = vmul.f32 %v2383_v57, %v2344_v51  ;;  %v2222_v53 = vmul.f32 %v2190_v30, %v2178_v52  ;;  %v2229_v7 = vmul.f32 %v2197_v32, %v2151_v19  ;;  %v2230_v47 = vmul.f32 %v2198_v3, %v2179_v63  ;;  %v9213_v25 = vld [vmem:[#allocation20_spill] sm:$0xff]  ;;  %v9219_v52 = vld [vmem:[#allocation162_spill] sm:$0xff] }
 0x3f9   : > { %v2345_v15 = vsel %vm2343_vm5, %v7481_v29, %v7509_v26  ;;  %v2259_v61 = vadd.f32 %v2227_v27, %v7396_v1  ;;  %v2252_v36 = vadd.f32 %v2220_v37, %v7399_v16  ;;  %v2445_v31 = vadd.f32 %v2413_v22, %v9212_v24  ;;  %v2392_v43 = vld [vmem:[#allocation5 + $0x778] sm:$0xff]  ;;  %v1944_v29 = vpop.permute.xlu0 %1943  ;;  %v9216_v16 = vld [vmem:[#allocation65_spill] sm:$0xff] }
 0x3fa   : > { %v2416_v50 = vmul.f32 %v2384_v44, %v2372_v9  ;;  %v2260_v12 = vadd.f32 %v2228_v38, %v7406_v39  ;;  %v2453_v55 = vadd.f32 %v2421_v48, %v9213_v25  ;;  %v2446_v60 = vadd.f32 %v2414_v42, %v9214_v33  ;;  %v9217_v37 = vld [vmem:[#allocation169_spill] sm:$0xff]  ;;  %v1952_v39 = vpop.permute.xlu1 %1951  ;;  %v9223_v25 = vld [vmem:[#allocation178_spill] sm:$0xff]  ;;  %v1729_v33 = vld [vmem:[#allocation5 + $0x3f8] sm:$0xff] }
 0x3fb   : > { %v2373_v4 = vsel %vm2343_vm5, %v7509_v26, %v9215_v10  ;;  %v4173_v21 = vpop.eup %4172  ;;  %v2253_v1 = vadd.f32 %v2221_v5, %v7418_v45  ;;  %v2454_v27 = vadd.f32 %v2422_v18, %v9216_v16  ;;  %v2447_v44 = vadd.f32 %v2415_v23, %v9217_v37  ;;  %v9218_v42 = vld [vmem:[#allocation161_spill] sm:$0xff]  ;;  %v9221_v18 = vld [vmem:[#allocation47_spill] sm:$0xff] }
 0x3fc   : > { %v2423_v57 = vmul.f32 %v2391_v58, %v2345_v15  ;;  %v4175_v51 = vpop.eup %4174  ;;  %v2254_v48 = vadd.f32 %v2222_v53, %v7421_v54  ;;  %v2261_v30 = vadd.f32 %v2229_v7, %v9218_v42  ;;  %v2262_v32 = vadd.f32 %v2230_v47, %v9219_v52  ;;  %v1726_v58 = vld [vmem:[#allocation5 + $0x3e0] sm:$0xff]  ;;  %v1727_v24 = vld [vmem:[#allocation5 + $0x3e8] sm:$0xff]  ;;  %v2011_v37 = vld [vmem:[#allocation5 + $0x5b0] sm:$0xff] }
 0x3fd   : > { %v2965_v3 = vadd.f32 1.0, %v4173_v21  ;;  %v7671_v26 = vadd.f32 %v2445_v31, %v2251_v41  ;;  %v2448_v63 = vadd.f32 %v2416_v50, %v9220_v11  ;;  %v2424_v45 = vmul.f32 %v2392_v43, %v2373_v4  ;;  %v2130_v9 = vpop.permute.xlu0 %2129  ;;  %v9222_v15 = vld [vmem:[#allocation109_spill] sm:$0xff]  ;;  %v9225_v4 = vld [vmem:[#allocation159_spill] sm:$0xff] }
 0x3fe   : > { %v4177_v19 = vpop.eup %4176  ;;  %v2966_v5 = vadd.f32 1.0, %v4175_v51  ;;  %v7674_v38 = vadd.f32 %v2453_v55, %v2259_v61  ;;  %v7676_v23 = vadd.f32 %v2446_v60, %v2252_v36  ;;  %v7678_v53 = vadd.f32 %v2454_v27, %v2260_v12  ;;  %v2138_v41 = vpop.permute.xlu1 %2137  ;;  %v1728_v36 = vld [vmem:[#allocation5 + $0x3f0] sm:$0xff]  ;;  %v2009_v10 = vld [vmem:[#allocation5 + $0x5a0] sm:$0xff]  ;;  %v2010_v16 = vld [vmem:[#allocation5 + $0x5a8] sm:$0xff] }
 0x3ff   : > { %v4179_v22 = vpop.eup %4178  ;;  %4180 = vrcp.f32 %v2965_v3  ;;  %v2963_v54 = vadd.f32 1.0, %v4177_v19  ;;  %v7680_v7 = vadd.f32 %v2447_v44, %v2253_v1  ;;  %v2455_v47 = vadd.f32 %v2423_v57, %v9221_v18  ;;  %v9224_v60 = vld [vmem:[#allocation154_spill] sm:$0xff]  ;;  %v1556_v21 = vld [vmem:[#allocation5 + $0x2a0] sm:$0xff]  ;;  %v9227_v42 = vld [vmem:[#allocation139_spill] sm:$0xff] }
 0x400   : > { %4182 = vrcp.f32 %v2966_v5  ;;  %v1680_v61 = vsel %vm1664_vm8, %v9222_v15, %v7604_v28  ;;  %v1672_v31 = vsel %vm1664_vm8, %v7618_v62, %v1655_v34  ;;  %v2964_v50 = vadd.f32 1.0, %v4179_v22  ;;  %v9226_v1 = vld [vmem:[#allocation102_spill] sm:$0xff]  ;;  %v9228_v5 = vld [vmem:[#allocation71_spill] sm:$0xff]  ;;  %v2203_v22 = vld [vmem:[#allocation5 + $0x6a0] sm:$0xff] }
 0x401   : > { %4184 = vrcp.f32 %v2963_v54  ;;  %v7690_v12 = vadd.f32 %v2448_v63, %v2254_v48  ;;  %v2456_v55 = vadd.f32 %v2424_v45, %v9223_v25  ;;  %v1668_v43 = vsel %vm1664_vm8, %v1655_v34, %v9224_v60  ;;  %v2146_v34 = vpop.permute.xlu0 %2145  ;;  %v1557_v57 = vld [vmem:[#allocation5 + $0x2a8] sm:$0xff]  ;;  %v1558_v51 = vld [vmem:[#allocation5 + $0x2b0] sm:$0xff]  ;;  %v1559_v48 = vld [vmem:[#allocation5 + $0x2b8] sm:$0xff] }
 0x402   : > { %v1966_v28 = vsel %vm1955_vm2, %v9225_v4, %v1936_v20  ;;  %v1517_v62 = vsel %vm1502_vm7, %v9226_v1, %v7539_v13  ;;  %v1962_v27 = vsel %vm1955_vm2, %v1936_v20, %v1944_v29  ;;  %v1958_v44 = vsel %vm1955_vm2, %v1944_v29, %v1952_v39  ;;  %v2324_v11 = vpop.permute.xlu1 %2323  ;;  %v2012_v45 = vld [vmem:[#allocation5 + $0x5b8] sm:$0xff] }
 0x403   : > { %4186 = vrcp.f32 %v2964_v50  ;;  %v1505_v52 = vsel %vm1502_vm7, %v7586_v59, %v9227_v42  ;;  %v1758_v3 = vmul.f32 %v1726_v58, %v1680_v61  ;;  %v1759_v13 = vmul.f32 %v1727_v24, %v7632_v0  ;;  %v9229_v54 = vld [vmem:[#allocation164_spill] sm:$0xff]  ;;  %v9230_v25 = vld [vmem:[#allocation35_spill] sm:$0xff] }
 0x404   : > { %v1760_v19 = vmul.f32 %v1728_v36, %v1672_v31  ;;  %v1761_v20 = vmul.f32 %v1729_v33, %v1668_v43  ;;  %v2041_v63 = vmul.f32 %v2009_v10, %v1966_v28  ;;  %v1986_v29 = vsel %vm1955_vm2, %v1952_v39, %v9228_v5  ;;  %v2204_v43 = vld [vmem:[#allocation5 + $0x6a8] sm:$0xff]  ;;  %v9231_v4 = vld [vmem:[#allocation119_spill] sm:$0xff]  ;;  %v9234_v42 = vld [vmem:[#allocation160_spill] sm:$0xff] }
 0x405   : > { %v2160_v18 = vsel %vm2149_vm3, %v9229_v54, %v2130_v9  ;;  %v7718_v15 = vadd.f32 %v2455_v47, %v2261_v30  ;;  %v1588_v59 = vmul.f32 %v1556_v21, %v1517_v62  ;;  %v2042_v58 = vmul.f32 %v2010_v16, %v1962_v27  ;;  %v2332_v50 = vpop.permute.xlu0 %2331  ;;  %v2205_v27 = vld [vmem:[#allocation5 + $0x6b0] sm:$0xff]  ;;  %v9236_v5 = vld [vmem:[#allocation60_spill] sm:$0xff] }
 0x406   : > { %v2043_v61 = vmul.f32 %v2011_v37, %v1958_v44  ;;  %v7720_v0 = vadd.f32 %v2456_v55, %v2262_v32  ;;  %v1589_v24 = vmul.f32 %v1557_v57, %v7584_v14  ;;  %v1590_v36 = vmul.f32 %v1558_v51, %v7593_v49  ;;  %v2340_v47 = vpop.permute.xlu1 %2339  ;;  %v9232_v55 = vld [vmem:[#allocation43_spill] sm:$0xff]  ;;  %v2575_v37 = vld [vmem:[#allocation5 + $0x820] sm:$0xff] }
 0x407   : > { %v1591_v31 = vmul.f32 %v1559_v48, %v1505_v52  ;;  %v7725_v39 = vadd.f32 %v1758_v3, %v9230_v25  ;;  %v2044_v33 = vmul.f32 %v2012_v45, %v1986_v29  ;;  %v2235_v60 = vmul.f32 %v2203_v22, %v2160_v18  ;;  %v9233_v49 = vld [vmem:[#allocation63_spill] sm:$0xff]  ;;  %v2397_v3 = vld [vmem:[#allocation5 + $0x7a0] sm:$0xff]  ;;  %v2576_v25 = vld [vmem:[#allocation5 + $0x828] sm:$0xff] }
 0x408   : > { %v2156_v30 = vsel %vm2149_vm3, %v2130_v9, %v2138_v41  ;;  %v7730_v32 = vadd.f32 %v1759_v13, %v9231_v4  ;;  %v7733_v14 = vadd.f32 %v1760_v19, %v9232_v55  ;;  %v7736_v28 = vadd.f32 %v1761_v20, %v9233_v49  ;;  %v2206_v48 = vld [vmem:[#allocation5 + $0x6b8] sm:$0xff]  ;;  %v9235_v13 = vld [vmem:[#allocation185_spill] sm:$0xff]  ;;  %v2399_v55 = vld [vmem:[#allocation5 + $0x7b0] sm:$0xff] }
 0x409   : > { %v4181_v10 = vpop.eup %4180  ;;  %v7738_v21 = vadd.f32 %v2041_v63, %v1588_v59  ;;  %v7740_v62 = vadd.f32 %v2042_v58, %v1589_v24  ;;  %v7742_v16 = vadd.f32 %v2043_v61, %v1590_v36  ;;  %v2152_v9 = vsel %vm2149_vm3, %v2138_v41, %v2146_v34  ;;  %v2514_v20 = vpop.permute.xlu0 %2513  ;;  %v2583_v63 = vld [vmem:[#allocation5 + $0x860] sm:$0xff]  ;;  %v9237_v58 = vld [vmem:[#allocation62_spill] sm:$0xff]  ;;  %v2400_v49 = vld [vmem:[#allocation5 + $0x7b8] sm:$0xff] }
 0x40a   : > { %v4183_v1 = vpop.eup %4182  ;;  %v7747_v44 = vmul.f32 %v4181_v10, %v7542_v40  ;;  %v2236_v51 = vmul.f32 %v2204_v43, %v2156_v30  ;;  %v2180_v52 = vsel %vm2149_vm3, %v2146_v34, %v9234_v42  ;;  %v2354_v19 = vsel %vm2343_vm5, %v9235_v13, %v2324_v11  ;;  %v2516_v34 = vpop.permute.xlu1 %2515  ;;  %v2584_v4 = vld [vmem:[#allocation5 + $0x868] sm:$0xff]  ;;  %v9241_v42 = vld [vmem:[#allocation175_spill] sm:$0xff] }
 0x40b   : > { %v4185_v57 = vpop.eup %4184  ;;  %v7756_v41 = vmul.f32 %v4183_v1, %v7545_v35  ;;  %v7758_v45 = vadd.f32 %v2044_v33, %v1591_v31  ;;  %v7761_v40 = vadd.f32 %v2235_v60, %v7516_v46  ;;  %v2546_v29 = vsel %vm2537_vm9, %v9236_v5, %v2514_v20  ;;  %v2398_v33 = vld [vmem:[#allocation5 + $0x7a8] sm:$0xff]  ;;  %v2578_v5 = vld [vmem:[#allocation5 + $0x838] sm:$0xff] }
 0x40c   : > { %v7767_v22 = vmul.f32 %v4185_v57, %v7549_v17  ;;  %v2237_v18 = vmul.f32 %v2205_v27, %v2152_v9  ;;  %v2607_v59 = vmul.f32 %v2575_v37, %v2546_v29  ;;  %v2547_v35 = vsel %vm2537_vm9, %v9237_v58, %v2516_v34  ;;  %v9240_v37 = vld [vmem:[#allocation149_spill] sm:$0xff] }
 0x40d   : > { %v4187_v54 = vpop.eup %4186  ;;  %v3170_v61 = vadd.f32 %v7756_v41, %v7747_v44  ;;  %v2238_v46 = vmul.f32 %v2206_v48, %v2180_v52  ;;  %v2429_v24 = vmul.f32 %v2397_v3, %v2354_v19  ;;  %v2615_v36 = vmul.f32 %v2583_v63, %v2547_v35  ;;  %v2522_v10 = vpop.permute.xlu0 %2521  ;;  %v2577_v63 = vld [vmem:[#allocation5 + $0x830] sm:$0xff] }
 0x40e   : > { %v7775_v31 = vmul.f32 %v4187_v54, %v7576_v8  ;;  %v7778_v17 = vadd.f32 %v2236_v51, %v7519_v2  ;;  %v2350_v60 = vsel %vm2343_vm5, %v2324_v11, %v2332_v50  ;;  %v2346_v43 = vsel %vm2343_vm5, %v2332_v50, %v2340_v47  ;;  %v9238_v8 = vld [vmem:[#allocation165_spill] sm:$0xff]  ;;  %v9239_v2 = vld [vmem:[#allocation167_spill] sm:$0xff]  ;;  %v2524_v50 = vpop.permute.xlu1 %2523 }
 0x40f   : > { %v2639_v30 = vadd.f32 %v2607_v59, %v7532_v56  ;;  %3171 = vadd.xlane.f32.xlu0 %v3170_v61  ;;  %v2374_v1 = vsel %vm2343_vm5, %v2340_v47, %v9238_v8  ;;  %v2647_v27 = vadd.f32 %v2615_v36, %v9239_v2  ;;  %v2542_v11 = vsel %vm2537_vm9, %v2514_v20, %v2522_v10  ;;  %v9242_v47 = vld [vmem:[#allocation129_spill] sm:$0xff]  ;;  %v2585_v35 = vld [vmem:[#allocation5 + $0x870] sm:$0xff] }
 0x410   : > { %v3044_v9 = vadd.f32 %v7775_v31, %v7767_v22  ;;  %v2269_v56 = vadd.f32 %v2237_v18, %v9240_v37  ;;  %v2608_v51 = vmul.f32 %v2576_v25, %v2542_v11  ;;  %v2543_v48 = vsel %vm2537_vm9, %v2516_v34, %v2524_v50  ;;  %v9243_v54 = vld [vmem:[#allocation45_spill] sm:$0xff]  ;;  %v9244_v18 = vld [vmem:[#allocation52_spill] sm:$0xff]  ;;  %v9245_v34 = vld [vmem:[#allocation163_spill] sm:$0xff] }
 0x411   : > { %v2703_v57 = vadd.f32 %v7671_v26, %v2639_v30  ;;  %v2270_v52 = vadd.f32 %v2238_v46, %v9241_v42  ;;  %v2461_v3 = vadd.f32 %v2429_v24, %v9242_v47  ;;  %v2430_v13 = vmul.f32 %v2398_v33, %v2350_v60  ;;  %v2530_v26 = vpop.permute.xlu0 %2529  ;;  %v9246_v24 = vld [vmem:[#allocation22_spill] sm:$0xff]  ;;  %v2586_v33 = vld [vmem:[#allocation5 + $0x878] sm:$0xff] }
 0x412   : > { %3045 = vadd.xlane.f32.xlu1 %v3044_v9  ;;  %v2616_v19 = vmul.f32 %v2584_v4, %v2543_v48  ;;  %v2431_v29 = vmul.f32 %v2399_v55, %v2346_v43  ;;  %v2432_v20 = vmul.f32 %v2400_v49, %v2374_v1  ;;  %v2640_v58 = vadd.f32 %v2608_v51, %v9244_v18  ;;  %v2532_v60 = vpop.permute.xlu1 %2531  ;;  %v9247_v49 = vld [vmem:[#allocation192_spill] sm:$0xff]  ;;  %v9248_v1 = vld [vmem:[#allocation59_spill] sm:$0xff]  ;;  %v9251_v48 = vld [vmem:[#allocation174_spill] sm:$0xff] }
 0x413   : > { %v2759_v59 = vmul.f32 %v9243_v54, %v2703_v57  ;;  %v2711_v61 = vadd.f32 %v7674_v38, %v2647_v27  ;;  %v2538_v46 = vsel %vm2537_vm9, %v2522_v10, %v2530_v26  ;;  %v2566_v25 = vsel %vm2537_vm9, %v2530_v26, %v9246_v24  ;;  %v9249_v9 = vld [vmem:[#allocation168_spill] sm:$0xff]  ;;  %v9252_v42 = vld [vmem:[#allocation179_spill] sm:$0xff]  ;;  %v9253_v47 = vld [vmem:[#allocation58_spill] sm:$0xff] }
 0x414   : > { %v2648_v36 = vadd.f32 %v2616_v19, %v9245_v34  ;;  %v2704_v43 = vadd.f32 %v7676_v23, %v2640_v58  ;;  %v2609_v30 = vmul.f32 %v2577_v63, %v2538_v46  ;;  %v2610_v4 = vmul.f32 %v2578_v5, %v2566_v25  ;;  %v9250_v23 = vld [vmem:[#allocation26_spill] sm:$0xff]  ;;  %v9254_v18 = vld [vmem:[#allocation68_spill] sm:$0xff] }
 0x415   : > { %v2539_v55 = vsel %vm2537_vm9, %v2524_v50, %v2532_v60  ;;  %v2567_v8 = vsel %vm2537_vm9, %v2532_v60, %v9247_v49  ;;  %v7816_v2 = vadd.f32 %v9248_v1, %v2759_v59  ;;  %v1477_v51 = vpop.permute.xlu0 %1476  ;;  %v2462_v50 = vadd.f32 %v2430_v13, %v9251_v48  ;;  %v1565_v49 = vld [vmem:[#allocation5 + $0x2e8] sm:$0xff] }
 0x416   : > { %v2712_v38 = vadd.f32 %v7678_v53, %v2648_v36  ;;  %v2617_v10 = vmul.f32 %v2585_v35, %v2539_v55  ;;  %v2760_v27 = vmul.f32 %v9243_v54, %v2704_v43  ;;  %v2641_v11 = vadd.f32 %v2609_v30, %v9249_v9  ;;  %v1485_v63 = vpop.permute.xlu1 %1484  ;;  %v9255_v35 = vld [vmem:[#allocation44_spill] sm:$0xff]  ;;  %v9256_v36 = vld [vmem:[#allocation166_spill] sm:$0xff] }
 0x417   : > { %v2642_v37 = vadd.f32 %v2610_v4, %v9250_v23  ;;  %v2618_v57 = vmul.f32 %v2586_v33, %v2567_v8  ;;  %v2463_v53 = vadd.f32 %v2431_v29, %v9252_v42  ;;  %v2847_v5 = vsub.f32 0.0, %v7816_v2  ;;  %v1566_v42 = vld [vmem:[#allocation5 + $0x2f0] sm:$0xff] }
 0x418   : > { %v2649_v19 = vadd.f32 %v2617_v10, %v9253_v47  ;;  %v2464_v59 = vadd.f32 %v2432_v20, %v9254_v18  ;;  %v2705_v58 = vadd.f32 %v7680_v7, %v2641_v11  ;;  %v2767_v46 = vmul.f32 %v9256_v36, %v2711_v61 }
 0x419   : > { %v2706_v26 = vadd.f32 %v7690_v12, %v2642_v37  ;;  %v2650_v34 = vadd.f32 %v2618_v57, %v9255_v35  ;;  %v7832_v13 = vadd.f32 %v9248_v1, %v2760_v27  ;;  %v2883_v29 = vmul.f32 1.442695, %v2847_v5  ;;  %v1493_v60 = vpop.permute.xlu0 %1492  ;;  %v2019_v35 = vld [vmem:[#allocation5 + $0x5f0] sm:$0xff] }
 0x41a   : > { %v2713_v24 = vadd.f32 %v7718_v15, %v2649_v19  ;;  %v2768_v25 = vmul.f32 %v9256_v36, %v2712_v38  ;;  %v2761_v33 = vmul.f32 %v9243_v54, %v2705_v58  ;;  %v7839_v12 = vadd.f32 %v2461_v3, %v7761_v40  ;;  %v1938_v43 = vpop.permute.xlu1 %1937  ;;  %v1564_v38 = vld [vmem:[#allocation5 + $0x2e0] sm:$0xff]  ;;  %v2018_v19 = vld [vmem:[#allocation5 + $0x5e8] sm:$0xff] }
 0x41b   : > { %v2762_v20 = vmul.f32 %v9243_v54, %v2706_v26  ;;  %v2714_v7 = vadd.f32 %v7720_v0, %v2650_v34  ;;  %v7842_v61 = vadd.f32 %v2462_v50, %v7778_v17  ;;  %v7844_v15 = vadd.f32 %v2463_v53, %v2269_v56  ;;  %v9257_v54 = vld [vmem:[#allocation105_spill] sm:$0xff]  ;;  %v2020_v34 = vld [vmem:[#allocation5 + $0x5f8] sm:$0xff] }
 0x41c   : > { %v2848_v30 = vsub.f32 0.0, %v7832_v13  ;;  %v7847_v4 = vadd.f32 %v2464_v59, %v2270_v52  ;;  %v2769_v55 = vmul.f32 %v9256_v36, %v2713_v24  ;;  %v1518_v0 = vsel %vm1502_vm7, %v9257_v54, %v1477_v51  ;;  %v2017_v17 = vld [vmem:[#allocation5 + $0x5e0] sm:$0xff]  ;;  %v9259_v52 = vld [vmem:[#allocation123_spill] sm:$0xff]  ;;  %v9262_v54 = vld [vmem:[#allocation122_spill] sm:$0xff] }
 0x41d   : > { %v1514_v40 = vsel %vm1502_vm7, %v1477_v51, %v1485_v63  ;;  %v9258_v3 = vld [vmem:[#allocation81_spill] sm:$0xff]  ;;  %4188 = vpow2.f32 %v2883_v29  ;;  %v7859_v10 = vadd.f32 %v9259_v52, %v2767_v46  ;;  %v2770_v27 = vmul.f32 %v9256_v36, %v2714_v7  ;;  %v1946_v9 = vpop.permute.xlu0 %1945  ;;  %v9260_v36 = vld [vmem:[#allocation88_spill] sm:$0xff] }
 0x41e   : > { %v1967_v56 = vsel %vm1955_vm2, %v9258_v3, %v1938_v43  ;;  %v2885_v8 = vmul.f32 1.442695, %v2848_v30  ;;  %v7863_v11 = vadd.f32 %v9259_v52, %v2768_v25  ;;  %v7866_v23 = vadd.f32 %v9248_v1, %v2761_v33  ;;  %v1954_v48 = vpop.permute.xlu1 %1953  ;;  %v1567_v33 = vld [vmem:[#allocation5 + $0x2f8] sm:$0xff] }
 0x41f   : > { %v7869_v37 = vadd.f32 %v9248_v1, %v2762_v20  ;;  %v1596_v57 = vmul.f32 %v1564_v38, %v1518_v0  ;;  %v1597_v51 = vmul.f32 %v1565_v49, %v1514_v40  ;;  %v2855_v50 = vsub.f32 0.0, %v7859_v10  ;;  %v9261_v20 = vld [vmem:[#allocation61_spill] sm:$0xff] }
 0x420   : > { %4190 = vpow2.f32 %v2885_v8  ;;  %v1510_v53 = vsel %vm1502_vm7, %v1485_v63, %v1493_v60  ;;  %v2049_v47 = vmul.f32 %v2017_v17, %v1967_v56  ;;  %v1963_v5 = vsel %vm1955_vm2, %v1938_v43, %v1946_v9  ;;  %v2211_v38 = vld [vmem:[#allocation5 + $0x6e0] sm:$0xff]  ;;  %v2212_v49 = vld [vmem:[#allocation5 + $0x6e8] sm:$0xff] }
 0x421   : > { %v2856_v18 = vsub.f32 0.0, %v7863_v11  ;;  %v1959_v1 = vsel %vm1955_vm2, %v1946_v9, %v1954_v48  ;;  %v2899_v59 = vmul.f32 1.442695, %v2855_v50  ;;  %v2849_v58 = vsub.f32 0.0, %v7866_v23  ;;  %v2132_v46 = vpop.permute.xlu0 %2131 }
 0x422   : > { %v7881_v26 = vadd.f32 %v9259_v52, %v2769_v55  ;;  %v1987_v63 = vsel %vm1955_vm2, %v1954_v48, %v9260_v36  ;;  %v2850_v29 = vsub.f32 0.0, %v7869_v37  ;;  %v7888_v25 = vadd.f32 %v9259_v52, %v2770_v27  ;;  %v2140_v55 = vpop.permute.xlu1 %2139  ;;  %v2405_v48 = vld [vmem:[#allocation5 + $0x7e0] sm:$0xff] }
 0x423   : > { %v2901_v24 = vmul.f32 1.442695, %v2856_v18  ;;  %v1506_v7 = vsel %vm1502_vm7, %v1493_v60, %v9261_v20  ;;  %v1598_v43 = vmul.f32 %v1566_v42, %v1510_v53  ;;  %v2050_v30 = vmul.f32 %v2018_v19, %v1963_v5  ;;  %v2213_v5 = vld [vmem:[#allocation5 + $0x6f0] sm:$0xff] }
 0x424   : > { %4192 = vpow2.f32 %v2899_v59  ;;  %v2161_v0 = vsel %vm2149_vm3, %v9262_v54, %v2132_v46  ;;  %v2157_v40 = vsel %vm2149_vm3, %v2132_v46, %v2140_v55  ;;  %v2887_v17 = vmul.f32 1.442695, %v2849_v58  ;;  %v2214_v58 = vld [vmem:[#allocation5 + $0x6f8] sm:$0xff] }
 0x425   : > { %4194 = vpow2.f32 %v2901_v24  ;;  %v2051_v3 = vmul.f32 %v2019_v35, %v1959_v1  ;;  %v2052_v56 = vmul.f32 %v2020_v34, %v1987_v63  ;;  %v2889_v8 = vmul.f32 1.442695, %v2850_v29  ;;  %v2148_v9 = vpop.permute.xlu0 %2147  ;;  %v9263_v35 = vld [vmem:[#allocation92_spill] sm:$0xff] }
 0x426   : > { %v2857_v60 = vsub.f32 0.0, %v7881_v26  ;;  %v1599_v52 = vmul.f32 %v1567_v33, %v1506_v7  ;;  %v7899_v27 = vadd.f32 %v2049_v47, %v1596_v57  ;;  %4196 = vpow2.f32 %v2887_v17  ;;  %v2326_v1 = vpop.permute.xlu1 %2325  ;;  %v9264_v47 = vld [vmem:[#allocation172_spill] sm:$0xff]  ;;  %v2406_v33 = vld [vmem:[#allocation5 + $0x7e8] sm:$0xff] }
 0x427   : > { %v2858_v50 = vsub.f32 0.0, %v7888_v25  ;;  %v4189_v42 = vpop.eup %4188  ;;  %v2243_v53 = vmul.f32 %v2211_v38, %v2161_v0  ;;  %v2244_v19 = vmul.f32 %v2212_v49, %v2157_v40  ;;  %v2153_v18 = vsel %vm2149_vm3, %v2140_v55, %v2148_v9  ;;  %v2408_v55 = vld [vmem:[#allocation5 + $0x7f8] sm:$0xff] }
 0x428   : > { %4198 = vpow2.f32 %v2889_v8  ;;  %v7904_v59 = vadd.f32 %v2050_v30, %v1597_v51  ;;  %v2181_v57 = vsel %vm2149_vm3, %v2148_v9, %v9263_v35  ;;  %v2355_v34 = vsel %vm2343_vm5, %v9264_v47, %v2326_v1  ;;  %v2407_v30 = vld [vmem:[#allocation5 + $0x7f0] sm:$0xff]  ;;  %v9265_v8 = vld [vmem:[#allocation56_spill] sm:$0xff]  ;;  %v9266_v9 = vld [vmem:[#allocation133_spill] sm:$0xff] }
 0x429   : > { %v2943_v36 = vadd.f32 1.0, %v4189_v42  ;;  %v7912_v46 = vadd.f32 %v2051_v3, %v1598_v43  ;;  %v7914_v24 = vadd.f32 %v2052_v56, %v1599_v52  ;;  %v2437_v29 = vmul.f32 %v2405_v48, %v2355_v34  ;;  %v2334_v7 = vpop.permute.xlu0 %2333  ;;  %v9268_v35 = vld [vmem:[#allocation37_spill] sm:$0xff]  ;;  %v9269_v47 = vld [vmem:[#allocation75_spill] sm:$0xff] }
 0x42a   : > { %v4191_v63 = vpop.eup %4190  ;;  %v2903_v20 = vmul.f32 1.442695, %v2857_v60  ;;  %v2245_v51 = vmul.f32 %v2213_v5, %v2153_v18  ;;  %v2905_v54 = vmul.f32 1.442695, %v2858_v50  ;;  %v2275_v0 = vadd.f32 %v2243_v53, %v7725_v39  ;;  %v2342_v17 = vpop.permute.xlu1 %2341 }
 0x42b   : > { %v2944_v38 = vadd.f32 1.0, %v4191_v63  ;;  %4200 = vrcp.f32 %v2943_v36  ;;  %v2276_v49 = vadd.f32 %v2244_v19, %v7730_v32  ;;  %v2246_v40 = vmul.f32 %v2214_v58, %v2181_v57  ;;  %v2591_v32 = vld [vmem:[#allocation5 + $0x8a0] sm:$0xff]  ;;  %v9267_v19 = vld [vmem:[#allocation182_spill] sm:$0xff]  ;;  %v9270_v36 = vld [vmem:[#allocation31_spill] sm:$0xff] }
 0x42c   : > { %v2351_v43 = vsel %vm2343_vm5, %v2326_v1, %v2334_v7  ;;  %v2347_v56 = vsel %vm2343_vm5, %v2334_v7, %v2342_v17  ;;  %v2375_v60 = vsel %vm2343_vm5, %v2342_v17, %v9265_v8  ;;  %v2469_v48 = vadd.f32 %v2437_v29, %v9266_v9  ;;  %v2592_v1 = vld [vmem:[#allocation5 + $0x8a8] sm:$0xff]  ;;  %v2594_v17 = vld [vmem:[#allocation5 + $0x8b8] sm:$0xff] }
 0x42d   : > { %v2438_v3 = vmul.f32 %v2406_v33, %v2351_v43  ;;  %4202 = vrcp.f32 %v2944_v38  ;;  %v2439_v39 = vmul.f32 %v2407_v30, %v2347_v56  ;;  %v2440_v50 = vmul.f32 %v2408_v55, %v2375_v60  ;;  %v2518_v18 = vpop.permute.xlu0 %2517  ;;  %v2593_v43 = vld [vmem:[#allocation5 + $0x8b0] sm:$0xff]  ;;  %v2599_v60 = vld [vmem:[#allocation5 + $0x8e0] sm:$0xff] }
 0x42e   : > { %v4193_v52 = vpop.eup %4192  ;;  %4204 = vpow2.f32 %v2903_v20  ;;  %v2277_v53 = vadd.f32 %v2245_v51, %v7733_v14  ;;  %v2548_v63 = vsel %vm2537_vm9, %v9270_v36, %v2518_v18  ;;  %v2526_v29 = vpop.permute.xlu1 %2525  ;;  %v2278_v7 = vadd.f32 %v2246_v40, %v7736_v28  ;;  %v2601_v36 = vld [vmem:[#allocation5 + $0x8f0] sm:$0xff] }
 0x42f   : > { %v4195_v42 = vpop.eup %4194  ;;  %v2470_v5 = vadd.f32 %v2438_v3, %v9267_v19  ;;  %v2951_v58 = vadd.f32 1.0, %v4193_v52  ;;  %4206 = vpow2.f32 %v2905_v54  ;;  %v2471_v57 = vadd.f32 %v2439_v39, %v9268_v35  ;;  %v9273_v35 = vld [vmem:[#allocation127_spill] sm:$0xff] }
 0x430   : > { %v2472_v34 = vadd.f32 %v2440_v50, %v9269_v47  ;;  %v2952_v33 = vadd.f32 1.0, %v4195_v42  ;;  %v4197_v20 = vpop.eup %4196  ;;  %v2623_v14 = vmul.f32 %v2591_v32, %v2548_v63  ;;  %v2544_v51 = vsel %vm2537_vm9, %v2518_v18, %v2526_v29  ;;  %v9271_v50 = vld [vmem:[#allocation24_spill] sm:$0xff]  ;;  %v2600_v18 = vld [vmem:[#allocation5 + $0x8e8] sm:$0xff] }
 0x431   : > { %4208 = vrcp.f32 %v2951_v58  ;;  %v2695_v55 = vadd.f32 %v2469_v48, %v2275_v0  ;;  %v2696_v38 = vadd.f32 %v2470_v5, %v2276_v49  ;;  %v2624_v54 = vmul.f32 %v2592_v1, %v2544_v51  ;;  %v2534_v8 = vpop.permute.xlu0 %2533 }
 0x432   : > { %v4199_v30 = vpop.eup %4198  ;;  %4210 = vrcp.f32 %v2952_v33  ;;  %v2697_v3 = vadd.f32 %v2471_v57, %v2277_v53  ;;  %v2655_v56 = vadd.f32 %v2623_v14, %v7738_v21  ;;  %v2945_v52 = vadd.f32 1.0, %v4197_v20  ;;  %v2520_v49 = vpop.permute.xlu1 %2519  ;;  %v9272_v53 = vld [vmem:[#allocation21_spill] sm:$0xff]  ;;  %v2602_v33 = vld [vmem:[#allocation5 + $0x8f8] sm:$0xff] }
 0x433   : > { %v2946_v9 = vadd.f32 1.0, %v4199_v30  ;;  %v2698_v28 = vadd.f32 %v2472_v34, %v2278_v7  ;;  %v2656_v40 = vadd.f32 %v2624_v54, %v7740_v62  ;;  %v2540_v39 = vsel %vm2537_vm9, %v2526_v29, %v2534_v8 }
 0x434   : > { %v2568_v0 = vsel %vm2537_vm9, %v2534_v8, %v9271_v50  ;;  %v2719_v32 = vadd.f32 %v7839_v12, %v2655_v56  ;;  %v2625_v42 = vmul.f32 %v2593_v43, %v2540_v39  ;;  %v2549_v19 = vsel %vm2537_vm9, %v9272_v53, %v2520_v49  ;;  %v9274_v43 = vld [vmem:[#allocation131_spill] sm:$0xff] }
 0x435   : > { %v4201_v48 = vpop.eup %4200  ;;  %v2626_v21 = vmul.f32 %v2594_v17, %v2568_v0  ;;  %v2720_v5 = vadd.f32 %v7842_v61, %v2656_v40  ;;  %v2631_v62 = vmul.f32 %v2599_v60, %v2549_v19  ;;  %4212 = vrcp.f32 %v2945_v52  ;;  %v2528_v34 = vpop.permute.xlu0 %2527 }
 0x436   : > { %v7949_v1 = vmul.f32 %v4201_v48, %v7816_v2  ;;  %v2775_v57 = vmul.f32 %v9273_v35, %v2719_v32  ;;  %v2657_v47 = vadd.f32 %v2625_v42, %v7742_v16  ;;  %4214 = vrcp.f32 %v2946_v9  ;;  %v2536_v20 = vpop.permute.xlu1 %2535  ;;  %v9275_v9 = vld [vmem:[#allocation191_spill] sm:$0xff] }
 0x437   : > { %v4203_v58 = vpop.eup %4202  ;;  %v2658_v12 = vadd.f32 %v2626_v21, %v7758_v45  ;;  %v2776_v29 = vmul.f32 %v9273_v35, %v2720_v5  ;;  %v2663_v61 = vadd.f32 %v2631_v62, %v7899_v27  ;;  %v2545_v2 = vsel %vm2537_vm9, %v2520_v49, %v2528_v34 }
 0x438   : > { %v4205_v63 = vpop.eup %4204  ;;  %v7959_v7 = vmul.f32 %v4203_v58, %v7832_v13  ;;  %v2721_v16 = vadd.f32 %v7844_v15, %v2657_v47  ;;  %v2632_v51 = vmul.f32 %v2600_v18, %v2545_v2  ;;  %v2541_v30 = vsel %vm2537_vm9, %v2528_v34, %v2536_v20  ;;  %v9277_v58 = vld [vmem:[#allocation33_spill] sm:$0xff] }
 0x439   : > { %v4207_v14 = vpop.eup %4206  ;;  %v2722_v45 = vadd.f32 %v7847_v4, %v2658_v12  ;;  %v2727_v54 = vadd.f32 %v2695_v55, %v2663_v61  ;;  %v2569_v27 = vsel %vm2537_vm9, %v2536_v20, %v9274_v43  ;;  %v2633_v17 = vmul.f32 %v2601_v36, %v2541_v30 }
 0x43a   : > { %v3273_v56 = vadd.f32 %v7959_v7, %v7949_v1  ;;  %v2777_v8 = vmul.f32 %v9273_v35, %v2721_v16  ;;  %v2664_v4 = vadd.f32 %v2632_v51, %v7904_v59  ;;  %v2634_v60 = vmul.f32 %v2602_v33, %v2569_v27  ;;  %v9276_v59 = vld [vmem:[#allocation140_spill] sm:$0xff] }
 0x43b   : > { %v4209_v13 = vpop.eup %4208  ;;  %v2778_v15 = vmul.f32 %v9273_v35, %v2722_v45  ;;  %v2783_v40 = vmul.f32 %v9275_v9, %v2727_v54  ;;  %v2665_v55 = vadd.f32 %v2633_v17, %v7912_v46  ;;  %v2953_v39 = vadd.f32 1.0, %v4205_v63 }
 0x43c   : > { %v4211_v52 = vpop.eup %4210  ;;  %3274 = vadd.xlane.f32.xlu1 %v3273_v56  ;;  %v7976_v6 = vmul.f32 %v4209_v13, %v7859_v10  ;;  %v2728_v50 = vadd.f32 %v2696_v38, %v2664_v4  ;;  %v2666_v0 = vadd.f32 %v2634_v60, %v7914_v24  ;;  %v2954_v48 = vadd.f32 1.0, %v4207_v14 }
 0x43d   : > { %v7980_v49 = vmul.f32 %v4211_v52, %v7863_v11  ;;  %v2729_v32 = vadd.f32 %v2697_v3, %v2665_v55  ;;  %4216 = vrcp.f32 %v2953_v39  ;;  %v7983_v42 = vadd.f32 %v9276_v59, %v2775_v57 }
 0x43e   : > { %v7986_v21 = vadd.f32 %v9276_v59, %v2776_v29  ;;  %v2784_v46 = vmul.f32 %v9275_v9, %v2728_v50  ;;  %v2730_v10 = vadd.f32 %v2698_v28, %v2666_v0  ;;  %4218 = vrcp.f32 %v2954_v48 }
 0x43f   : > { %v3276_v38 = vadd.f32 %v7980_v49, %v7976_v6  ;;  %v4213_v24 = vpop.eup %4212  ;;  %v2785_v11 = vmul.f32 %v9275_v9, %v2729_v32  ;;  %v2863_v53 = vsub.f32 0.0, %v7983_v42  ;;  %v7995_v19 = vadd.f32 %v9276_v59, %v2777_v8 }
 0x440   : > { %v2864_v3 = vsub.f32 0.0, %v7986_v21  ;;  %v4215_v5 = vpop.eup %4214  ;;  %v2786_v62 = vmul.f32 %v9275_v9, %v2730_v10  ;;  %v7999_v28 = vmul.f32 %v4213_v24, %v7866_v23  ;;  %v8002_v18 = vadd.f32 %v9276_v59, %v2778_v15 }
 0x441   : > { %3277 = vadd.xlane.f32.xlu0 %v3276_v38  ;;  %v8005_v35 = vadd.f32 %v9277_v58, %v2783_v40  ;;  %v8008_v57 = vmul.f32 %v4215_v5, %v7869_v37  ;;  %v2915_v47 = vmul.f32 1.442695, %v2863_v53  ;;  %v2865_v34 = vsub.f32 0.0, %v7995_v19 }
 0x442   : > { %v2917_v12 = vmul.f32 1.442695, %v2864_v3  ;;  %v2866_v36 = vsub.f32 0.0, %v8002_v18  ;;  %v8013_v63 = vadd.f32 %v9277_v58, %v2785_v11  ;;  %v8016_v23 = vadd.f32 %v9277_v58, %v2786_v62 }
 0x443   : > { %v8019_v29 = vadd.f32 %v9277_v58, %v2784_v46  ;;  %v3385_v61 = vadd.f32 %v8008_v57, %v7999_v28  ;;  %4220 = vpow2.f32 %v2915_v47  ;;  %v2919_v37 = vmul.f32 1.442695, %v2865_v34 }
 0x444   : > { %v2871_v2 = vsub.f32 0.0, %v8005_v35  ;;  %4222 = vpow2.f32 %v2917_v12  ;;  %v2921_v33 = vmul.f32 1.442695, %v2866_v36  ;;  %v2873_v20 = vsub.f32 0.0, %v8013_v63 }
 0x445   : > { %v2874_v14 = vsub.f32 0.0, %v8016_v23  ;;  %3386 = vadd.xlane.f32.xlu1 %v3385_v61  ;;  %4224 = vpow2.f32 %v2919_v37  ;;  %v2872_v16 = vsub.f32 0.0, %v8019_v29 }
 0x446   : > { %v2931_v45 = vmul.f32 1.442695, %v2871_v2  ;;  %4226 = vpow2.f32 %v2921_v33  ;;  %v2935_v51 = vmul.f32 1.442695, %v2873_v20 }
 0x447   : > { %v2937_v30 = vmul.f32 1.442695, %v2874_v14  ;;  %v4217_v54 = vpop.eup %4216  ;;  %v2933_v43 = vmul.f32 1.442695, %v2872_v16 }
 0x448   : > { %4228 = vpow2.f32 %v2931_v45  ;;  %v4219_v27 = vpop.eup %4218  ;;  %v8028_v17 = vmul.f32 %v4217_v54, %v7881_v26  ;;  %v8076_v54 = vld [vmem:[%s9278_s24] sm:$0xff] }
 0x449   : > { %4230 = vpow2.f32 %v2935_v51  ;;  %v8031_v56 = vmul.f32 %v4219_v27, %v7888_v25  ;;  %v8081_v27 = vld [vmem:[%s9278_s24 + $0x10] sm:$0xff] }
 0x44a   : > { %4232 = vpow2.f32 %v2937_v30 }
 0x44b   : > { %4234 = vpow2.f32 %v2933_v43  ;;  %v3388_v13 = vadd.f32 %v8031_v56, %v8028_v17 }
 0x44d   : > { %v4221_v8 = vpop.eup %4220  ;;  %3389 = vadd.xlane.f32.xlu0 %v3388_v13 }
 0x44e   : > { %v4223_v15 = vpop.eup %4222  ;;  %v2959_v4 = vadd.f32 1.0, %v4221_v8 }
 0x44f   : > { %v4225_v60 = vpop.eup %4224  ;;  %v2960_v52 = vadd.f32 1.0, %v4223_v15 }
 0x450   : > { %v4227_v9 = vpop.eup %4226  ;;  %4236 = vrcp.f32 %v2959_v4  ;;  %v2961_v40 = vadd.f32 1.0, %v4225_v60 }
 0x451   : > { %4238 = vrcp.f32 %v2960_v52  ;;  %v2962_v55 = vadd.f32 1.0, %v4227_v9 }
 0x452   : > { %v4229_v26 = vpop.eup %4228  ;;  %4240 = vrcp.f32 %v2961_v40  ;;  %v8092_v40 = vld [vmem:[%s9278_s24 + $0x18] sm:$0xff] }
 0x453   : > { %v4231_v39 = vpop.eup %4230  ;;  %v2967_v25 = vadd.f32 1.0, %v4229_v26  ;;  %4242 = vrcp.f32 %v2962_v55 }
 0x454   : > { %v4233_v50 = vpop.eup %4232  ;;  %v2969_v0 = vadd.f32 1.0, %v4231_v39 }
 0x455   : > { %v4235_v48 = vpop.eup %4234  ;;  %v2970_v32 = vadd.f32 1.0, %v4233_v50  ;;  %4244 = vrcp.f32 %v2967_v25 }
 0x456   : > { %4246 = vrcp.f32 %v2969_v0  ;;  %v2968_v59 = vadd.f32 1.0, %v4235_v48 }
 0x457   : > { %4248 = vrcp.f32 %v2970_v32 }
 0x458   : > { %4250 = vrcp.f32 %v2968_v59 }
 0x45a   : > { %v4237_v46 = vpop.eup %4236 }
 0x45b   : > { %v4239_v10 = vpop.eup %4238  ;;  %v8036_v38 = vmul.f32 %v4237_v46, %v7983_v42 }
 0x45c   : > { %v4241_v24 = vpop.eup %4240  ;;  %v8039_v11 = vmul.f32 %v4239_v10, %v7986_v21 }
 0x45d   : > { %v4243_v53 = vpop.eup %4242  ;;  %v8042_v3 = vmul.f32 %v4241_v24, %v7995_v19 }
 0x45e   : > { %v3279_v62 = vadd.f32 %v8039_v11, %v8036_v38  ;;  %v8047_v58 = vmul.f32 %v4243_v53, %v8002_v18 }
 0x45f   : > { %v4245_v5 = vpop.eup %4244 }
 0x460   : > { %v4247_v47 = vpop.eup %4246  ;;  %3280 = vadd.xlane.f32.xlu1 %v3279_v62  ;;  %v3391_v42 = vadd.f32 %v8047_v58, %v8042_v3  ;;  %v8058_v36 = vmul.f32 %v4245_v5, %v8005_v35 }
 0x461   : > { %v4249_v12 = vpop.eup %4248  ;;  %v8052_v21 = vmul.f32 %v4247_v47, %v8013_v63 }
 0x462   : > { %v4251_v34 = vpop.eup %4250  ;;  %v8055_v19 = vmul.f32 %v4249_v12, %v8016_v23  ;;  %3392 = vadd.xlane.f32.xlu0 %v3391_v42  ;;  %v3037_v63 = vpop.xlane.xlu0 %3036 }
 0x463   : > { %v8061_v18 = vmul.f32 %v4251_v34, %v8019_v29  ;;  %v8070_v29 = vld [vmem:[%s9278_s24 + $0x8] sm:$0xff]  ;;  %v3047_v43 = vmul.f32 0.00390625, %v3037_v63 }
 0x464   : > { %v3394_v61 = vadd.f32 %v8055_v19, %v8052_v21 }
 0x465   : > { %v3282_v37 = vadd.f32 %v8061_v18, %v8058_v36  ;;  %v3055_v52 = vmul.f32 %v8076_v54, %v3047_v43 }
 0x466   : > { %3395 = vadd.xlane.f32.xlu0 %v3394_v61  ;;  %v3163_v2 = vpop.xlane.xlu0 %3162 }
 0x467   : > { %3283 = vadd.xlane.f32.xlu1 %v3282_v37  ;;  %v3173_v16 = vmul.f32 0.00390625, %v3163_v2  ;;  %v3060_v59 = vsel %vm3059_vm10, %v3055_v52, 0.0 }
 0x468   : > { %v3040_v23 = vpop.xlane.xlu1 %3039 }
 0x469   : > { %v3048_v51 = vmul.f32 0.00390625, %v3040_v23  ;;  %v3177_v8 = vmul.f32 %v3173_v16, %v8076_v54  ;;  %v8103_v16 = vld [vmem:[#allocation7] sm:$0x1] }
 0x46a   : > { %v3166_v33 = vpop.xlane.xlu0 %3165 }
 0x46b   : > { %v3174_v14 = vmul.f32 0.00390625, %v3166_v33  ;;  %v3056_v4 = vmul.f32 %v8070_v29, %v3048_v51  ;;  %v3181_v55 = vsel %vm3059_vm10, %v3177_v8, 0.0 }
 0x46d   : > { %v3043_v35 = vpop.xlane.xlu1 %3042  ;;  %v3178_v30 = vmul.f32 %v3174_v14, %v8070_v29  ;;  %v3061_v50 = vsel %vm3059_vm10, %v3056_v4, 0.0 }
 0x46e   : > { %v3049_v13 = vmul.f32 0.00390625, %v3043_v35  ;;  %v3062_v53 = vadd.f32 %v3061_v50, %v3060_v59  ;;  %v8118_v59 = vld [vmem:[%s9280_s22] sm:$0xff] }
 0x46f   : > { %v3169_v20 = vpop.xlane.xlu0 %3168  ;;  %v3182_v60 = vsel %vm3059_vm10, %v3178_v30, 0.0 }
 0x470   : > { %v3175_v45 = vmul.f32 0.00390625, %v3169_v20  ;;  %v3057_v9 = vmul.f32 %v8081_v27, %v3049_v13  ;;  %v3183_v0 = vadd.f32 %v3182_v60, %v3181_v55 }
 0x472   : > { %v3179_v15 = vmul.f32 %v3175_v45, %v8081_v27  ;;  %v3063_v46 = vsel %vm3059_vm10, %v3057_v9, 0.0 }
 0x473   : > { %v3064_v12 = vadd.f32 %v3063_v46, %v3062_v53  ;;  %v8129_v53 = vld [vmem:[%s9280_s22 + $0x10] sm:$0xff] }
 0x474   : > { %v3184_v39 = vsel %vm3059_vm10, %v3179_v15, 0.0 }
 0x475   : > { %v3185_v10 = vadd.f32 %v3184_v39, %v3183_v0  ;;  %v9279_v39 = vlaneseq }
 0x49c   : > { %v3172_v26 = vpop.xlane.xlu0 %3171 }
 0x49d   : > { %v3176_v25 = vmul.f32 0.00390625, %v3172_v26 }
 0x49f   : > { %v3180_v48 = vmul.f32 %v3176_v25, %v8092_v40  ;;  %v3046_v32 = vpop.xlane.xlu1 %3045  ;;  %v3086_v25 = vshrl.u32 %v9279_v39, 7 }
 0x4a0   : > { %v3050_v24 = vmul.f32 0.00390625, %v3046_v32  ;;  %v8113_v32 = vld [vmem:[%s9280_s22 + $0x8] sm:$0xff] }
 0x4a1   : > { %v3186_v5 = vsel %vm3059_vm10, %v3180_v48, 0.0  ;;  %v8108_v50 = vsub.s32 0, %v3086_v25 }
 0x4a2   : > { %v3187_v62 = vadd.f32 %v3186_v5, %v3185_v10  ;;  %v3058_v47 = vmul.f32 %v8092_v40, %v3050_v24  ;;  %v8124_v24 = vld [vmem:[%s9280_s22 + $0x18] sm:$0xff] }
 0x4a4   : > { %v3188_v42 = vrot.slane %v3187_v62, 4  ;;  %v3065_v34 = vsel %vm3059_vm10, %v3058_v47, 0.0 }
 0x4a5   : > { %v3066_v61 = vadd.f32 %v3065_v34, %v3064_v12 }
 0x4a6   : > { %v3189_v37 = vadd.f32 %v3188_v42, %v3187_v62 }
 0x4a7   : > { %v3067_v63 = vrot.slane %v3066_v61, 4 }
 0x4a8   : > { %v3190_v2 = vrot.slane %v3189_v37, 2 }
 0x4a9   : > { %v3068_v33 = vadd.f32 %v3067_v63, %v3066_v61 }
 0x4aa   : > { %v3191_v23 = vadd.f32 %v3190_v2, %v3189_v37 }
 0x4ab   : > { %v3069_v20 = vrot.slane %v3068_v33, 2 }
 0x4ac   : > { %v3192_v14 = vrot.slane %v3191_v23, 1 }
 0x4ad   : > { %v3070_v35 = vadd.f32 %v3069_v20, %v3068_v33 }
 0x4ae   : > { %v3193_v45 = vadd.f32 %v3192_v14, %v3191_v23 }
 0x4af   : > { %v3071_v51 = vrot.slane %v3070_v35, 1 }
 0x4b0   : > { %v3194_v30 = vadd.f32 %v3193_v45, %v8103_v16 }
 0x4b1   : > { %v3072_v43 = vadd.f32 %v3071_v51, %v3070_v35 }
 0x4b2   : > { %v3195_v13 = vsub.f32 0.0, %v3194_v30 }
 0x4b3   : > { %v3074_v8 = vadd.f32 %v8103_v16, %v3072_v43 }
 0x4b4   : > { %v3196_v15 = vmul.f32 1.442695, %v3195_v13 }
 0x4b5   : > { %v3075_v4 = vsub.f32 0.0, %v3074_v8 }
 0x4b6   : > { %4252 = vpow2.f32 %v3196_v15 }
 0x4b7   : > { %v3076_v60 = vmul.f32 1.442695, %v3075_v4 }
 0x4b9   : > { %4254 = vpow2.f32 %v3076_v60 }
 0x4c0   : > { %v4253_v52 = vpop.eup %4252 }
 0x4c1   : > { %v3198_v9 = vadd.f32 1.0, %v4253_v52 }
 0x4c3   : > { %v4255_v26 = vpop.eup %4254  ;;  %4256 = vrcp.f32 %v3198_v9 }
 0x4c4   : > { %v3078_v55 = vadd.f32 1.0, %v4255_v26 }
 0x4c6   : > { %4258 = vrcp.f32 %v3078_v55 }
 0x4c9   : > { %v3275_v13 = vpop.xlane.xlu1 %3274 }
 0x4ca   : > { %v3285_v4 = vmul.f32 0.00390625, %v3275_v13 }
 0x4cc   : > { %v3289_v26 = vmul.f32 %v3285_v4, %v8076_v54 }
 0x4cd   : > { %v4257_v0 = vpop.eup %4256 }
 0x4ce   : > { %v3200_v48 = vmul.f32 %v4257_v0, %v3194_v30  ;;  %v3278_v43 = vpop.xlane.xlu0 %3277 }
 0x4cf   : > { %v3286_v60 = vmul.f32 0.00390625, %v3278_v43 }
 0x4d0   : > { %v4259_v46 = vpop.eup %4258  ;;  %v3204_v10 = vrot.slane %v3200_v48, %v8108_v50 }
 0x4d1   : > { %v3080_v5 = vmul.f32 %v4259_v46, %v3074_v8  ;;  %v3290_v39 = vmul.f32 %v3286_v60, %v8070_v29 }
 0x4d2   : > { %v3206_v62 = vmul.f32 %v3204_v10, %v8113_v32  ;;  %v3205_v47 = vmul.f32 %v3204_v10, %v8118_v59  ;;  %v3208_v12 = vmul.f32 %v3204_v10, %v8124_v24  ;;  %v3207_v61 = vmul.f32 %v3204_v10, %v8129_v53  ;;  %v3387_v15 = vpop.xlane.xlu1 %3386 }
 0x4d3   : > { %v3088_v37 = vrot.slane %v3080_v5, %v8108_v50  ;;  %v3397_v9 = vmul.f32 0.00390625, %v3387_v15 }
 0x4d4   : > { %v3212_v42 = vsel %vm3059_vm10, %v3206_v62, 0.0  ;;  %v3209_v34 = vsel %vm3059_vm10, %v3205_v47, 0.0  ;;  %v3218_v63 = vsel %vm3059_vm10, %v3208_v12, 0.0  ;;  %v3215_v2 = vsel %vm3059_vm10, %v3207_v61, 0.0 }
 0x4d5   : > { %3213 = vadd.xlane.f32.xlu0 %v3212_v42  ;;  %3210 = vadd.xlane.f32.xlu1 %v3209_v34  ;;  %v3090_v33 = vmul.f32 %v3088_v37, %v8113_v32  ;;  %v3089_v23 = vmul.f32 %v3088_v37, %v8118_v59  ;;  %v3092_v35 = vmul.f32 %v3088_v37, %v8124_v24  ;;  %v3293_v62 = vsel %vm3059_vm10, %v3289_v26, 0.0 }
 0x4d6   : > { %v3091_v45 = vmul.f32 %v3088_v37, %v8129_v53  ;;  %v3401_v0 = vmul.f32 %v3397_v9, %v8076_v54  ;;  %v3294_v47 = vsel %vm3059_vm10, %v3290_v39, 0.0 }
 0x4d7   : > { %v3096_v20 = vsel %vm3059_vm10, %v3090_v33, 0.0  ;;  %v3093_v14 = vsel %vm3059_vm10, %v3089_v23, 0.0  ;;  %v3102_v51 = vsel %vm3059_vm10, %v3092_v35, 0.0  ;;  %v3295_v33 = vadd.f32 %v3294_v47, %v3293_v62 }
 0x4d8   : > { %v3099_v30 = vsel %vm3059_vm10, %v3091_v45, 0.0  ;;  %v3405_v42 = vsel %vm3059_vm10, %v3401_v0, 0.0 }
 0x4d9   : > { %3219 = vadd.xlane.f32.xlu0 %v3218_v63  ;;  %3216 = vadd.xlane.f32.xlu1 %v3215_v2 }
 0x4da   : > { %v3390_v8 = vpop.xlane.xlu0 %3389 }
 0x4db   : > { %v3398_v52 = vmul.f32 0.00390625, %v3390_v8 }
 0x4dd   : > { %3097 = vadd.xlane.f32.xlu0 %v3096_v20  ;;  %3094 = vadd.xlane.f32.xlu1 %v3093_v14  ;;  %v3402_v25 = vmul.f32 %v3398_v52, %v8070_v29 }
 0x4df   : > { %v3406_v12 = vsel %vm3059_vm10, %v3402_v25, 0.0 }
 0x4e0   : > { %v3407_v23 = vadd.f32 %v3406_v12, %v3405_v42 }
 0x4e1   : > { %3103 = vadd.xlane.f32.xlu0 %v3102_v51  ;;  %3100 = vadd.xlane.f32.xlu1 %v3099_v30 }
 0x4ed   : > { %v3281_v55 = vpop.xlane.xlu1 %3280 }
 0x4ee   : > { %v3287_v48 = vmul.f32 0.00390625, %v3281_v55 }
 0x4ef   : > { %v3393_v46 = vpop.xlane.xlu0 %3392 }
 0x4f0   : > { %v3291_v10 = vmul.f32 %v3287_v48, %v8081_v27  ;;  %v3399_v5 = vmul.f32 0.00390625, %v3393_v46 }
 0x4f2   : > { %v3403_v34 = vmul.f32 %v3399_v5, %v8081_v27  ;;  %v3296_v29 = vsel %vm3059_vm10, %v3291_v10, 0.0 }
 0x4f3   : > { %v3396_v61 = vpop.xlane.xlu0 %3395  ;;  %v3297_v35 = vadd.f32 %v3296_v29, %v3295_v33 }
 0x4f4   : > { %v3284_v37 = vpop.xlane.xlu1 %3283  ;;  %v3408_v54 = vsel %vm3059_vm10, %v3403_v34, 0.0  ;;  %v3400_v63 = vmul.f32 0.00390625, %v3396_v61 }
 0x4f5   : > { %v3288_v2 = vmul.f32 0.00390625, %v3284_v37  ;;  %v3409_v45 = vadd.f32 %v3408_v54, %v3407_v23 }
 0x4f6   : > { %v3404_v20 = vmul.f32 %v3400_v63, %v8092_v40 }
 0x4f7   : > { %v3292_v14 = vmul.f32 %v3288_v2, %v8092_v40 }
 0x4f8   : > { %v3410_v51 = vsel %vm3059_vm10, %v3404_v20, 0.0 }
 0x4f9   : > { %v3298_v27 = vsel %vm3059_vm10, %v3292_v14, 0.0  ;;  %v3411_v30 = vadd.f32 %v3410_v51, %v3409_v45 }
 0x4fa   : > { %v3299_v43 = vadd.f32 %v3298_v27, %v3297_v35 }
 0x4fb   : > { %v3412_v13 = vrot.slane %v3411_v30, 4 }
 0x4fc   : > { %v3300_v8 = vrot.slane %v3299_v43, 4 }
 0x4fd   : > { %v3413_v15 = vadd.f32 %v3412_v13, %v3411_v30 }
 0x4fe   : > { %v3301_v4 = vadd.f32 %v3300_v8, %v3299_v43 }
 0x4ff   : > { %v3414_v60 = vrot.slane %v3413_v15, 2 }
 0x500   : > { %v3302_v52 = vrot.slane %v3301_v4, 2 }
 0x501   : > { %v3415_v9 = vadd.f32 %v3414_v60, %v3413_v15  ;;  %v8187_v15 = vld [vmem:[%s9281_s20 + $0x8] sm:$0xff] }
 0x502   : > { %v3303_v26 = vadd.f32 %v3302_v52, %v3301_v4  ;;  %v8192_v4 = vld [vmem:[%s9281_s20] sm:$0xff] }
 0x503   : > { %v3416_v55 = vrot.slane %v3415_v9, 1 }
 0x504   : > { %v3304_v39 = vrot.slane %v3303_v26, 1 }
 0x505   : > { %v3417_v25 = vadd.f32 %v3416_v55, %v3415_v9  ;;  %v8199_v9 = vld [vmem:[%s9281_s20 + $0x18] sm:$0xff] }
 0x506   : > { %v3305_v40 = vadd.f32 %v3304_v39, %v3303_v26  ;;  %v8204_v26 = vld [vmem:[%s9281_s20 + $0x10] sm:$0xff] }
 0x507   : > { %v3418_v0 = vadd.f32 %v3417_v25, %v8103_v16 }
 0x508   : > { %v3306_v48 = vadd.f32 %v3305_v40, %v8103_v16 }
 0x509   : > { %v3419_v46 = vsub.f32 0.0, %v3418_v0 }
 0x50a   : > { %v3307_v10 = vsub.f32 0.0, %v3306_v48 }
 0x50b   : > { %v3420_v5 = vmul.f32 1.442695, %v3419_v46 }
 0x50c   : > { %v3308_v62 = vmul.f32 1.442695, %v3307_v10 }
 0x50d   : > { %4260 = vpow2.f32 %v3420_v5 }
 0x50e   : > { %4262 = vpow2.f32 %v3308_v62 }
 0x517   : > { %v4261_v47 = vpop.eup %4260 }
 0x518   : > { %v4263_v12 = vpop.eup %4262  ;;  %v3422_v42 = vadd.f32 1.0, %v4261_v47 }
 0x519   : > { %v3310_v34 = vadd.f32 1.0, %v4263_v12 }
 0x51a   : > { %4264 = vrcp.f32 %v3422_v42 }
 0x51b   : > { %4266 = vrcp.f32 %v3310_v34 }
 0x524   : > { %v4265_v61 = vpop.eup %4264 }
 0x525   : > { %v4267_v37 = vpop.eup %4266  ;;  %v3424_v29 = vmul.f32 %v4265_v61, %v3418_v0 }
 0x526   : > { %v3312_v54 = vmul.f32 %v4267_v37, %v3306_v48 }
 0x527   : > { %v3428_v16 = vrot.slane %v3424_v29, %v8108_v50 }
 0x528   : > { %v3316_v63 = vrot.slane %v3312_v54, %v8108_v50 }
 0x529   : > { %v3430_v14 = vmul.f32 %v3428_v16, %v8113_v32  ;;  %v3429_v35 = vmul.f32 %v3428_v16, %v8118_v59 }
 0x52a   : > { %v3318_v2 = vmul.f32 %v3316_v63, %v8113_v32  ;;  %v3317_v33 = vmul.f32 %v3316_v63, %v8118_v59  ;;  %v3320_v50 = vmul.f32 %v3316_v63, %v8124_v24  ;;  %v3319_v27 = vmul.f32 %v3316_v63, %v8129_v53 }
 0x52b   : > { %v3436_v45 = vsel %vm3059_vm10, %v3430_v14, 0.0  ;;  %v3433_v51 = vsel %vm3059_vm10, %v3429_v35, 0.0  ;;  %v3432_v32 = vmul.f32 %v3428_v16, %v8124_v24  ;;  %v3431_v59 = vmul.f32 %v3428_v16, %v8129_v53 }
 0x52c   : > { %v3324_v23 = vsel %vm3059_vm10, %v3318_v2, 0.0  ;;  %v3321_v20 = vsel %vm3059_vm10, %v3317_v33, 0.0  ;;  %v3330_v30 = vsel %vm3059_vm10, %v3320_v50, 0.0  ;;  %v3327_v43 = vsel %vm3059_vm10, %v3319_v27, 0.0 }
 0x52d   : > { %3325 = vadd.xlane.f32.xlu0 %v3324_v23  ;;  %3322 = vadd.xlane.f32.xlu1 %v3321_v20  ;;  %v3442_v13 = vsel %vm3059_vm10, %v3432_v32, 0.0  ;;  %v3439_v8 = vsel %vm3059_vm10, %v3431_v59, 0.0 }
 0x531   : > { %3437 = vadd.xlane.f32.xlu0 %v3436_v45  ;;  %3434 = vadd.xlane.f32.xlu1 %v3433_v51 }
 0x535   : > { %3331 = vadd.xlane.f32.xlu0 %v3330_v30  ;;  %3328 = vadd.xlane.f32.xlu1 %v3327_v43 }
 0x539   : > { %3443 = vadd.xlane.f32.xlu0 %v3442_v13  ;;  %3440 = vadd.xlane.f32.xlu1 %v3439_v8 }
 0x562   : > { %v3214_v24 = vpop.xlane.xlu0 %3213  ;;  %v3211_v53 = vpop.xlane.xlu1 %3210 }
 0x563   : > { %v3222_v60 = vadd.f32 %v3214_v24, %v8187_v15  ;;  %v3221_v52 = vadd.f32 %v3211_v53, %v8192_v4 }
 0x565   : > { %v3226_v55 = vsub.f32 0.0, %v3222_v60  ;;  %v3225_v39 = vsub.f32 0.0, %v3221_v52 }
 0x566   : > { %v3220_v25 = vpop.xlane.xlu0 %3219  ;;  %v3217_v40 = vpop.xlane.xlu1 %3216 }
 0x567   : > { %v3231_v0 = vmul.f32 1.442695, %v3226_v55  ;;  %v3229_v48 = vmul.f32 1.442695, %v3225_v39  ;;  %v3224_v46 = vadd.f32 %v3220_v25, %v8199_v9  ;;  %v3223_v10 = vadd.f32 %v3217_v40, %v8204_v26 }
 0x569   : > { %4268 = vpow2.f32 %v3231_v0  ;;  %v3228_v5 = vsub.f32 0.0, %v3224_v46  ;;  %v3227_v62 = vsub.f32 0.0, %v3223_v10 }
 0x56a   : > { %4270 = vpow2.f32 %v3229_v48  ;;  %v3098_v47 = vpop.xlane.xlu0 %3097  ;;  %v3095_v12 = vpop.xlane.xlu1 %3094 }
 0x56b   : > { %v3235_v42 = vmul.f32 1.442695, %v3228_v5  ;;  %v3233_v34 = vmul.f32 1.442695, %v3227_v62  ;;  %v3110_v61 = vadd.f32 %v8187_v15, %v3098_v47  ;;  %v3109_v37 = vadd.f32 %v8192_v4, %v3095_v12 }
 0x56d   : > { %4272 = vpow2.f32 %v3235_v42  ;;  %v3114_v29 = vsub.f32 0.0, %v3110_v61  ;;  %v3113_v54 = vsub.f32 0.0, %v3109_v37 }
 0x56e   : > { %4274 = vpow2.f32 %v3233_v34  ;;  %v3104_v63 = vpop.xlane.xlu0 %3103  ;;  %v3101_v16 = vpop.xlane.xlu1 %3100 }
 0x56f   : > { %v3119_v2 = vmul.f32 1.442695, %v3114_v29  ;;  %v3117_v33 = vmul.f32 1.442695, %v3113_v54  ;;  %v3112_v23 = vadd.f32 %v8199_v9, %v3104_v63  ;;  %v3111_v20 = vadd.f32 %v8204_v26, %v3101_v16 }
 0x571   : > { %4276 = vpow2.f32 %v3119_v2  ;;  %v3116_v14 = vsub.f32 0.0, %v3112_v23  ;;  %v3115_v35 = vsub.f32 0.0, %v3111_v20 }
 0x572   : > { %4278 = vpow2.f32 %v3117_v33 }
 0x573   : > { %v4269_v45 = vpop.eup %4268  ;;  %v3123_v51 = vmul.f32 1.442695, %v3116_v14  ;;  %v3121_v27 = vmul.f32 1.442695, %v3115_v35 }
 0x574   : > { %v4271_v50 = vpop.eup %4270  ;;  %v3238_v43 = vadd.f32 1.0, %v4269_v45 }
 0x575   : > { %v3237_v30 = vadd.f32 1.0, %v4271_v50  ;;  %4280 = vpow2.f32 %v3123_v51 }
 0x577   : > { %v4273_v32 = vpop.eup %4272  ;;  %4282 = vrcp.f32 %v3237_v30 }
 0x578   : > { %v4275_v59 = vpop.eup %4274  ;;  %4284 = vpow2.f32 %v3121_v27  ;;  %v3240_v24 = vadd.f32 1.0, %v4273_v32 }
 0x579   : > { %v3239_v13 = vadd.f32 1.0, %v4275_v59  ;;  %4286 = vrcp.f32 %v3238_v43 }
 0x57b   : > { %v4277_v8 = vpop.eup %4276  ;;  %4288 = vrcp.f32 %v3239_v13 }
 0x57c   : > { %v4279_v53 = vpop.eup %4278  ;;  %v3126_v60 = vadd.f32 1.0, %v4277_v8 }
 0x57d   : > { %v3125_v52 = vadd.f32 1.0, %v4279_v53 }
 0x57e   : > { %4290 = vrcp.f32 %v3126_v60 }
 0x57f   : > { %4292 = vrcp.f32 %v3240_v24  ;;  %v4281_v55 = vpop.eup %4280 }
 0x580   : > { %4294 = vrcp.f32 %v3125_v52  ;;  %v3128_v40 = vadd.f32 1.0, %v4281_v55 }
 0x581   : > { %v4283_v39 = vpop.eup %4282 }
 0x582   : > { %v4285_v25 = vpop.eup %4284  ;;  %3247 = vperm.xlu1 %3985, %v4283_v39  }
 0x583   : > { %v3127_v0 = vadd.f32 1.0, %v4285_v25  ;;  %v4287_v48 = vpop.eup %4286 }
 0x585   : > { %v4289_v46 = vpop.eup %4288  ;;  %4296 = vrcp.f32 %v3127_v0 }
 0x586   : > { %3252 = vperm.xlu1 %3985, %v4287_v48   ;;  %3257 = vperm.xlu0 %3984, %v4289_v46   ;;  %4298 = vrcp.f32 %v3128_v40 }
 0x588   : > { %v4291_v10 = vpop.eup %4290 }
 0x589   : > { %v4293_v5 = vpop.eup %4292 }
 0x58a   : > { %3262 = vperm.xlu1 %3985, %v4293_v5   ;;  %3140 = vperm.xlu0 %3984, %v4291_v10   ;;  %v4295_v62 = vpop.eup %4294 }
 0x58e   : > { %3135 = vperm.xlu1 %3985, %v4295_v62  }
 0x58f   : > { %v4297_v47 = vpop.eup %4296 }
 0x590   : > { %3145 = vperm.xlu0 %3984, %v4297_v47   ;;  %v4299_v12 = vpop.eup %4298 }
 0x592   : > { %3150 = vperm.xlu1 %3985, %v4299_v12  }
 0x5ba   : > { %v3326_v42 = vpop.xlane.xlu0 %3325  ;;  %v3323_v34 = vpop.xlane.xlu1 %3322 }
 0x5bb   : > { %v3334_v61 = vadd.f32 %v3326_v42, %v8187_v15  ;;  %v3333_v37 = vadd.f32 %v3323_v34, %v8192_v4 }
 0x5bd   : > { %v3338_v29 = vsub.f32 0.0, %v3334_v61  ;;  %v3337_v54 = vsub.f32 0.0, %v3333_v37 }
 0x5be   : > { %v3438_v63 = vpop.xlane.xlu0 %3437  ;;  %v3435_v16 = vpop.xlane.xlu1 %3434 }
 0x5bf   : > { %v3343_v2 = vmul.f32 1.442695, %v3338_v29  ;;  %v3341_v33 = vmul.f32 1.442695, %v3337_v54  ;;  %v3446_v23 = vadd.f32 %v3438_v63, %v8187_v15  ;;  %v3445_v20 = vadd.f32 %v3435_v16, %v8192_v4 }
 0x5c1   : > { %4300 = vpow2.f32 %v3343_v2  ;;  %v3450_v14 = vsub.f32 0.0, %v3446_v23  ;;  %v3449_v35 = vsub.f32 0.0, %v3445_v20  ;;  %v3696_v20 = vld [vmem:[%s9282_s14] sm:$0xff] }
 0x5c2   : > { %4302 = vpow2.f32 %v3341_v33  ;;  %v3332_v45 = vpop.xlane.xlu0 %3331  ;;  %v3329_v51 = vpop.xlane.xlu1 %3328 }
 0x5c3   : > { %v3455_v50 = vmul.f32 1.442695, %v3450_v14  ;;  %v3453_v27 = vmul.f32 1.442695, %v3449_v35  ;;  %v3336_v30 = vadd.f32 %v3332_v45, %v8199_v9  ;;  %v3335_v43 = vadd.f32 %v3329_v51, %v8204_v26  ;;  %v3682_v35 = vld [vmem:[%s9283_s9] sm:$0xff]  ;;  %s4454_s9 = sshll.u32 %s4541_s17, 4  ;;  %s4455_s9 = int_to_ptr.vmem [resolvable:$false] %s4454_s9 }
 0x5c4   : > { %s4456_s27 = scalar_lea.vmem %s4455_s9, 2048  ;;  %p4457_p12 = scmp.lt.s32.totalorder %s8284_s29, %s4455_s9 }
 0x5c5   : > { %4304 = vpow2.f32 %v3455_v50  ;;  %v3340_v32 = vsub.f32 0.0, %v3336_v30  ;;  %v3339_v59 = vsub.f32 0.0, %v3335_v43  ;;  %v9285_v43 = vld [vmem:[#allocation158_spill] sm:$0xff]  ;;  %p4458_p2 = scmp.lt.s32.totalorder %s4456_s27, %s4450_s18 }
 0x5c6   : > { %4306 = vpow2.f32 %v3453_v27  ;;  %v3444_v13 = vpop.xlane.xlu0 %3443  ;;  %v3441_v15 = vpop.xlane.xlu1 %3440  ;;  %v9284_v27 = vld [vmem:[#allocation157_spill] sm:$0xff] }
 0x5c7   : > { %v3347_v8 = vmul.f32 1.442695, %v3340_v32  ;;  %v3345_v4 = vmul.f32 1.442695, %v3339_v59  ;;  %v3448_v24 = vadd.f32 %v3444_v13, %v8199_v9  ;;  %v3447_v53 = vadd.f32 %v3441_v15, %v8204_v26  ;;  %v9286_v59 = vld [vmem:[#allocation146_spill] sm:$0xff]  ;;  %v9287_v15 = vld [vmem:[#allocation25_spill] sm:$0xff]  ;;  %p4459_p1 = por %p4458_p2, %p4457_p12 }
 0x5c9   : > { %4308 = vpow2.f32 %v3347_v8  ;;  %v3452_v60 = vsub.f32 0.0, %v3448_v24  ;;  %v3451_v52 = vsub.f32 0.0, %v3447_v53  ;;  %p4460_p4 = pnand %p4459_p1, %p4453_p7 }
 0x5ca   : > { %4310 = vpow2.f32 %v3345_v4 }
 0x5cb   : > { %v4301_v55 = vpop.eup %4300  ;;  %v3459_v39 = vmul.f32 1.442695, %v3452_v60  ;;  %v3457_v0 = vmul.f32 1.442695, %v3451_v52  ;;  %v9288_v52 = vld [vmem:[#allocation66_spill] sm:$0xff] }
 0x5cc   : > { %v4303_v25 = vpop.eup %4302  ;;  %v3350_v40 = vadd.f32 1.0, %v4301_v55 }
 0x5cd   : > { %v3349_v48 = vadd.f32 1.0, %v4303_v25  ;;  %4312 = vpow2.f32 %v3459_v39  ;;  %v9289_v39 = vld [vmem:[#allocation148_spill] sm:$0xff] }
 0x5ce   : > { %4314 = vrcp.f32 %v3350_v40 }
 0x5cf   : > { %v4305_v46 = vpop.eup %4304  ;;  %4316 = vrcp.f32 %v3349_v48 }
 0x5d0   : > { %v4307_v10 = vpop.eup %4306  ;;  %v3462_v5 = vadd.f32 1.0, %v4305_v46  ;;  %4318 = vpow2.f32 %v3457_v0 }
 0x5d1   : > { %v3461_v9 = vadd.f32 1.0, %v4307_v10 }
 0x5d2   : > { %4320 = vrcp.f32 %v3462_v5  ;;  %v9290_v5 = vld [vmem:[#allocation186_spill] sm:$0xff] }
 0x5d3   : > { %v4309_v26 = vpop.eup %4308  ;;  %4322 = vrcp.f32 %v3461_v9 }
 0x5d4   : > { %v4311_v62 = vpop.eup %4310  ;;  %v3352_v47 = vadd.f32 1.0, %v4309_v26  ;;  %v9291_v26 = vld [vmem:[#allocation72_spill] sm:$0xff] }
 0x5d5   : > { %v3351_v12 = vadd.f32 1.0, %v4311_v62 }
 0x5d6   : > { %4324 = vrcp.f32 %v3352_v47  ;;  %v9292_v47 = vld [vmem:[#allocation183_spill] sm:$0xff] }
 0x5d7   : > { %v4313_v42 = vpop.eup %4312  ;;  %4326 = vrcp.f32 %v3351_v12 }
 0x5d8   : > { %v4315_v34 = vpop.eup %4314  ;;  %v3464_v61 = vadd.f32 1.0, %v4313_v42  ;;  %v9293_v42 = vld [vmem:[#allocation156_spill] sm:$0xff] }
 0x5d9   : > { %v4317_v37 = vpop.eup %4316  ;;  %3364 = vperm.xlu1 %3985, %v4315_v34  }
 0x5da   : > { %v4319_v29 = vpop.eup %4318  ;;  %4328 = vrcp.f32 %v3464_v61  ;;  %3359 = vperm.xlu0 %3984, %v4317_v37   ;;  %v3497_v37 = vld [vmem:[#allocation8] sm:$0xf] }
 0x5db   : > { %v3463_v54 = vadd.f32 1.0, %v4319_v29  ;;  %v9294_v29 = vld [vmem:[#allocation54_spill] sm:$0xff] }
 0x5dc   : > { %v4321_v63 = vpop.eup %4320 }
 0x5dd   : > { %v4323_v16 = vpop.eup %4322  ;;  %4330 = vrcp.f32 %v3463_v54  ;;  %3476 = vperm.xlu1 %3985, %v4321_v63  }
 0x5de   : > { %3471 = vperm.xlu0 %3984, %v4323_v16   ;;  %v9295_v16 = vld [vmem:[#allocation29_spill] sm:$0xff] }
 0x5e0   : > { %v4325_v2 = vpop.eup %4324 }
 0x5e1   : > { %v4327_v33 = vpop.eup %4326  ;;  %3374 = vperm.xlu1 %3985, %v4325_v2  }
 0x5e2   : > { %3369 = vperm.xlu0 %3984, %v4327_v33  }
 0x5e4   : > { %v4329_v23 = vpop.eup %4328 }
 0x5e5   : > { %3486 = vperm.xlu1 %3985, %v4329_v23  }
 0x5e7   : > { %v4331_v14 = vpop.eup %4330 }
 0x5e8   : > { %3481 = vperm.xlu0 %3984, %v4331_v14  }
 0x5e9   : > { %3699 = vperm.xlu1 %3985, %v3696_v20   ;;  %v9296_v20 = vmov 0  }
 0x5ec   : > { %3685 = vperm.xlu0 %3984, %v3682_v35  }
 0x601   : > { %v3248_v45 = vpop.permute.xlu1 %3247 }
 0x602   : > { %v3265_v30 = vmul.f32 %v3248_v45, %v9284_v27  ;;  %v3266_v32 = vmul.f32 %v3248_v45, %v9285_v43 }
 0x605   : > { %v3258_v51 = vpop.permute.xlu0 %3257  ;;  %v3253_v50 = vpop.permute.xlu1 %3252 }
 0x606   : > { %v3267_v13 = vmul.f32 %v3253_v50, %v9286_v59  ;;  %v3268_v8 = vmul.f32 %v3253_v50, %v9287_v15  ;;  %v3269_v55 = vmul.f32 %v3258_v51, %v9288_v52  ;;  %v3270_v25 = vmul.f32 %v3258_v51, %v9289_v39 }
 0x608   : > { %v3500_v4 = vpack.c.bf16 %v3267_v13, %v3265_v30  ;;  %v3501_v24 = vpack.c.bf16 %v3268_v8, %v3266_v32 }
 0x609   : > { %v3141_v53 = vpop.permute.xlu0 %3140  ;;  %v3263_v60 = vpop.permute.xlu1 %3262 }
 0x60a   : > { %v3271_v40 = vmul.f32 %v3263_v60, %v7747_v44  ;;  %v3272_v0 = vmul.f32 %v3263_v60, %v7756_v41  ;;  %3559 = vmatprep.subr.bf16.mxu1 %v3501_v24  ;;  %v3155_v9 = vmul.f32 %v3141_v53, %v9290_v5  ;;  %v3156_v62 = vmul.f32 %v3141_v53, %v9291_v26 }
 0x60b   : > { %3560 = vmatpush1.bf16.msra.mxu1 %v3500_v4 }
 0x60c   : > { %v3508_v48 = vpack.c.bf16 %v3271_v40, %v3269_v55  ;;  %v3509_v46 = vpack.c.bf16 %v3272_v0, %v3270_v25  ;;  %v4332_v40 = vld [vmem:[%s4812_s28 + $0x8] sm:$0xff] }
 0x60d   : > { %v3136_v10 = vpop.permute.xlu1 %3135  ;;  %v3712_v0 = vunpack.c.l.bf16 %v4332_v40 }
 0x60e   : > { %v3153_v12 = vmul.f32 %v3136_v10, %v9292_v47  ;;  %v3154_v34 = vmul.f32 %v3136_v10, %v9293_v42  ;;  %3561 = vmatprep.subr.bf16.mxu1 %v3509_v46  ;;  %v3713_v10 = vunpack.c.h.bf16 %v4332_v40 }
 0x60f   : > { %v3146_v61 = vpop.permute.xlu0 %3145  ;;  %3562 = vmatpush1.bf16.msra.mxu1 %v3508_v48 }
 0x610   : > { %v3498_v44 = vpack.c.bf16 %v3155_v9, %v3153_v12  ;;  %v3499_v41 = vpack.c.bf16 %v3156_v62, %v3154_v34  ;;  %v3157_v54 = vmul.f32 %v3146_v61, %v9294_v29  ;;  %v3158_v2 = vmul.f32 %v3146_v61, %v9295_v16  ;;  %v4333_v34 = vld [vmem:[%s4812_s28] sm:$0xff] }
 0x611   : > { %v3151_v63 = vpop.permute.xlu1 %3150  ;;  %v3710_v61 = vunpack.c.l.bf16 %v4333_v34 }
 0x612   : > { %v3159_v33 = vmul.f32 %v3151_v63, %v7767_v22  ;;  %v3160_v23 = vmul.f32 %v3151_v63, %v7775_v31  ;;  %3518 = vmatprep.subr.bf16.mxu0 %v3499_v41  ;;  %3886 = vmatmul.mubr.msk.bf16.vlgmr.msra.gmra.mrb[16].mxu1 %vm3514_vm11, %v3497_v37  ;;  %v3711_v41 = vunpack.c.h.bf16 %v4333_v34 }
 0x613   : > { %3519 = vmatpush1.bf16.msra.mxu0 %v3498_v44  ;;  %3673 = vmatprep.mubr.bf16.mxu1 %v9296_v20 }
 0x614   : > { %v3506_v14 = vpack.c.bf16 %v3159_v33, %v3157_v54  ;;  %v3507_v35 = vpack.c.bf16 %v3160_v23, %v3158_v2 }
 0x616   : > { %3520 = vmatprep.subr.bf16.mxu0 %v3507_v35 }
 0x617   : > { %3521 = vmatpush1.bf16.msra.mxu0 %v3506_v14  ;;  %v4334_v14 = vld [vmem:[%s4812_s28 + $0x10] sm:$0xff] }
 0x618   : > { %v3714_v35 = vunpack.c.l.bf16 %v4334_v14 }
 0x61a   : > { %3885 = vmatmul.mubr.msk.bf16.vlgmr.msra.gmra.mrb[16].mxu0 %vm3514_vm11, %v3497_v37 }
 0x61b   : > { %3632 = vmatprep.mubr.bf16.mxu0 %v9296_v20 }
 0x658   : > { %v3365_v45 = vpop.permute.xlu1 %3364 }
 0x659   : > { %v3360_v51 = vpop.permute.xlu0 %3359  ;;  %v3379_v22 = vmul.f32 %v3365_v45, %v7976_v6  ;;  %v3380_v31 = vmul.f32 %v3365_v45, %v7980_v49 }
 0x65a   : > { %v3377_v50 = vmul.f32 %v3360_v51, %v7949_v1  ;;  %v3378_v27 = vmul.f32 %v3360_v51, %v7959_v7 }
 0x65c   : > { %v3502_v30 = vpack.c.bf16 %v3379_v22, %v3377_v50  ;;  %v3503_v43 = vpack.c.bf16 %v3380_v31, %v3378_v27  ;;  %v3477_v32 = vpop.permute.xlu1 %3476  ;;  %v3715_v22 = vunpack.c.h.bf16 %v4334_v14 }
 0x65d   : > { %v3472_v59 = vpop.permute.xlu0 %3471  ;;  %v3491_v13 = vmul.f32 %v3477_v32, %v8028_v17  ;;  %v3492_v15 = vmul.f32 %v3477_v32, %v8031_v56 }
 0x65e   : > { %v3489_v8 = vmul.f32 %v3472_v59, %v7999_v28  ;;  %v3490_v4 = vmul.f32 %v3472_v59, %v8008_v57  ;;  %3600 = vmatprep.subr.bf16.mxu0 %v3503_v43 }
 0x65f   : > { %3601 = vmatpush1.bf16.msra.mxu0 %v3502_v30 }
 0x660   : > { %v3504_v6 = vpack.c.bf16 %v3491_v13, %v3489_v8  ;;  %v3505_v49 = vpack.c.bf16 %v3492_v15, %v3490_v4  ;;  %v3375_v24 = vpop.permute.xlu1 %3374  ;;  %v4335_v15 = vld [vmem:[%s4812_s28 + $0x18] sm:$0xff]  ;;  %s9297_s28 = sld [smem:[#allocation198_spill]] }
 0x661   : > { %v3370_v1 = vpop.permute.xlu0 %3369  ;;  %v3383_v7 = vmul.f32 %v3375_v24, %v8058_v36  ;;  %v3384_v53 = vmul.f32 %v3375_v24, %v8061_v18  ;;  %v3716_v8 = vunpack.c.l.bf16 %v4335_v15 }
 0x662   : > { %v3381_v60 = vmul.f32 %v3370_v1, %v8036_v38  ;;  %v3382_v17 = vmul.f32 %v3370_v1, %v8039_v11  ;;  %3641 = vmatprep.subr.bf16.mxu1 %v3505_v49  ;;  %v3717_v49 = vunpack.c.h.bf16 %v4335_v15 }
 0x663   : > { %3642 = vmatpush1.bf16.msra.mxu1 %v3504_v6 }
 0x664   : > { %v3510_v56 = vpack.c.bf16 %v3383_v7, %v3381_v60  ;;  %v3511_v28 = vpack.c.bf16 %v3384_v53, %v3382_v17  ;;  %v3487_v52 = vpop.permute.xlu1 %3486 }
 0x665   : > { %v3495_v57 = vmul.f32 %v3487_v52, %v8052_v21  ;;  %v3496_v55 = vmul.f32 %v3487_v52, %v8055_v19 }
 0x666   : > { %3602 = vmatprep.subr.bf16.mxu0 %v3511_v28  ;;  %s8282_s14 = scalar_lea.hbm %s9297_s28, %s3895_s25 }
 0x667   : > { %v3482_v39 = vpop.permute.xlu0 %3481  ;;  %3603 = vmatpush1.bf16.msra.mxu0 %v3510_v56 }
 0x668   : > { %v3493_v36 = vmul.f32 %v3482_v39, %v8042_v3  ;;  %v3494_v38 = vmul.f32 %v3482_v39, %v8047_v58  ;;  %v3700_v46 = vpop.permute.xlu1 %3699 }
 0x66a   : > { %v3512_v18 = vpack.c.bf16 %v3495_v57, %v3493_v36  ;;  %v3513_v11 = vpack.c.bf16 %v3496_v55, %v3494_v38  ;;  %3887 = vmatmul.mubr.msk.bf16.vlgmr.msra.gmra.mrb[20].mxu0 %vm3514_vm11, %v3497_v37 }
 0x66b   : > { %v3686_v25 = vpop.permute.xlu0 %3685 }
 0x66c   : > { %3643 = vmatprep.subr.bf16.mxu1 %v3513_v11 }
 0x66d   : > { %3644 = vmatpush1.bf16.msra.mxu1 %v3512_v18 }
 0x670   : > { %3888 = vmatmul.mubr.msk.bf16.vlgmr.msra.gmra.mrb[20].mxu1 %vm3514_vm11, %v3497_v37 }
 0x6e5   : > { %v3593_v21 = vpop.f32.mrb[16].mxu1 }
 0x6e6   : > { %v3690_v19 = vmul.f32 %v3686_v25, %v3593_v21  ;;  %v3595_v48 = vpop.f32.mrb[17].mxu1 }
 0x6e7   : > { %v3691_v3 = vmul.f32 %v3686_v25, %v3595_v48  ;;  %v3597_v58 = vpop.f32.mrb[18].mxu1 }
 0x6e8   : > { %v3704_v5 = vadd.f32 %v3700_v46, %v3690_v19  ;;  %v3598_v9 = vpop.f32.mrb[19].mxu1 }
 0x6e9   : > { %v3705_v26 = vadd.f32 %v3700_v46, %v3691_v3 }
 0x6ea   : > { %v3720_v62 = vadd.f32 %v3712_v0, %v3704_v5 }
 0x6eb   : > { %v3721_v47 = vadd.f32 %v3713_v10, %v3705_v26 }
 0x6ec   : > { %3728 = vst [vmem:[%s8266_s13 + $0x10] sm:$0xff] %v3720_v62 }
 0x6ed   : > { %3729 = vst [vmem:[%s8266_s13 + $0x18] sm:$0xff] %v3721_v47  ;;  %v3552_v12 = vpop.f32.mrb[16].mxu0 }
 0x6ee   : > { %v3688_v42 = vmul.f32 %v3686_v25, %v3552_v12  ;;  %v3554_v37 = vpop.f32.mrb[17].mxu0 }
 0x6ef   : > { %v3689_v44 = vmul.f32 %v3686_v25, %v3554_v37  ;;  %v3556_v29 = vpop.f32.mrb[18].mxu0 }
 0x6f0   : > { %v3702_v54 = vadd.f32 %v3700_v46, %v3688_v42  ;;  %v3557_v63 = vpop.f32.mrb[19].mxu0 }
 0x6f1   : > { %v3703_v16 = vadd.f32 %v3700_v46, %v3689_v44 }
 0x6f2   : > { %v3718_v2 = vadd.f32 %v3710_v61, %v3702_v54 }
 0x6f3   : > { %v3719_v33 = vadd.f32 %v3711_v41, %v3703_v16 }
 0x6f4   : > { %3726 = vst [vmem:[%s8266_s13] sm:$0xff] %v3718_v2 }
 0x6f5   : > { %3727 = vst [vmem:[%s8266_s13 + $0x8] sm:$0xff] %v3719_v33 }
 0x73d   : > { %v3634_v23 = vpop.f32.mrb[20].mxu0 }
 0x73e   : > { %v3692_v20 = vmul.f32 %v3686_v25, %v3634_v23  ;;  %v3636_v45 = vpop.f32.mrb[21].mxu0 }
 0x73f   : > { %v3693_v51 = vmul.f32 %v3686_v25, %v3636_v45  ;;  %v3638_v31 = vpop.f32.mrb[22].mxu0 }
 0x740   : > { %v3706_v50 = vadd.f32 %v3700_v46, %v3692_v20  ;;  %v3639_v27 = vpop.f32.mrb[23].mxu0 }
 0x741   : > { %v3707_v30 = vadd.f32 %v3700_v46, %v3693_v51 }
 0x742   : > { %v3722_v43 = vadd.f32 %v3714_v35, %v3706_v50 }
 0x743   : > { %v3723_v32 = vadd.f32 %v3715_v22, %v3707_v30  ;;  %v3675_v59 = vpop.f32.mrb[20].mxu1 }
 0x744   : > { %3730 = vst [vmem:[%s8266_s13 + $0x20] sm:$0xff] %v3722_v43  ;;  %v3694_v13 = vmul.f32 %v3686_v25, %v3675_v59  ;;  %v3677_v4 = vpop.f32.mrb[21].mxu1 }
 0x745   : > { %3731 = vst [vmem:[%s8266_s13 + $0x28] sm:$0xff] %v3723_v32  ;;  %v3695_v6 = vmul.f32 %v3686_v25, %v3677_v4  ;;  %v3679_v24 = vpop.f32.mrb[22].mxu1 }
 0x746   : > { %v3708_v1 = vadd.f32 %v3700_v46, %v3694_v13  ;;  %v3680_v7 = vpop.f32.mrb[23].mxu1 }
 0x747   : > { %v3709_v53 = vadd.f32 %v3700_v46, %v3695_v6 }
 0x748   : > { %v3724_v60 = vadd.f32 %v3716_v8, %v3708_v1 }
 0x749   : > { %v3725_v17 = vadd.f32 %v3717_v49, %v3709_v53 }
 0x74a   : > { %3732 = vst [vmem:[%s8266_s13 + $0x30] sm:$0xff] %v3724_v60 }
 0x74b   : > { %3733 = vst [vmem:[%s8266_s13 + $0x38] sm:$0xff] %v3725_v17 }
 0x74c   : > { %4463 = shalt.err (!%p4460_p4)
}
 0x74d   : > { %s4464_s23 = scalar_lea.hbm %s8282_s14, 1024  ;;  %s4468_s19 = scalar_lea.hbm %s9297_s28, 2048 }
 0x74e   : > { %p4465_p0 = scmp.ne.s32.totalorder %s8282_s14, %s4464_s23  ;;  %p4469_p8 = scmp.lt.u32.totalorder %s8282_s14, %s9297_s28 }
 0x74f   : > { %p4470_p13 = scmp.lt.u32.totalorder %s4468_s19, %s4464_s23  ;;  %p4472_p10 = scmp.lt.u32.totalorder %s4464_s23, %s8282_s14 }
 0x750   : > { %p4466_p9 = pnand %p4465_p0, %p4763_p5 }
 0x751   : > { %p4471_p6 = por %p4470_p13, %p4469_p8 }
 0x752   : > { %p4467_p11 = pneg %p4466_p9 }
 0x753   : > { %p4473_p3 = por %p4472_p10, %p4471_p6 }
 0x755   : > { %p4474_p7 = pnand %p4473_p3, %p4467_p11 }
 0x757   : > { %4477 = shalt.err (!%p4474_p7)
}
 0x758   : > { %3910 = dma.vmem_to_hbm [thread:$0]  (%p4763_p5), %s8284_s29, 1024, %s8282_s14, %s3735_s26  }
 0x759 PF: > { %s9298_s18 = sld [smem:[#allocation15_spill]]  ;;  %s9299_s9 = sld [smem:[#allocation16_spill]] }
 0x75a   : > { %p9301_p2 = scmp.ge.s32.totalorder %s4524_s16, 2 }
 0x75f   : > { %s3761_s27 = sand.u32 1, %s9298_s18   ;;  %p9300_p12 = scmp.ne.s32.totalorder %s9299_s9, 0 }
 0x760   : > { %s3762_s13 = scalar_lea.sflag [#allocation4], %s3761_s27 }
 0x761   : > { %p3927_p1 = pnand %p9301_p2, %p9300_p12 }
 0x763   : > { %4507 = dma.done.wait (!%p3927_p1), %s3762_s13, 1024  }
 0x764   : > { %4509 = vsyncadd (!%p3927_p1), %s3762_s13, 4294966272  ;;  %p29_p4 = scmp.ge.s32.totalorder %s4749_s12, 4   ;;  %s9302_s29 = smov %s4516_s30 }
 0x765   : > { %s9303_s30 = smov %s4520_s15  ;;  %s9304_s15 = smov %s4759_s7 }
 0x766   : > { %s9305_s16 = smov %s4749_s12  ;;  %31 = sbr.rel (!%p29_p4) target bundleno = 14 (0xe), region = 141 }
 0x76d   :  { %3767 = vsyncpa [#allocation3], 1 }
 0x76e   :  { %3769 = vsyncpa [#allocation3 + $0x1], 1 }
 0x76f   :  { %3770 = vsyncpa [#allocation6], 1 }
 0x770   :  { %3771 = vsyncpa [#allocation9], 1 }
 0x771   :  { %3772 = vsyncpa [#allocation4], 1 }
 0x772   :  { %3774 = vsyncpa [#allocation4 + $0x1], 1 }

</bundles_post_ra>
